<compile_context>
chip_gen: v6e
topology: v6e:2x2x1
jax: 0.10.0
libtpu: 0.0.40
codegen_flags: <defaults>
</compile_context>

<pallas_src>
import jax
import jax.numpy as jnp
import numpy as np
from jax.experimental import pallas as pl
from jax.experimental.pallas import tpu as pltpu

# TODO(synk): the pretrained BERT encoder (self._petrained_language_model) has
# no clean small Pallas equivalent here; its pooler_output is taken as kernel
# input instead of being recomputed from token ids.

_LANE = 128
_SUBLANE = 8


def _round_up(n, m):
    return ((n + m - 1) // m) * m


def _pad_axis(x, axis, new_size, value=0):
    pad = new_size - x.shape[axis]
    if pad == 0:
        return x
    widths = [(0, 0)] * x.ndim
    widths[axis] = (0, pad)
    return jnp.pad(x, widths, constant_values=value)


def _pad_gate_cols(w, h, h_pad):
    """Pad the trailing (4*h) LSTM gate axis to (4*h_pad), padding each of the
    four [i, f, g, o] gate blocks independently with zeros (numerically inert:
    padded lanes of c/h stay exactly 0)."""
    lead = w.shape[:-1]
    w4 = w.reshape(lead + (4, h))
    w4 = jnp.pad(w4, [(0, 0)] * len(lead) + [(0, 0), (0, h_pad - h)])
    return w4.reshape(lead + (4 * h_pad,))


def robert_kernel(x_ref, idx_ref, wih_ref, whh_ref, b_ref, wfc_ref, bfc_ref,
                  out_ref, xg_ref, h_scr, c_scr, sel_scr):
    """Grid = (batch tiles, time chunks); time chunks are sequential.

      x_ref   : (Tc, TB, D)   act-dtype  document embeddings (time-major tile)
      idx_ref : (TB, 1)       i32  index of last valid timestep per sentence
      wih_ref : (D, 4*Hp)     mm-dtype   LSTM input-hidden weights (padded)
      whh_ref : (Hp, 4*Hp)    mm-dtype   LSTM hidden-hidden weights (padded)
      b_ref   : (1, 4*Hp)     f32  b_ih + b_hh (padded gates)
      wfc_ref : (Hp, Lp)      mm-dtype   collapsed fc head W1.W2.W3 (padded)
      bfc_ref : (1, Lp)       f32  collapsed fc head bias (padded)
      out_ref : (TB, Lp)      f32  padded logits (written at last time chunk)
      xg_ref  : (Tc*TB, 4*Hp) act-dtype  VMEM scratch: hoisted input proj.
      h/c/sel_scr : (TB, Hp)  f32  recurrent state carried across time chunks
    """
    Tc, TB, D = x_ref.shape
    Hp = whh_ref.shape[0]
    tc = pl.program_id(1)
    n_tc = pl.num_programs(1)

    # Fresh state at the start of every batch tile's time sweep.
    @pl.when(tc == 0)
    def _():
        h_scr[...] = jnp.zeros_like(h_scr)
        c_scr[...] = jnp.zeros_like(c_scr)
        sel_scr[...] = jnp.zeros_like(sel_scr)

    wih = wih_ref[...]
    whh = whh_ref[...]

    # 1) Hoisted input projection (+ bias, folded in once) for the whole time
    #    chunk: one large MXU matmul, kept out of the serial recurrence.
    x_flat = x_ref[...].reshape(Tc * TB, D).astype(wih.dtype)
    xg_ref[...] = (jnp.dot(x_flat, wih, preferred_element_type=jnp.float32)
                   + b_ref[...]).astype(xg_ref.dtype)              # (Tc*TB,4Hp)

    idx = idx_ref[...]                                             # (TB, 1) i32
    t0 = tc * Tc                                                   # global base

    def sigmoid(v):
        # One EUP tanh instead of exp + divide; exact identity for sigmoid.
        return 0.5 * jnp.tanh(0.5 * v) + 0.5

    def step(s, carry):
        h, c, sel = carry
        row = pl.multiple_of(s * TB, TB)
        gates = (xg_ref[pl.ds(row, TB), :].astype(jnp.float32)
                 + jnp.dot(h.astype(whh.dtype), whh,
                           preferred_element_type=jnp.float32))    # (TB, 4Hp)
        # PyTorch LSTM gate order: input, forget, cell(g), output.
        # Hp is a multiple of 128 -> all slices are lane-aligned full vregs.
        i_g = sigmoid(gates[:, 0:Hp])
        f_g = sigmoid(gates[:, Hp:2 * Hp])
        g_g = jnp.tanh(gates[:, 2 * Hp:3 * Hp])
        o_g = sigmoid(gates[:, 3 * Hp:4 * Hp])
        c = f_g * c + i_g * g_g
        h = o_g * jnp.tanh(c)
        # lstm_outputs[b, nseg[b]-1] == h after global step t where t == idx[b]
        sel = jnp.where(idx == (t0 + s), h, sel)
        return h, c, sel

    carry0 = (h_scr[...], c_scr[...], sel_scr[...])
    # unroll kept at 1: at TB=128 a single step's gates are already >=64 vregs.
    h, c, sel = jax.lax.fori_loop(0, Tc, step, carry0, unroll=1)
    h_scr[...] = h
    c_scr[...] = c
    sel_scr[...] = sel

    # Collapsed fc head (single matmul) + lane-dense store on the last chunk.
    @pl.when(tc == n_tc - 1)
    def _():
        out_ref[...] = (jnp.dot(sel.astype(wfc_ref.dtype), wfc_ref[...],
                                preferred_element_type=jnp.float32)
                        + bfc_ref[...])


def robert_forward(document_embedding, num_segments, params, num_labels,
                   *, batch_tile=128, time_tile=8,
                   matmul_dtype=jnp.bfloat16):
    """document_embedding: (B, T, D) f32 pooler outputs (post-dropout, eval).
       num_segments      : (B,) int, assumed 1 <= num_segments <= T
                           (0 wraps to the last timestep like PyTorch's -1).
       matmul_dtype      : jnp.bfloat16 (default; MXU-native, f32 accumulation
                           and f32 gate/state math) or jnp.float32.
    """
    B, T, D = document_embedding.shape
    H = params["w_hh"].shape[0]

    wdt = matmul_dtype
    if wdt == jnp.bfloat16:
        assert batch_tile % 16 == 0   # bf16 sublane packing
    else:
        assert batch_tile % _SUBLANE == 0
    TB = batch_tile
    Tc = min(time_tile, T)
    Bp = _round_up(B, TB)
    Tp = _round_up(T, Tc)
    Hp = _round_up(H, _LANE)
    Lp = _round_up(num_labels, _LANE)

    # Time-major so every time chunk is a contiguous (Tc*TB, D) slab; pad the
    # batch to the tile size and T to a multiple of the time chunk (padded
    # timesteps carry zeros and are never selected since idx <= T-1).
    x_tbd = jnp.transpose(document_embedding, (1, 0, 2)).astype(wdt)
    x_tbd = _pad_axis(_pad_axis(x_tbd, 1, Bp), 0, Tp)              # (Tp, Bp, D)

    # Index of the last valid LSTM output per sentence (PyTorch wrap for 0).
    # Padded batch rows get idx 0 and produce garbage logits that are sliced
    # off at the end (benign). num_segments > T would silently wrap (documented
    # assumption, matches no-guard behaviour of the module within [1, T]).
    last_idx = jnp.mod(num_segments.astype(jnp.int32) - 1, T)
    last_idx = _pad_axis(last_idx, 0, Bp).reshape(Bp, 1)           # (Bp, 1)

    # LSTM weights pre-transposed to (in, 4H); pad each gate block to Hp lanes.
    wih = _pad_gate_cols(params["w_ih"], H, Hp).astype(wdt)            # (D,4Hp)
    whh = _pad_axis(_pad_gate_cols(params["w_hh"], H, Hp), 0, Hp).astype(wdt)
    b_l = _pad_gate_cols(params["b_lstm"], H, Hp).astype(jnp.float32)  # (1,4Hp)

    # Collapse the fc head host-side (no nonlinearities between Linears):
    #   W = W1.W2.W3,  b = (b1.W2 + b2).W3 + b3   -> single in-kernel matmul.
    w_fc = (params["w1"] @ params["w2"]) @ params["w3"]                # (H, L)
    b_fc = (params["b1"] @ params["w2"] + params["b2"]) @ params["w3"] \
        + params["b3"]                                                 # (1, L)
    w_fc = _pad_axis(_pad_axis(w_fc, 0, Hp), 1, Lp).astype(wdt)        # (Hp,Lp)
    b_fc = _pad_axis(b_fc, 1, Lp).astype(jnp.float32)                  # (1, Lp)

    def whole(shape):
        nd = len(shape)
        return pl.BlockSpec(shape, lambda b, t: (0,) * nd)

    grid = (Bp // TB, Tp // Tc)
    # NOTE: constant-weight blocks could be single-buffered
    # (pipeline_mode=pl.Buffered(1)) to save VMEM on v7x; left at the default.
    out_padded = pl.pallas_call(
        robert_kernel,
        out_shape=jax.ShapeDtypeStruct((Bp, Lp), jnp.float32),
        grid=grid,
        in_specs=[
            pl.BlockSpec((Tc, TB, D), lambda b, t: (t, b, 0)),   # x (time-major)
            pl.BlockSpec((TB, 1), lambda b, t: (b, 0)),          # last-out idx
            whole(wih.shape), whole(whh.shape), whole(b_l.shape),
            whole(w_fc.shape), whole(b_fc.shape),
        ],
        out_specs=pl.BlockSpec((TB, Lp), lambda b, t: (b, 0)),   # lane-dense
        scratch_shapes=[
            pltpu.VMEM((Tc * TB, 4 * Hp), wdt),        # hoisted input proj.
            pltpu.VMEM((TB, Hp), jnp.float32),         # h (carried over t)
            pltpu.VMEM((TB, Hp), jnp.float32),         # c (carried over t)
            pltpu.VMEM((TB, Hp), jnp.float32),         # selected last output
        ],
        compiler_params=pltpu.CompilerParams(
            dimension_semantics=("parallel", "arbitrary"),  # batch || , time seq
            vmem_limit_bytes=48 * 1024 * 1024),
    )(x_tbd, last_idx, wih, whh, b_l, w_fc, b_fc)

    return out_padded[:B, :num_labels]


def reference_forward(document_embedding, num_segments, params, num_labels):
    """Pure-JAX reference mirroring the PyTorch forward (eval mode)."""
    B, T, D = document_embedding.shape
    H = params["w_hh"].shape[0]
    h = jnp.zeros((B, H), jnp.float32)
    c = jnp.zeros((B, H), jnp.float32)
    outs = []
    for t in range(T):
        x_t = document_embedding[:, t, :]
        gates = x_t @ params["w_ih"] + h @ params["w_hh"] + params["b_lstm"]
        i_g = jax.nn.sigmoid(gates[:, 0:H])
        f_g = jax.nn.sigmoid(gates[:, H:2 * H])
        g_g = jnp.tanh(gates[:, 2 * H:3 * H])
        o_g = jax.nn.sigmoid(gates[:, 3 * H:4 * H])
        c = f_g * c + i_g * g_g
        h = o_g * jnp.tanh(c)
        outs.append(h)
    lstm_outputs = jnp.stack(outs, axis=1)                      # (B, T, H)
    last = lstm_outputs[jnp.arange(B), num_segments - 1]        # (B, H)
    y = last @ params["w1"] + params["b1"]
    y = y @ params["w2"] + params["b2"]
    return y @ params["w3"] + params["b3"]


if __name__ == "__main__":
    # Small, forward-consistent shapes.
    num_sentences = 2        # batch of documents
    max_segments = 8         # segments per document (LSTM sequence length)
    size_pretrained = 32     # stand-in for BERT hidden_size
    lstm_hidden_dim = 64
    dense_hidden_dim = 32
    num_labels = 3
    init_range = 0.02        # BERT initializer_range

    key = jax.random.PRNGKey(0)
    ks = jax.random.split(key, 10)

    # Pooler outputs / document embedding (dropout is identity in eval mode).
    document_embedding = jax.random.normal(
        ks[0], (num_sentences, max_segments, size_pretrained), jnp.float32)
    num_segments = jnp.array([5, 8], dtype=jnp.int32)

    H, D = lstm_hidden_dim, size_pretrained
    lstm_scale = 1.0 / np.sqrt(H)
    params = {
        # LSTM weights stored pre-transposed: (in, 4H)
        "w_ih": jax.random.uniform(ks[1], (D, 4 * H), jnp.float32,
                                   -lstm_scale, lstm_scale),
        "w_hh": jax.random.uniform(ks[2], (H, 4 * H), jnp.float32,
                                   -lstm_scale, lstm_scale),
        "b_lstm": (jax.random.uniform(ks[3], (1, 4 * H), jnp.float32,
                                      -lstm_scale, lstm_scale)
                   + jax.random.uniform(ks[4], (1, 4 * H), jnp.float32,
                                        -lstm_scale, lstm_scale)),  # b_ih+b_hh
        # fc head (module init: normal(0, initializer_range), zero bias)
        "w1": init_range * jax.random.normal(
            ks[5], (H, dense_hidden_dim), jnp.float32),
        "b1": jnp.zeros((1, dense_hidden_dim), jnp.float32),
        "w2": init_range * jax.random.normal(
            ks[6], (dense_hidden_dim, dense_hidden_dim), jnp.float32),
        "b2": jnp.zeros((1, dense_hidden_dim), jnp.float32),
        "w3": init_range * jax.random.normal(
            ks[7], (dense_hidden_dim, num_labels), jnp.float32),
        "b3": jnp.zeros((1, num_labels), jnp.float32),
    }

    ref = reference_forward(document_embedding, num_segments, params, num_labels)

    # f32 path: matches the reference up to f32 reassociation (collapsed fc
    # head, tanh-form sigmoid).
    logits_f32 = robert_forward(document_embedding, num_segments, params,
                                num_labels, matmul_dtype=jnp.float32)
    logits_f32 = jax.block_until_ready(logits_f32)
    np.testing.assert_allclose(np.asarray(logits_f32), np.asarray(ref),
                               rtol=1e-4, atol=1e-5)
    assert logits_f32.shape == (num_sentences, num_labels)

    # Default bf16 path: bf16 weights/activations on the MXU, f32 accumulation
    # and f32 gate/state math (looser check; W_hh error compounds over T).
    logits_bf16 = robert_forward(document_embedding, num_segments, params,
                                 num_labels)
    logits_bf16 = jax.block_until_ready(logits_bf16)
    assert logits_bf16.shape == (num_sentences, num_labels)
    np.testing.assert_allclose(np.asarray(logits_bf16), np.asarray(ref),
                               rtol=1e-1, atol=1e-3)

    print("KERNEL_OK")
</pallas_src>

<mosaic_0001>
module attributes {stable_mosaic.version = 11 : i64} {
  func.func @robert_kernel(%arg0: i32, %arg1: i32, %arg2: memref<8x128x32xf32, #tpu.memory_space<vmem>>, %arg3: memref<128x1xi32, #tpu.memory_space<vmem>>, %arg4: memref<32x512xf32, #tpu.memory_space<vmem>>, %arg5: memref<128x512xf32, #tpu.memory_space<vmem>>, %arg6: memref<1x512xf32, #tpu.memory_space<vmem>>, %arg7: memref<128x128xf32, #tpu.memory_space<vmem>>, %arg8: memref<1x128xf32, #tpu.memory_space<vmem>>, %arg9: memref<128x128xf32, #tpu.memory_space<vmem>>, %arg10: memref<1024x512xf32, #tpu.memory_space<vmem>>, %arg11: memref<128x128xf32, #tpu.memory_space<vmem>>, %arg12: memref<128x128xf32, #tpu.memory_space<vmem>>, %arg13: memref<128x128xf32, #tpu.memory_space<vmem>>) attributes {dimension_semantics = [#tpu.dimension_semantics<parallel>, #tpu.dimension_semantics<arbitrary>], iteration_bounds = array<i64: 1, 1>, scalar_prefetch = 0 : i64, scratch_operands = 4 : i64, tpu.core_type = #tpu.core_type<tc>, window_params = [{transform_indices = @transform_0, window_bounds = array<i64: 8, 128, 32>}, {transform_indices = @transform_1, window_bounds = array<i64: 128, 1>}, {pipeline_mode = #tpu.pipeline_mode<synchronous>, transform_indices = @transform_2, window_bounds = array<i64: 32, 512>}, {pipeline_mode = #tpu.pipeline_mode<synchronous>, transform_indices = @transform_3, window_bounds = array<i64: 128, 512>}, {pipeline_mode = #tpu.pipeline_mode<synchronous>, transform_indices = @transform_4, window_bounds = array<i64: 1, 512>}, {pipeline_mode = #tpu.pipeline_mode<synchronous>, transform_indices = @transform_5, window_bounds = array<i64: 128, 128>}, {pipeline_mode = #tpu.pipeline_mode<synchronous>, transform_indices = @transform_6, window_bounds = array<i64: 1, 128>}, {transform_indices = @transform_7, window_bounds = array<i64: 128, 128>}]} {
    %c0_i32 = arith.constant 0 : i32
    %0 = arith.cmpi eq, %arg1, %c0_i32 : i32
    %1 = arith.extui %0 : i1 to i32
    %c0_i32_0 = arith.constant 0 : i32
    %2 = arith.cmpi ne, %1, %c0_i32_0 : i32
    scf.if %2 {
      %cst_30 = arith.constant 0.000000e+00 : f32
      %25 = vector.broadcast %cst_30 : f32 to vector<128x128xf32>
      %c0_31 = arith.constant 0 : index
      %c0_32 = arith.constant 0 : index
      %26 = vector.load %arg11[%c0_31, %c0_32] : memref<128x128xf32, #tpu.memory_space<vmem>>, vector<128x128xf32>
      tpu.vector_store %arg11[%c0_31, %c0_32], %25 {strides = array<i32>} : memref<128x128xf32, #tpu.memory_space<vmem>>, vector<128x128xf32>,
      %cst_33 = arith.constant 0.000000e+00 : f32
      %27 = vector.broadcast %cst_33 : f32 to vector<128x128xf32>
      %c0_34 = arith.constant 0 : index
      %c0_35 = arith.constant 0 : index
      %28 = vector.load %arg12[%c0_34, %c0_35] : memref<128x128xf32, #tpu.memory_space<vmem>>, vector<128x128xf32>
      tpu.vector_store %arg12[%c0_34, %c0_35], %27 {strides = array<i32>} : memref<128x128xf32, #tpu.memory_space<vmem>>, vector<128x128xf32>,
      %cst_36 = arith.constant 0.000000e+00 : f32
      %29 = vector.broadcast %cst_36 : f32 to vector<128x128xf32>
      %c0_37 = arith.constant 0 : index
      %c0_38 = arith.constant 0 : index
      %30 = vector.load %arg13[%c0_37, %c0_38] : memref<128x128xf32, #tpu.memory_space<vmem>>, vector<128x128xf32>
      tpu.vector_store %arg13[%c0_37, %c0_38], %29 {strides = array<i32>} : memref<128x128xf32, #tpu.memory_space<vmem>>, vector<128x128xf32>,
    } else {
    }
    %c0 = arith.constant 0 : index
    %c0_1 = arith.constant 0 : index
    %3 = vector.load %arg4[%c0, %c0_1] : memref<32x512xf32, #tpu.memory_space<vmem>>, vector<32x512xf32>
    %c0_2 = arith.constant 0 : index
    %c0_3 = arith.constant 0 : index
    %4 = vector.load %arg5[%c0_2, %c0_3] : memref<128x512xf32, #tpu.memory_space<vmem>>, vector<128x512xf32>
    %c0_4 = arith.constant 0 : index
    %c0_5 = arith.constant 0 : index
    %c0_6 = arith.constant 0 : index
    %5 = vector.load %arg2[%c0_4, %c0_5, %c0_6] : memref<8x128x32xf32, #tpu.memory_space<vmem>>, vector<8x128x32xf32>
    %6 = vector.shape_cast %5 : vector<8x128x32xf32> to vector<1024x32xf32>
    %cst = arith.constant dense<0.000000e+00> : vector<1024x512xf32>
    %7 = tpu.matmul %6, %3, %cst {dimension_numbers = #tpu.dot_dimension_numbers<[1], [0], [0], [1], [0, 0, 1, 1], [], []>} : vector<1024x32xf32>, vector<32x512xf32>, vector<1024x512xf32> -> vector<1024x512xf32>
    %c0_7 = arith.constant 0 : index
    %c0_8 = arith.constant 0 : index
    %8 = vector.load %arg6[%c0_7, %c0_8] : memref<1x512xf32, #tpu.memory_space<vmem>>, vector<1x512xf32>
    %9 = vector.broadcast %8 : vector<1x512xf32> to vector<1024x512xf32>
    %10 = arith.addf %7, %9 : vector<1024x512xf32>
    %c0_9 = arith.constant 0 : index
    %c0_10 = arith.constant 0 : index
    %11 = vector.load %arg10[%c0_9, %c0_10] : memref<1024x512xf32, #tpu.memory_space<vmem>>, vector<1024x512xf32>
    tpu.vector_store %arg10[%c0_9, %c0_10], %10 {strides = array<i32>} : memref<1024x512xf32, #tpu.memory_space<vmem>>, vector<1024x512xf32>,
    %c0_11 = arith.constant 0 : index
    %c0_12 = arith.constant 0 : index
    %12 = vector.load %arg3[%c0_11, %c0_12] : memref<128x1xi32, #tpu.memory_space<vmem>>, vector<128x1xi32>
    %c8_i32 = arith.constant 8 : i32
    %13 = arith.muli %arg1, %c8_i32 : i32
    %c0_13 = arith.constant 0 : index
    %c0_14 = arith.constant 0 : index
    %14 = vector.load %arg11[%c0_13, %c0_14] : memref<128x128xf32, #tpu.memory_space<vmem>>, vector<128x128xf32>
    %c0_15 = arith.constant 0 : index
    %c0_16 = arith.constant 0 : index
    %15 = vector.load %arg12[%c0_15, %c0_16] : memref<128x128xf32, #tpu.memory_space<vmem>>, vector<128x128xf32>
    %c0_17 = arith.constant 0 : index
    %c0_18 = arith.constant 0 : index
    %16 = vector.load %arg13[%c0_17, %c0_18] : memref<128x128xf32, #tpu.memory_space<vmem>>, vector<128x128xf32>
    %c0_i32_19 = arith.constant 0 : i32
    %c8_i32_20 = arith.constant 8 : i32
    %17 = arith.addi %c0_i32_19, %c8_i32_20 : i32
    %c1_i32 = arith.constant 1 : i32
    %18:3 = scf.for %arg14 = %c0_i32_19 to %17 step %c1_i32 iter_args(%arg15 = %14, %arg16 = %15, %arg17 = %16) -> (vector<128x128xf32>, vector<128x128xf32>, vector<128x128xf32>)  : i32 {
      %c128_i32 = arith.constant 128 : i32
      %25 = arith.muli %arg14, %c128_i32 : i32
      %26 = tpu.assume_multiple %25, 128 : i32
      %27 = arith.index_cast %26 : i32 to index
      %c0_30 = arith.constant 0 : index
      %28 = vector.load %arg10[%27, %c0_30] : memref<1024x512xf32, #tpu.memory_space<vmem>>, vector<128x512xf32>
      %cst_31 = arith.constant dense<0.000000e+00> : vector<128x512xf32>
      %29 = tpu.matmul %arg15, %4, %cst_31 {dimension_numbers = #tpu.dot_dimension_numbers<[1], [0], [0], [1], [0, 0, 1, 1], [], []>} : vector<128x128xf32>, vector<128x512xf32>, vector<128x512xf32> -> vector<128x512xf32>
      %30 = arith.addf %28, %29 : vector<128x512xf32>
      %31 = vector.extract_strided_slice %30 {offsets = [0, 0], sizes = [128, 128], strides = [1, 1]} : vector<128x512xf32> to vector<128x128xf32>
      %cst_32 = arith.constant 5.000000e-01 : f32
      %32 = vector.broadcast %cst_32 : f32 to vector<128x128xf32>
      %33 = arith.mulf %32, %31 : vector<128x128xf32>
      %34 = math.tanh %33 : vector<128x128xf32>
      %cst_33 = arith.constant 5.000000e-01 : f32
      %35 = vector.broadcast %cst_33 : f32 to vector<128x128xf32>
      %36 = arith.mulf %35, %34 : vector<128x128xf32>
      %cst_34 = arith.constant 5.000000e-01 : f32
      %37 = vector.broadcast %cst_34 : f32 to vector<128x128xf32>
      %38 = arith.addf %36, %37 : vector<128x128xf32>
      %39 = vector.extract_strided_slice %30 {offsets = [0, 128], sizes = [128, 128], strides = [1, 1]} : vector<128x512xf32> to vector<128x128xf32>
      %cst_35 = arith.constant 5.000000e-01 : f32
      %40 = vector.broadcast %cst_35 : f32 to vector<128x128xf32>
      %41 = arith.mulf %40, %39 : vector<128x128xf32>
      %42 = math.tanh %41 : vector<128x128xf32>
      %cst_36 = arith.constant 5.000000e-01 : f32
      %43 = vector.broadcast %cst_36 : f32 to vector<128x128xf32>
      %44 = arith.mulf %43, %42 : vector<128x128xf32>
      %cst_37 = arith.constant 5.000000e-01 : f32
      %45 = vector.broadcast %cst_37 : f32 to vector<128x128xf32>
      %46 = arith.addf %44, %45 : vector<128x128xf32>
      %47 = vector.extract_strided_slice %30 {offsets = [0, 256], sizes = [128, 128], strides = [1, 1]} : vector<128x512xf32> to vector<128x128xf32>
      %48 = math.tanh %47 : vector<128x128xf32>
      %49 = vector.extract_strided_slice %30 {offsets = [0, 384], sizes = [128, 128], strides = [1, 1]} : vector<128x512xf32> to vector<128x128xf32>
      %cst_38 = arith.constant 5.000000e-01 : f32
      %50 = vector.broadcast %cst_38 : f32 to vector<128x128xf32>
      %51 = arith.mulf %50, %49 : vector<128x128xf32>
      %52 = math.tanh %51 : vector<128x128xf32>
      %cst_39 = arith.constant 5.000000e-01 : f32
      %53 = vector.broadcast %cst_39 : f32 to vector<128x128xf32>
      %54 = arith.mulf %53, %52 : vector<128x128xf32>
      %cst_40 = arith.constant 5.000000e-01 : f32
      %55 = vector.broadcast %cst_40 : f32 to vector<128x128xf32>
      %56 = arith.addf %54, %55 : vector<128x128xf32>
      %57 = arith.mulf %46, %arg16 : vector<128x128xf32>
      %58 = arith.mulf %38, %48 : vector<128x128xf32>
      %59 = arith.addf %57, %58 : vector<128x128xf32>
      %60 = math.tanh %59 : vector<128x128xf32>
      %61 = arith.mulf %56, %60 : vector<128x128xf32>
      %62 = arith.addi %13, %arg14 : i32
      %63 = vector.broadcast %62 : i32 to vector<128x1xi32>
      %64 = arith.cmpi eq, %12, %63 : vector<128x1xi32>
      %65 = vector.shape_cast %64 : vector<128x1xi1> to vector<128x1xi1>
      %66 = vector.broadcast %65 : vector<128x1xi1> to vector<128x128xi1>
      %67 = arith.select %66, %61, %arg17 : vector<128x128xi1>, vector<128x128xf32>
      scf.yield %61, %59, %67 : vector<128x128xf32>, vector<128x128xf32>, vector<128x128xf32>
    }
    %c8_i32_21 = arith.constant 8 : i32
    %c0_22 = arith.constant 0 : index
    %c0_23 = arith.constant 0 : index
    %19 = vector.load %arg11[%c0_22, %c0_23] : memref<128x128xf32, #tpu.memory_space<vmem>>, vector<128x128xf32>
    tpu.vector_store %arg11[%c0_22, %c0_23], %18#0 {strides = array<i32>} : memref<128x128xf32, #tpu.memory_space<vmem>>, vector<128x128xf32>,
    %c0_24 = arith.constant 0 : index
    %c0_25 = arith.constant 0 : index
    %20 = vector.load %arg12[%c0_24, %c0_25] : memref<128x128xf32, #tpu.memory_space<vmem>>, vector<128x128xf32>
    tpu.vector_store %arg12[%c0_24, %c0_25], %18#1 {strides = array<i32>} : memref<128x128xf32, #tpu.memory_space<vmem>>, vector<128x128xf32>,
    %c0_26 = arith.constant 0 : index
    %c0_27 = arith.constant 0 : index
    %21 = vector.load %arg13[%c0_26, %c0_27] : memref<128x128xf32, #tpu.memory_space<vmem>>, vector<128x128xf32>
    tpu.vector_store %arg13[%c0_26, %c0_27], %18#2 {strides = array<i32>} : memref<128x128xf32, #tpu.memory_space<vmem>>, vector<128x128xf32>,
    %c0_i32_28 = arith.constant 0 : i32
    %22 = arith.cmpi eq, %arg1, %c0_i32_28 : i32
    %23 = arith.extui %22 : i1 to i32
    %c0_i32_29 = arith.constant 0 : i32
    %24 = arith.cmpi ne, %23, %c0_i32_29 : i32
    scf.if %24 {
      %c0_30 = arith.constant 0 : index
      %c0_31 = arith.constant 0 : index
      %25 = vector.load %arg7[%c0_30, %c0_31] : memref<128x128xf32, #tpu.memory_space<vmem>>, vector<128x128xf32>
      %cst_32 = arith.constant dense<0.000000e+00> : vector<128x128xf32>
      %26 = tpu.matmul %18#2, %25, %cst_32 {dimension_numbers = #tpu.dot_dimension_numbers<[1], [0], [0], [1], [0, 0, 1, 1], [], []>} : vector<128x128xf32>, vector<128x128xf32>, vector<128x128xf32> -> vector<128x128xf32>
      %c0_33 = arith.constant 0 : index
      %c0_34 = arith.constant 0 : index
      %27 = vector.load %arg8[%c0_33, %c0_34] : memref<1x128xf32, #tpu.memory_space<vmem>>, vector<1x128xf32>
      %28 = vector.broadcast %27 : vector<1x128xf32> to vector<128x128xf32>
      %29 = arith.addf %26, %28 : vector<128x128xf32>
      %c0_35 = arith.constant 0 : index
      %c0_36 = arith.constant 0 : index
      %30 = vector.load %arg9[%c0_35, %c0_36] : memref<128x128xf32, #tpu.memory_space<vmem>>, vector<128x128xf32>
      tpu.vector_store %arg9[%c0_35, %c0_36], %29 {strides = array<i32>} : memref<128x128xf32, #tpu.memory_space<vmem>>, vector<128x128xf32>,
    } else {
    }
    return
  }
  func.func @transform_0(%arg0: i32, %arg1: i32) -> (i32, i32, i32) {
    %c0_i32 = arith.constant 0 : i32
    %c0_i32_0 = arith.constant 0 : i32
    return %arg1, %arg0, %c0_i32 : i32, i32, i32
  }
  func.func @transform_1(%arg0: i32, %arg1: i32) -> (i32, i32) {
    %c0_i32 = arith.constant 0 : i32
    %c0_i32_0 = arith.constant 0 : i32
    return %arg0, %c0_i32 : i32, i32
  }
  func.func @transform_2(%arg0: i32, %arg1: i32) -> (i32, i32) {
    %c0_i32 = arith.constant 0 : i32
    %c0_i32_0 = arith.constant 0 : i32
    %c0_i32_1 = arith.constant 0 : i32
    return %c0_i32, %c0_i32_0 : i32, i32
  }
  func.func @transform_3(%arg0: i32, %arg1: i32) -> (i32, i32) {
    %c0_i32 = arith.constant 0 : i32
    %c0_i32_0 = arith.constant 0 : i32
    %c0_i32_1 = arith.constant 0 : i32
    return %c0_i32, %c0_i32_0 : i32, i32
  }
  func.func @transform_4(%arg0: i32, %arg1: i32) -> (i32, i32) {
    %c0_i32 = arith.constant 0 : i32
    %c0_i32_0 = arith.constant 0 : i32
    %c0_i32_1 = arith.constant 0 : i32
    return %c0_i32, %c0_i32_0 : i32, i32
  }
  func.func @transform_5(%arg0: i32, %arg1: i32) -> (i32, i32) {
    %c0_i32 = arith.constant 0 : i32
    %c0_i32_0 = arith.constant 0 : i32
    %c0_i32_1 = arith.constant 0 : i32
    return %c0_i32, %c0_i32_0 : i32, i32
  }
  func.func @transform_6(%arg0: i32, %arg1: i32) -> (i32, i32) {
    %c0_i32 = arith.constant 0 : i32
    %c0_i32_0 = arith.constant 0 : i32
    %c0_i32_1 = arith.constant 0 : i32
    return %c0_i32, %c0_i32_0 : i32, i32
  }
  func.func @transform_7(%arg0: i32, %arg1: i32) -> (i32, i32) {
    %c0_i32 = arith.constant 0 : i32
    %c0_i32_0 = arith.constant 0 : i32
    return %arg0, %c0_i32 : i32, i32
  }
}

</mosaic_0001>

<bundles_post_ra>
// kernel: tpu_custom_call.1
= control target key start
LH: loop header
LB: loop body
LE: loop exit
PB: predicated region body
PF: predicated region fallthrough
CT: control target
= control target key end

     0   :  { %12 = vsyncpa [#allocation7], 0  ;;  %v8524_v5 = vmov 0.0   ;;  %vm309_vm0 = vcmask 261120   ;;  %s8516_s0 = inlined_call_operand.vmem [shape: f32[8,128,32], index: 0, kind: input, shape index: {}]   ;;  %s8517_s1 = inlined_call_operand.vmem [shape: s32[128,1], index: 1, kind: input, shape index: {}]   ;;  %s8518_s2 = inlined_call_operand.vmem [shape: f32[32,512], index: 2, kind: input, shape index: {}]   ;;  %s8519_s3 = inlined_call_operand.vmem [shape: f32[128,512], index: 3, kind: input, shape index: {}]   ;;  %s8520_s4 = inlined_call_operand.vmem [shape: f32[1,512], index: 4, kind: input, shape index: {}]   ;;  %s8521_s5 = inlined_call_operand.vmem [shape: f32[128,128], index: 5, kind: input, shape index: {}]   ;;  %s8522_s6 = inlined_call_operand.vmem [shape: f32[1,128], index: 6, kind: input, shape index: {}]   ;;  %s8523_s7 = inlined_call_operand.hbm [shape: f32[128,128], index: 7, kind: output, shape index: {}]  }
   0x1   :  { %v92_v0 = vld [vmem:[%s8518_s2 + $0x68] sm:$0xff]  ;;  %v5661_v1 = vld [vmem:[%s8519_s3] sm:$0xff]  ;;  %v5671_v3 = vld [vmem:[%s8519_s3 + $0x10] sm:$0xff]  ;;  %31 = vst [vmem:[#allocation3 + $0x30] sm:$0xff] %v8524_v5  ;;  %758 = vmatprep.mubr.f32.mxu0 %v8524_v5  ;;  %1591 = vmatprep.mubr.f32.mxu1 %v8524_v5 }
   0x2   :  { %8544 = vst [vmem:[#allocation9_spill] sm:$0xff] %v5661_v1  ;;  %v5666_v2 = vld [vmem:[%s8519_s3 + $0x8] sm:$0xff]  ;;  %8546 = vst [vmem:[#allocation11_spill] sm:$0xff] %v5671_v3  ;;  %v5676_v4 = vld [vmem:[%s8519_s3 + $0x18] sm:$0xff]  ;;  %718 = vmatprep.subr.mxu0 %v92_v0 }
   0x3   :  { %8545 = vst [vmem:[#allocation10_spill] sm:$0xff] %v5666_v2  ;;  %8547 = vst [vmem:[#allocation12_spill] sm:$0xff] %v5676_v4  ;;  %v5683_v6 = vld [vmem:[%s8519_s3 + $0x20] sm:$0xff]  ;;  %v5688_v7 = vld [vmem:[%s8519_s3 + $0x28] sm:$0xff] }
   0x4   :  { %8548 = vst [vmem:[#allocation13_spill] sm:$0xff] %v5683_v6  ;;  %8549 = vst [vmem:[#allocation14_spill] sm:$0xff] %v5688_v7  ;;  %v5693_v8 = vld [vmem:[%s8519_s3 + $0x30] sm:$0xff]  ;;  %v5699_v9 = vld [vmem:[%s8519_s3 + $0x38] sm:$0xff] }
   0x5   :  { %8550 = vst [vmem:[#allocation15_spill] sm:$0xff] %v5693_v8  ;;  %8551 = vst [vmem:[#allocation16_spill] sm:$0xff] %v5699_v9  ;;  %v5704_v10 = vld [vmem:[%s8519_s3 + $0x40] sm:$0xff]  ;;  %v5709_v11 = vld [vmem:[%s8519_s3 + $0x48] sm:$0xff] }
   0x6   :  { %8552 = vst [vmem:[#allocation17_spill] sm:$0xff] %v5704_v10  ;;  %8553 = vst [vmem:[#allocation18_spill] sm:$0xff] %v5709_v11  ;;  %v5714_v12 = vld [vmem:[%s8519_s3 + $0x50] sm:$0xff]  ;;  %v5719_v13 = vld [vmem:[%s8519_s3 + $0x58] sm:$0xff] }
   0x7   :  { %8554 = vst [vmem:[#allocation19_spill] sm:$0xff] %v5714_v12  ;;  %8555 = vst [vmem:[#allocation20_spill] sm:$0xff] %v5719_v13  ;;  %v5724_v14 = vld [vmem:[%s8519_s3 + $0x60] sm:$0xff]  ;;  %v5729_v15 = vld [vmem:[%s8519_s3 + $0x68] sm:$0xff] }
   0x8   :  { %8556 = vst [vmem:[#allocation21_spill] sm:$0xff] %v5724_v14  ;;  %8557 = vst [vmem:[#allocation22_spill] sm:$0xff] %v5729_v15  ;;  %v5734_v16 = vld [vmem:[%s8519_s3 + $0x70] sm:$0xff]  ;;  %v5739_v17 = vld [vmem:[%s8519_s3 + $0x78] sm:$0xff] }
   0x9   :  { %8558 = vst [vmem:[#allocation23_spill] sm:$0xff] %v5734_v16  ;;  %8559 = vst [vmem:[#allocation24_spill] sm:$0xff] %v5739_v17  ;;  %v5744_v18 = vld [vmem:[%s8519_s3 + $0x80] sm:$0xff]  ;;  %v5749_v19 = vld [vmem:[%s8519_s3 + $0x88] sm:$0xff] }
   0xa   :  { %8560 = vst [vmem:[#allocation25_spill] sm:$0xff] %v5744_v18  ;;  %8561 = vst [vmem:[#allocation26_spill] sm:$0xff] %v5749_v19  ;;  %v5754_v20 = vld [vmem:[%s8519_s3 + $0x90] sm:$0xff]  ;;  %v5759_v21 = vld [vmem:[%s8519_s3 + $0x98] sm:$0xff]  ;;  %v7563_v18 = vmov 0.0   ;;  %v7567_v19 = vmov 0.0  }
   0xb   :  { %8562 = vst [vmem:[#allocation27_spill] sm:$0xff] %v5754_v20  ;;  %8563 = vst [vmem:[#allocation28_spill] sm:$0xff] %v5759_v21  ;;  %v5764_v22 = vld [vmem:[%s8519_s3 + $0xa0] sm:$0xff]  ;;  %v5769_v23 = vld [vmem:[%s8519_s3 + $0xa8] sm:$0xff]  ;;  %v7565_v21 = vmov 0.0  }
   0xc   :  { %8564 = vst [vmem:[#allocation29_spill] sm:$0xff] %v5764_v22  ;;  %8565 = vst [vmem:[#allocation30_spill] sm:$0xff] %v5769_v23  ;;  %v5774_v24 = vld [vmem:[%s8519_s3 + $0xb0] sm:$0xff]  ;;  %v5779_v25 = vld [vmem:[%s8519_s3 + $0xb8] sm:$0xff]  ;;  %v7571_v22 = vmov 0.0   ;;  %v7575_v23 = vmov 0.0  }
   0xd   :  { %8566 = vst [vmem:[#allocation31_spill] sm:$0xff] %v5774_v24  ;;  %8567 = vst [vmem:[#allocation32_spill] sm:$0xff] %v5779_v25  ;;  %v5784_v26 = vld [vmem:[%s8519_s3 + $0xc0] sm:$0xff]  ;;  %v5789_v27 = vld [vmem:[%s8519_s3 + $0xc8] sm:$0xff]  ;;  %v7569_v24 = vmov 0.0   ;;  %v7573_v25 = vmov 0.0  }
   0xe   :  { %8568 = vst [vmem:[#allocation33_spill] sm:$0xff] %v5784_v26  ;;  %8569 = vst [vmem:[#allocation34_spill] sm:$0xff] %v5789_v27  ;;  %v5794_v28 = vld [vmem:[%s8519_s3 + $0xd0] sm:$0xff]  ;;  %v5799_v29 = vld [vmem:[%s8519_s3 + $0xd8] sm:$0xff]  ;;  %v7579_v26 = vmov 0.0   ;;  %v7583_v27 = vmov 0.0  }
   0xf   :  { %8570 = vst [vmem:[#allocation35_spill] sm:$0xff] %v5794_v28  ;;  %8571 = vst [vmem:[#allocation36_spill] sm:$0xff] %v5799_v29  ;;  %v5804_v30 = vld [vmem:[%s8519_s3 + $0xe0] sm:$0xff]  ;;  %v5809_v31 = vld [vmem:[%s8519_s3 + $0xe8] sm:$0xff]  ;;  %v7577_v28 = vmov 0.0   ;;  %v7581_v29 = vmov 0.0  }
  0x10   :  { %8572 = vst [vmem:[#allocation37_spill] sm:$0xff] %v5804_v30  ;;  %8573 = vst [vmem:[#allocation38_spill] sm:$0xff] %v5809_v31  ;;  %v5814_v32 = vld [vmem:[%s8519_s3 + $0xf0] sm:$0xff]  ;;  %v5819_v33 = vld [vmem:[%s8519_s3 + $0xf8] sm:$0xff]  ;;  %v7587_v30 = vmov 0.0   ;;  %v7591_v31 = vmov 0.0  }
  0x11   :  { %8574 = vst [vmem:[#allocation39_spill] sm:$0xff] %v5814_v32  ;;  %8575 = vst [vmem:[#allocation40_spill] sm:$0xff] %v5819_v33  ;;  %v5824_v34 = vld [vmem:[%s8519_s3 + $0x100] sm:$0xff]  ;;  %v5829_v35 = vld [vmem:[%s8519_s3 + $0x108] sm:$0xff]  ;;  %v7585_v32 = vmov 0.0   ;;  %v7589_v33 = vmov 0.0  }
  0x12   :  { %8576 = vst [vmem:[#allocation41_spill] sm:$0xff] %v5824_v34  ;;  %8577 = vst [vmem:[#allocation42_spill] sm:$0xff] %v5829_v35  ;;  %v5834_v36 = vld [vmem:[%s8519_s3 + $0x110] sm:$0xff]  ;;  %v5839_v37 = vld [vmem:[%s8519_s3 + $0x118] sm:$0xff]  ;;  %v7595_v34 = vmov 0.0   ;;  %v7599_v35 = vmov 0.0  }
  0x13   :  { %8578 = vst [vmem:[#allocation43_spill] sm:$0xff] %v5834_v36  ;;  %8579 = vst [vmem:[#allocation44_spill] sm:$0xff] %v5839_v37  ;;  %v5844_v38 = vld [vmem:[%s8519_s3 + $0x120] sm:$0xff]  ;;  %v5849_v39 = vld [vmem:[%s8519_s3 + $0x128] sm:$0xff]  ;;  %v7593_v36 = vmov 0.0   ;;  %v7597_v37 = vmov 0.0  }
  0x14   :  { %8580 = vst [vmem:[#allocation45_spill] sm:$0xff] %v5844_v38  ;;  %8581 = vst [vmem:[#allocation46_spill] sm:$0xff] %v5849_v39  ;;  %v5854_v40 = vld [vmem:[%s8519_s3 + $0x130] sm:$0xff]  ;;  %v5859_v41 = vld [vmem:[%s8519_s3 + $0x138] sm:$0xff]  ;;  %v7603_v38 = vmov 0.0   ;;  %v7607_v39 = vmov 0.0  }
  0x15   :  { %8582 = vst [vmem:[#allocation47_spill] sm:$0xff] %v5854_v40  ;;  %8583 = vst [vmem:[#allocation48_spill] sm:$0xff] %v5859_v41  ;;  %v5864_v42 = vld [vmem:[%s8519_s3 + $0x140] sm:$0xff]  ;;  %v5869_v43 = vld [vmem:[%s8519_s3 + $0x148] sm:$0xff]  ;;  %v7601_v40 = vmov 0.0   ;;  %v7605_v41 = vmov 0.0  }
  0x16   :  { %8584 = vst [vmem:[#allocation49_spill] sm:$0xff] %v5864_v42  ;;  %8585 = vst [vmem:[#allocation50_spill] sm:$0xff] %v5869_v43  ;;  %v5874_v44 = vld [vmem:[%s8519_s3 + $0x150] sm:$0xff]  ;;  %v5879_v45 = vld [vmem:[%s8519_s3 + $0x158] sm:$0xff]  ;;  %v7611_v42 = vmov 0.0   ;;  %v7615_v43 = vmov 0.0  }
  0x17   :  { %8586 = vst [vmem:[#allocation51_spill] sm:$0xff] %v5874_v44  ;;  %8587 = vst [vmem:[#allocation52_spill] sm:$0xff] %v5879_v45  ;;  %v5884_v46 = vld [vmem:[%s8519_s3 + $0x160] sm:$0xff]  ;;  %v5889_v47 = vld [vmem:[%s8519_s3 + $0x168] sm:$0xff]  ;;  %v7609_v44 = vmov 0.0   ;;  %v7613_v45 = vmov 0.0  }
  0x18   :  { %8588 = vst [vmem:[#allocation53_spill] sm:$0xff] %v5884_v46  ;;  %8589 = vst [vmem:[#allocation54_spill] sm:$0xff] %v5889_v47  ;;  %v5894_v48 = vld [vmem:[%s8519_s3 + $0x170] sm:$0xff]  ;;  %v5899_v49 = vld [vmem:[%s8519_s3 + $0x178] sm:$0xff]  ;;  %v7619_v46 = vmov 0.0   ;;  %v7623_v47 = vmov 0.0  }
  0x19   :  { %8590 = vst [vmem:[#allocation55_spill] sm:$0xff] %v5894_v48  ;;  %8591 = vst [vmem:[#allocation56_spill] sm:$0xff] %v5899_v49  ;;  %v5904_v50 = vld [vmem:[%s8519_s3 + $0x180] sm:$0xff]  ;;  %v5909_v51 = vld [vmem:[%s8519_s3 + $0x188] sm:$0xff]  ;;  %v7617_v48 = vmov 0.0   ;;  %v7621_v49 = vmov 0.0  }
  0x1a   :  { %8592 = vst [vmem:[#allocation57_spill] sm:$0xff] %v5904_v50  ;;  %8593 = vst [vmem:[#allocation58_spill] sm:$0xff] %v5909_v51  ;;  %v5914_v52 = vld [vmem:[%s8519_s3 + $0x190] sm:$0xff]  ;;  %v5919_v53 = vld [vmem:[%s8519_s3 + $0x198] sm:$0xff] }
  0x1b   :  { %8594 = vst [vmem:[#allocation59_spill] sm:$0xff] %v5914_v52  ;;  %8595 = vst [vmem:[#allocation60_spill] sm:$0xff] %v5919_v53  ;;  %v5924_v54 = vld [vmem:[%s8519_s3 + $0x1a0] sm:$0xff]  ;;  %v5929_v55 = vld [vmem:[%s8519_s3 + $0x1a8] sm:$0xff] }
  0x1c   :  { %8596 = vst [vmem:[#allocation61_spill] sm:$0xff] %v5924_v54  ;;  %8597 = vst [vmem:[#allocation62_spill] sm:$0xff] %v5929_v55  ;;  %v5934_v56 = vld [vmem:[%s8519_s3 + $0x1b0] sm:$0xff]  ;;  %v5939_v57 = vld [vmem:[%s8519_s3 + $0x1b8] sm:$0xff] }
  0x1d   :  { %8598 = vst [vmem:[#allocation63_spill] sm:$0xff] %v5934_v56  ;;  %8599 = vst [vmem:[#allocation64_spill] sm:$0xff] %v5939_v57  ;;  %v5944_v58 = vld [vmem:[%s8519_s3 + $0x1c0] sm:$0xff]  ;;  %v5949_v59 = vld [vmem:[%s8519_s3 + $0x1c8] sm:$0xff] }
  0x1e   :  { %8600 = vst [vmem:[#allocation65_spill] sm:$0xff] %v5944_v58  ;;  %8601 = vst [vmem:[#allocation66_spill] sm:$0xff] %v5949_v59  ;;  %v5954_v60 = vld [vmem:[%s8519_s3 + $0x1d0] sm:$0xff]  ;;  %v5959_v61 = vld [vmem:[%s8519_s3 + $0x1d8] sm:$0xff] }
  0x1f   :  { %8602 = vst [vmem:[#allocation67_spill] sm:$0xff] %v5954_v60  ;;  %8603 = vst [vmem:[#allocation68_spill] sm:$0xff] %v5959_v61  ;;  %v5964_v62 = vld [vmem:[%s8519_s3 + $0x1e0] sm:$0xff]  ;;  %v5969_v63 = vld [vmem:[%s8519_s3 + $0x1e8] sm:$0xff] }
  0x20   :  { %8604 = vst [vmem:[#allocation69_spill] sm:$0xff] %v5964_v62  ;;  %8605 = vst [vmem:[#allocation70_spill] sm:$0xff] %v5969_v63  ;;  %v5974_v0 = vld [vmem:[%s8519_s3 + $0x1f0] sm:$0xff]  ;;  %v5979_v5 = vld [vmem:[%s8519_s3 + $0x1f8] sm:$0xff] }
  0x21   :  { %8606 = vst [vmem:[#allocation71_spill] sm:$0xff] %v5974_v0  ;;  %8607 = vst [vmem:[#allocation72_spill] sm:$0xff] %v5979_v5  ;;  %v94_v3 = vld [vmem:[%s8518_s2 + $0x78] sm:$0xff]  ;;  %v91_v4 = vld [vmem:[%s8518_s2 + $0x60] sm:$0xff] }
  0x22   :  { %v93_v1 = vld [vmem:[%s8518_s2 + $0x70] sm:$0xff]  ;;  %1551 = vmatprep.subr.mxu1 %v94_v3  ;;  %719 = vmatpush1.msra.mxu0 %v91_v4  ;;  %v88_v8 = vld [vmem:[%s8518_s2 + $0x48] sm:$0xff]  ;;  %v90_v2 = vld [vmem:[%s8518_s2 + $0x58] sm:$0xff] }
  0x23   :  { %v87_v9 = vld [vmem:[%s8518_s2 + $0x40] sm:$0xff]  ;;  %1552 = vmatpush1.msra.mxu1 %v93_v1  ;;  %720 = vmatprep.subr.mxu0 %v88_v8  ;;  %v89_v6 = vld [vmem:[%s8518_s2 + $0x50] sm:$0xff]  ;;  %v84_v3 = vld [vmem:[%s8518_s2 + $0x28] sm:$0xff] }
  0x24   :  { %v86_v4 = vld [vmem:[%s8518_s2 + $0x38] sm:$0xff]  ;;  %1553 = vmatprep.subr.mxu1 %v90_v2  ;;  %721 = vmatpush1.msra.mxu0 %v87_v9  ;;  %v83_v12 = vld [vmem:[%s8518_s2 + $0x20] sm:$0xff]  ;;  %v85_v1 = vld [vmem:[%s8518_s2 + $0x30] sm:$0xff] }
  0x25   :  { %v80_v8 = vld [vmem:[%s8518_s2 + $0x8] sm:$0xff]  ;;  %1554 = vmatpush1.msra.mxu1 %v89_v6  ;;  %722 = vmatprep.subr.mxu0 %v84_v3  ;;  %v82_v7 = vld [vmem:[%s8518_s2 + $0x18] sm:$0xff]  ;;  %v79_v2 = vld [vmem:[%s8518_s2] sm:$0xff]  ;;  %v8608_v6 = vmov 0.0  }
  0x26   :  { %1555 = vmatprep.subr.mxu1 %v86_v4  ;;  %723 = vmatpush1.msra.mxu0 %v83_v12  ;;  %v81_v9 = vld [vmem:[%s8518_s2 + $0x10] sm:$0xff]  ;;  %v159_v13 = vld [vmem:[%s8516_s0] sm:$0xff]  ;;  %v160_v12 = vld [vmem:[%s8516_s0 + $0x8] sm:$0xff] }
  0x27   :  { %1556 = vmatpush1.msra.mxu1 %v85_v1  ;;  %724 = vmatprep.subr.mxu0 %v80_v8  ;;  %v163_v3 = vld [vmem:[%s8516_s0 + $0x20] sm:$0xff]  ;;  %v164_v4 = vld [vmem:[%s8516_s0 + $0x28] sm:$0xff]  ;;  %v165_v1 = vld [vmem:[%s8516_s0 + $0x30] sm:$0xff] }
  0x28   :  { %1557 = vmatprep.subr.mxu1 %v82_v7  ;;  %725 = vmatpush1.msra.mxu0 %v79_v2  ;;  %v161_v7 = vld [vmem:[%s8516_s0 + $0x10] sm:$0xff]  ;;  %v166_v8 = vld [vmem:[%s8516_s0 + $0x38] sm:$0xff]  ;;  %v167_v2 = vld [vmem:[%s8516_s0 + $0x40] sm:$0xff] }
  0x29   :  { %1558 = vmatpush1.msra.mxu1 %v81_v9  ;;  %4251 = vmatmul.mubr.msk.f32.vlgmr.msra.gmra.mxu0 %vm309_vm0, %v159_v13  ;;  %v168_v9 = vld [vmem:[%s8516_s0 + $0x48] sm:$0xff] }
  0x2a   :  { %4379 = vmatmul.mubr.msk.f32.vlgmr.msra.gmra.mxu1 %vm309_vm0, %v159_v13  ;;  %764 = vmatprep.mubr.f32.mxu0 %v8608_v6  ;;  %v162_v13 = vld [vmem:[%s8516_s0 + $0x18] sm:$0xff] }
  0x2b   :  { %1597 = vmatprep.mubr.f32.mxu1 %v8608_v6 }
  0x2d   :  { %4252 = vmatmul.mubr.msk.f32.gmra.mxu0 %vm309_vm0, %v160_v12 }
  0x2e   :  { %4380 = vmatmul.mubr.msk.f32.gmra.mxu1 %vm309_vm0, %v160_v12  ;;  %770 = vmatprep.mubr.f32.mxu0 %v8608_v6  ;;  %v169_v12 = vld [vmem:[%s8516_s0 + $0x50] sm:$0xff] }
  0x2f   :  { %1603 = vmatprep.mubr.f32.mxu1 %v8608_v6 }
  0x31   :  { %4253 = vmatmul.mubr.msk.f32.gmra.mxu0 %vm309_vm0, %v161_v7 }
  0x32   :  { %4381 = vmatmul.mubr.msk.f32.gmra.mxu1 %vm309_vm0, %v161_v7  ;;  %776 = vmatprep.mubr.f32.mxu0 %v8608_v6  ;;  %v170_v7 = vld [vmem:[%s8516_s0 + $0x58] sm:$0xff] }
  0x33   :  { %1609 = vmatprep.mubr.f32.mxu1 %v8608_v6 }
  0x35   :  { %4254 = vmatmul.mubr.msk.f32.gmra.mxu0 %vm309_vm0, %v162_v13 }
  0x36   :  { %4382 = vmatmul.mubr.msk.f32.gmra.mxu1 %vm309_vm0, %v162_v13  ;;  %782 = vmatprep.mubr.f32.mxu0 %v8608_v6  ;;  %v171_v13 = vld [vmem:[%s8516_s0 + $0x60] sm:$0xff] }
  0x37   :  { %1615 = vmatprep.mubr.f32.mxu1 %v8608_v6 }
  0x39   :  { %4255 = vmatmul.mubr.msk.f32.gmra.mxu0 %vm309_vm0, %v163_v3 }
  0x3a   :  { %4383 = vmatmul.mubr.msk.f32.gmra.mxu1 %vm309_vm0, %v163_v3  ;;  %788 = vmatprep.mubr.f32.mxu0 %v8608_v6  ;;  %v172_v3 = vld [vmem:[%s8516_s0 + $0x68] sm:$0xff] }
  0x3b   :  { %1621 = vmatprep.mubr.f32.mxu1 %v8608_v6 }
  0x3d   :  { %4256 = vmatmul.mubr.msk.f32.gmra.mxu0 %vm309_vm0, %v164_v4 }
  0x3e   :  { %4384 = vmatmul.mubr.msk.f32.gmra.mxu1 %vm309_vm0, %v164_v4  ;;  %794 = vmatprep.mubr.f32.mxu0 %v8608_v6  ;;  %v173_v4 = vld [vmem:[%s8516_s0 + $0x70] sm:$0xff] }
  0x3f   :  { %1627 = vmatprep.mubr.f32.mxu1 %v8608_v6 }
  0x41   :  { %4257 = vmatmul.mubr.msk.f32.gmra.mxu0 %vm309_vm0, %v165_v1 }
  0x42   :  { %4385 = vmatmul.mubr.msk.f32.gmra.mxu1 %vm309_vm0, %v165_v1  ;;  %800 = vmatprep.mubr.f32.mxu0 %v8608_v6  ;;  %v174_v1 = vld [vmem:[%s8516_s0 + $0x78] sm:$0xff] }
  0x43   :  { %1633 = vmatprep.mubr.f32.mxu1 %v8608_v6 }
  0x45   :  { %4258 = vmatmul.mubr.msk.f32.gmra.mxu0 %vm309_vm0, %v166_v8 }
  0x46   :  { %4386 = vmatmul.mubr.msk.f32.gmra.mxu1 %vm309_vm0, %v166_v8  ;;  %806 = vmatprep.mubr.f32.mxu0 %v8608_v6  ;;  %v175_v8 = vld [vmem:[%s8516_s0 + $0x80] sm:$0xff] }
  0x47   :  { %1639 = vmatprep.mubr.f32.mxu1 %v8608_v6 }
  0x49   :  { %4259 = vmatmul.mubr.msk.f32.gmra.mxu0 %vm309_vm0, %v167_v2 }
  0x4a   :  { %4387 = vmatmul.mubr.msk.f32.gmra.mxu1 %vm309_vm0, %v167_v2  ;;  %812 = vmatprep.mubr.f32.mxu0 %v8608_v6  ;;  %v176_v2 = vld [vmem:[%s8516_s0 + $0x88] sm:$0xff] }
  0x4b   :  { %1645 = vmatprep.mubr.f32.mxu1 %v8608_v6 }
  0x4d   :  { %4260 = vmatmul.mubr.msk.f32.gmra.mxu0 %vm309_vm0, %v168_v9 }
  0x4e   :  { %4388 = vmatmul.mubr.msk.f32.gmra.mxu1 %vm309_vm0, %v168_v9  ;;  %818 = vmatprep.mubr.f32.mxu0 %v8608_v6  ;;  %v177_v9 = vld [vmem:[%s8516_s0 + $0x90] sm:$0xff] }
  0x4f   :  { %1651 = vmatprep.mubr.f32.mxu1 %v8608_v6 }
  0x51   :  { %4261 = vmatmul.mubr.msk.f32.gmra.mxu0 %vm309_vm0, %v169_v12 }
  0x52   :  { %4389 = vmatmul.mubr.msk.f32.gmra.mxu1 %vm309_vm0, %v169_v12  ;;  %824 = vmatprep.mubr.f32.mxu0 %v8608_v6  ;;  %v178_v12 = vld [vmem:[%s8516_s0 + $0x98] sm:$0xff] }
  0x53   :  { %1657 = vmatprep.mubr.f32.mxu1 %v8608_v6 }
  0x55   :  { %4262 = vmatmul.mubr.msk.f32.gmra.mxu0 %vm309_vm0, %v170_v7 }
  0x56   :  { %4390 = vmatmul.mubr.msk.f32.gmra.mxu1 %vm309_vm0, %v170_v7  ;;  %830 = vmatprep.mubr.f32.mxu0 %v8608_v6  ;;  %v179_v7 = vld [vmem:[%s8516_s0 + $0xa0] sm:$0xff] }
  0x57   :  { %1663 = vmatprep.mubr.f32.mxu1 %v8608_v6 }
  0x59   :  { %4263 = vmatmul.mubr.msk.f32.gmra.mxu0 %vm309_vm0, %v171_v13 }
  0x5a   :  { %4391 = vmatmul.mubr.msk.f32.gmra.mxu1 %vm309_vm0, %v171_v13  ;;  %836 = vmatprep.mubr.f32.mxu0 %v8608_v6  ;;  %v180_v13 = vld [vmem:[%s8516_s0 + $0xa8] sm:$0xff] }
  0x5b   :  { %1669 = vmatprep.mubr.f32.mxu1 %v8608_v6 }
  0x5d   :  { %4264 = vmatmul.mubr.msk.f32.gmra.mxu0 %vm309_vm0, %v172_v3 }
  0x5e   :  { %4392 = vmatmul.mubr.msk.f32.gmra.mxu1 %vm309_vm0, %v172_v3  ;;  %842 = vmatprep.mubr.f32.mxu0 %v8608_v6  ;;  %v181_v3 = vld [vmem:[%s8516_s0 + $0xb0] sm:$0xff] }
  0x5f   :  { %1675 = vmatprep.mubr.f32.mxu1 %v8608_v6 }
  0x61   :  { %4265 = vmatmul.mubr.msk.f32.gmra.mxu0 %vm309_vm0, %v173_v4 }
  0x62   :  { %4393 = vmatmul.mubr.msk.f32.gmra.mxu1 %vm309_vm0, %v173_v4  ;;  %848 = vmatprep.mubr.f32.mxu0 %v8608_v6  ;;  %v182_v4 = vld [vmem:[%s8516_s0 + $0xb8] sm:$0xff] }
  0x63   :  { %1681 = vmatprep.mubr.f32.mxu1 %v8608_v6 }
  0x65   :  { %4266 = vmatmul.mubr.msk.f32.gmra.mxu0 %vm309_vm0, %v174_v1 }
  0x66   :  { %4394 = vmatmul.mubr.msk.f32.gmra.mxu1 %vm309_vm0, %v174_v1  ;;  %854 = vmatprep.mubr.f32.mxu0 %v8608_v6  ;;  %v183_v1 = vld [vmem:[%s8516_s0 + $0xc0] sm:$0xff] }
  0x67   :  { %1687 = vmatprep.mubr.f32.mxu1 %v8608_v6 }
  0x69   :  { %4267 = vmatmul.mubr.msk.f32.gmra.mxu0 %vm309_vm0, %v175_v8 }
  0x6a   :  { %4395 = vmatmul.mubr.msk.f32.gmra.mxu1 %vm309_vm0, %v175_v8  ;;  %860 = vmatprep.mubr.f32.mxu0 %v8608_v6  ;;  %v184_v8 = vld [vmem:[%s8516_s0 + $0xc8] sm:$0xff] }
  0x6b   :  { %1693 = vmatprep.mubr.f32.mxu1 %v8608_v6 }
  0x6d   :  { %4268 = vmatmul.mubr.msk.f32.gmra.mxu0 %vm309_vm0, %v176_v2 }
  0x6e   :  { %4396 = vmatmul.mubr.msk.f32.gmra.mxu1 %vm309_vm0, %v176_v2  ;;  %866 = vmatprep.mubr.f32.mxu0 %v8608_v6  ;;  %v185_v2 = vld [vmem:[%s8516_s0 + $0xd0] sm:$0xff] }
  0x6f   :  { %1699 = vmatprep.mubr.f32.mxu1 %v8608_v6 }
  0x71   :  { %4269 = vmatmul.mubr.msk.f32.gmra.mxu0 %vm309_vm0, %v177_v9 }
  0x72   :  { %4397 = vmatmul.mubr.msk.f32.gmra.mxu1 %vm309_vm0, %v177_v9  ;;  %872 = vmatprep.mubr.f32.mxu0 %v8608_v6  ;;  %v186_v9 = vld [vmem:[%s8516_s0 + $0xd8] sm:$0xff] }
  0x73   :  { %1705 = vmatprep.mubr.f32.mxu1 %v8608_v6 }
  0x75   :  { %4270 = vmatmul.mubr.msk.f32.gmra.mxu0 %vm309_vm0, %v178_v12 }
  0x76   :  { %4398 = vmatmul.mubr.msk.f32.gmra.mxu1 %vm309_vm0, %v178_v12  ;;  %878 = vmatprep.mubr.f32.mxu0 %v8608_v6  ;;  %v187_v12 = vld [vmem:[%s8516_s0 + $0xe0] sm:$0xff] }
  0x77   :  { %1711 = vmatprep.mubr.f32.mxu1 %v8608_v6 }
  0x79   :  { %4271 = vmatmul.mubr.msk.f32.gmra.mxu0 %vm309_vm0, %v179_v7 }
  0x7a   :  { %4399 = vmatmul.mubr.msk.f32.gmra.mxu1 %vm309_vm0, %v179_v7  ;;  %884 = vmatprep.mubr.f32.mxu0 %v8608_v6  ;;  %v188_v7 = vld [vmem:[%s8516_s0 + $0xe8] sm:$0xff] }
  0x7b   :  { %1717 = vmatprep.mubr.f32.mxu1 %v8608_v6 }
  0x7d   :  { %4272 = vmatmul.mubr.msk.f32.gmra.mxu0 %vm309_vm0, %v180_v13 }
  0x7e   :  { %4400 = vmatmul.mubr.msk.f32.gmra.mxu1 %vm309_vm0, %v180_v13  ;;  %890 = vmatprep.mubr.f32.mxu0 %v8608_v6  ;;  %v189_v13 = vld [vmem:[%s8516_s0 + $0xf0] sm:$0xff] }
  0x7f   :  { %1723 = vmatprep.mubr.f32.mxu1 %v8608_v6 }
  0x81   :  { %4273 = vmatmul.mubr.msk.f32.gmra.mxu0 %vm309_vm0, %v181_v3 }
  0x82   :  { %4401 = vmatmul.mubr.msk.f32.gmra.mxu1 %vm309_vm0, %v181_v3  ;;  %896 = vmatprep.mubr.f32.mxu0 %v8608_v6  ;;  %v190_v3 = vld [vmem:[%s8516_s0 + $0xf8] sm:$0xff] }
  0x83   :  { %1729 = vmatprep.mubr.f32.mxu1 %v8608_v6 }
  0x85   :  { %4274 = vmatmul.mubr.msk.f32.gmra.mxu0 %vm309_vm0, %v182_v4 }
  0x86   :  { %4402 = vmatmul.mubr.msk.f32.gmra.mxu1 %vm309_vm0, %v182_v4  ;;  %902 = vmatprep.mubr.f32.mxu0 %v8608_v6  ;;  %v191_v4 = vld [vmem:[%s8516_s0 + $0x100] sm:$0xff] }
  0x87   :  { %1735 = vmatprep.mubr.f32.mxu1 %v8608_v6 }
  0x89   :  { %4275 = vmatmul.mubr.msk.f32.gmra.mxu0 %vm309_vm0, %v183_v1 }
  0x8a   :  { %4403 = vmatmul.mubr.msk.f32.gmra.mxu1 %vm309_vm0, %v183_v1  ;;  %908 = vmatprep.mubr.f32.mxu0 %v8608_v6  ;;  %v192_v1 = vld [vmem:[%s8516_s0 + $0x108] sm:$0xff] }
  0x8b   :  { %1741 = vmatprep.mubr.f32.mxu1 %v8608_v6 }
  0x8d   :  { %4276 = vmatmul.mubr.msk.f32.gmra.mxu0 %vm309_vm0, %v184_v8 }
  0x8e   :  { %4404 = vmatmul.mubr.msk.f32.gmra.mxu1 %vm309_vm0, %v184_v8  ;;  %914 = vmatprep.mubr.f32.mxu0 %v8608_v6  ;;  %v193_v8 = vld [vmem:[%s8516_s0 + $0x110] sm:$0xff] }
  0x8f   :  { %1747 = vmatprep.mubr.f32.mxu1 %v8608_v6 }
  0x91   :  { %4277 = vmatmul.mubr.msk.f32.gmra.mxu0 %vm309_vm0, %v185_v2 }
  0x92   :  { %4405 = vmatmul.mubr.msk.f32.gmra.mxu1 %vm309_vm0, %v185_v2  ;;  %920 = vmatprep.mubr.f32.mxu0 %v8608_v6  ;;  %v194_v2 = vld [vmem:[%s8516_s0 + $0x118] sm:$0xff] }
  0x93   :  { %1753 = vmatprep.mubr.f32.mxu1 %v8608_v6 }
  0x95   :  { %4278 = vmatmul.mubr.msk.f32.gmra.mxu0 %vm309_vm0, %v186_v9 }
  0x96   :  { %4406 = vmatmul.mubr.msk.f32.gmra.mxu1 %vm309_vm0, %v186_v9  ;;  %926 = vmatprep.mubr.f32.mxu0 %v8608_v6  ;;  %v195_v9 = vld [vmem:[%s8516_s0 + $0x120] sm:$0xff] }
  0x97   :  { %1759 = vmatprep.mubr.f32.mxu1 %v8608_v6 }
  0x99   :  { %4279 = vmatmul.mubr.msk.f32.gmra.mxu0 %vm309_vm0, %v187_v12 }
  0x9a   :  { %4407 = vmatmul.mubr.msk.f32.gmra.mxu1 %vm309_vm0, %v187_v12  ;;  %932 = vmatprep.mubr.f32.mxu0 %v8608_v6  ;;  %v196_v12 = vld [vmem:[%s8516_s0 + $0x128] sm:$0xff] }
  0x9b   :  { %1765 = vmatprep.mubr.f32.mxu1 %v8608_v6 }
  0x9d   :  { %4280 = vmatmul.mubr.msk.f32.gmra.mxu0 %vm309_vm0, %v188_v7 }
  0x9e   :  { %4408 = vmatmul.mubr.msk.f32.gmra.mxu1 %vm309_vm0, %v188_v7  ;;  %938 = vmatprep.mubr.f32.mxu0 %v8608_v6  ;;  %v197_v7 = vld [vmem:[%s8516_s0 + $0x130] sm:$0xff] }
  0x9f   :  { %1771 = vmatprep.mubr.f32.mxu1 %v8608_v6 }
  0xa1   :  { %4281 = vmatmul.mubr.msk.f32.gmra.mxu0 %vm309_vm0, %v189_v13 }
  0xa2   :  { %4409 = vmatmul.mubr.msk.f32.gmra.mxu1 %vm309_vm0, %v189_v13  ;;  %944 = vmatprep.mubr.f32.mxu0 %v8608_v6  ;;  %v198_v13 = vld [vmem:[%s8516_s0 + $0x138] sm:$0xff] }
  0xa3   :  { %1777 = vmatprep.mubr.f32.mxu1 %v8608_v6 }
  0xa5   :  { %4282 = vmatmul.mubr.msk.f32.gmra.mxu0 %vm309_vm0, %v190_v3 }
  0xa6   :  { %4410 = vmatmul.mubr.msk.f32.gmra.mxu1 %vm309_vm0, %v190_v3  ;;  %950 = vmatprep.mubr.f32.mxu0 %v8608_v6  ;;  %v199_v3 = vld [vmem:[%s8516_s0 + $0x140] sm:$0xff] }
  0xa7   :  { %1783 = vmatprep.mubr.f32.mxu1 %v8608_v6 }
  0xa9   :  { %4283 = vmatmul.mubr.msk.f32.gmra.mxu0 %vm309_vm0, %v191_v4 }
  0xaa   :  { %4411 = vmatmul.mubr.msk.f32.gmra.mxu1 %vm309_vm0, %v191_v4  ;;  %956 = vmatprep.mubr.f32.mxu0 %v8608_v6  ;;  %v200_v4 = vld [vmem:[%s8516_s0 + $0x148] sm:$0xff] }
  0xab   :  { %1789 = vmatprep.mubr.f32.mxu1 %v8608_v6 }
  0xad   :  { %4284 = vmatmul.mubr.msk.f32.gmra.mxu0 %vm309_vm0, %v192_v1 }
  0xae   :  { %4412 = vmatmul.mubr.msk.f32.gmra.mxu1 %vm309_vm0, %v192_v1  ;;  %962 = vmatprep.mubr.f32.mxu0 %v8608_v6  ;;  %v201_v1 = vld [vmem:[%s8516_s0 + $0x150] sm:$0xff] }
  0xaf   :  { %1795 = vmatprep.mubr.f32.mxu1 %v8608_v6 }
  0xb1   :  { %4285 = vmatmul.mubr.msk.f32.gmra.mxu0 %vm309_vm0, %v193_v8 }
  0xb2   :  { %4413 = vmatmul.mubr.msk.f32.gmra.mxu1 %vm309_vm0, %v193_v8  ;;  %968 = vmatprep.mubr.f32.mxu0 %v8608_v6  ;;  %v202_v8 = vld [vmem:[%s8516_s0 + $0x158] sm:$0xff] }
  0xb3   :  { %1801 = vmatprep.mubr.f32.mxu1 %v8608_v6 }
  0xb5   :  { %4286 = vmatmul.mubr.msk.f32.gmra.mxu0 %vm309_vm0, %v194_v2 }
  0xb6   :  { %4414 = vmatmul.mubr.msk.f32.gmra.mxu1 %vm309_vm0, %v194_v2  ;;  %974 = vmatprep.mubr.f32.mxu0 %v8608_v6  ;;  %v203_v2 = vld [vmem:[%s8516_s0 + $0x160] sm:$0xff] }
  0xb7   :  { %1807 = vmatprep.mubr.f32.mxu1 %v8608_v6 }
  0xb9   :  { %4287 = vmatmul.mubr.msk.f32.gmra.mxu0 %vm309_vm0, %v195_v9 }
  0xba   :  { %4415 = vmatmul.mubr.msk.f32.gmra.mxu1 %vm309_vm0, %v195_v9  ;;  %980 = vmatprep.mubr.f32.mxu0 %v8608_v6  ;;  %v204_v9 = vld [vmem:[%s8516_s0 + $0x168] sm:$0xff] }
  0xbb   :  { %1813 = vmatprep.mubr.f32.mxu1 %v8608_v6 }
  0xbd   :  { %4288 = vmatmul.mubr.msk.f32.gmra.mxu0 %vm309_vm0, %v196_v12 }
  0xbe   :  { %4416 = vmatmul.mubr.msk.f32.gmra.mxu1 %vm309_vm0, %v196_v12  ;;  %986 = vmatprep.mubr.f32.mxu0 %v8608_v6  ;;  %v289_v12 = vlaneseq }
  0xbf   :  { %1819 = vmatprep.mubr.f32.mxu1 %v8608_v6 }
  0xc1   :  { %4289 = vmatmul.mubr.msk.f32.gmra.mxu0 %vm309_vm0, %v197_v7 }
  0xc2   :  { %4417 = vmatmul.mubr.msk.f32.gmra.mxu1 %vm309_vm0, %v197_v7  ;;  %992 = vmatprep.mubr.f32.mxu0 %v8608_v6  ;;  %v205_v7 = vld [vmem:[%s8516_s0 + $0x170] sm:$0xff] }
  0xc3   :  { %1825 = vmatprep.mubr.f32.mxu1 %v8608_v6 }
  0xc5   :  { %4290 = vmatmul.mubr.msk.f32.gmra.mxu0 %vm309_vm0, %v198_v13 }
  0xc6   :  { %4418 = vmatmul.mubr.msk.f32.gmra.mxu1 %vm309_vm0, %v198_v13  ;;  %998 = vmatprep.mubr.f32.mxu0 %v8608_v6  ;;  %v290_v13 = vshrl.u32 %v289_v12, 7 }
  0xc7   :  { %1831 = vmatprep.mubr.f32.mxu1 %v8608_v6 }
  0xc9   :  { %4291 = vmatmul.mubr.msk.f32.gmra.mxu0 %vm309_vm0, %v199_v3 }
  0xca   :  { %4419 = vmatmul.mubr.msk.f32.gmra.mxu1 %vm309_vm0, %v199_v3  ;;  %1004 = vmatprep.mubr.f32.mxu0 %v8608_v6  ;;  %v206_v3 = vld [vmem:[%s8516_s0 + $0x178] sm:$0xff] }
  0xcb   :  { %1837 = vmatprep.mubr.f32.mxu1 %v8608_v6 }
  0xcd   :  { %4292 = vmatmul.mubr.msk.f32.gmra.mxu0 %vm309_vm0, %v200_v4 }
  0xce   :  { %4420 = vmatmul.mubr.msk.f32.gmra.mxu1 %vm309_vm0, %v200_v4  ;;  %1010 = vmatprep.mubr.f32.mxu0 %v8608_v6  ;;  %v291_v4 = vsub.s32 0, %v290_v13 }
  0xcf   :  { %1843 = vmatprep.mubr.f32.mxu1 %v8608_v6 }
  0xd1   :  { %4293 = vmatmul.mubr.msk.f32.gmra.mxu0 %vm309_vm0, %v201_v1 }
  0xd2   :  { %4421 = vmatmul.mubr.msk.f32.gmra.mxu1 %vm309_vm0, %v201_v1  ;;  %1016 = vmatprep.mubr.f32.mxu0 %v8608_v6  ;;  %v287_v1 = vld [vmem:[%s8520_s4] sm:$0xf] }
  0xd3   :  { %1849 = vmatprep.mubr.f32.mxu1 %v8608_v6  ;;  %v6364_v12 = vrot.slane %v287_v1, %v291_v4  ;;  %v208_v4 = vld [vmem:[%s8516_s0 + $0x188] sm:$0xff] }
  0xd5   :  { %4294 = vmatmul.mubr.msk.f32.gmra.mxu0 %vm309_vm0, %v202_v8 }
  0xd6   :  { %4422 = vmatmul.mubr.msk.f32.gmra.mxu1 %vm309_vm0, %v202_v8  ;;  %1022 = vmatprep.mubr.f32.mxu0 %v8608_v6  ;;  %v299_v8 = vsub.s32 2, %v290_v13 }
  0xd7   :  { %1855 = vmatprep.mubr.f32.mxu1 %v8608_v6 }
  0xd8   :  { %v6370_v10 = vrot.slane %v287_v1, %v299_v8 }
  0xd9   :  { %4295 = vmatmul.mubr.msk.f32.gmra.mxu0 %vm309_vm0, %v203_v2 }
  0xda   :  { %4423 = vmatmul.mubr.msk.f32.gmra.mxu1 %vm309_vm0, %v203_v2  ;;  %1028 = vmatprep.mubr.f32.mxu0 %v8608_v6  ;;  %v295_v2 = vsub.s32 1, %v290_v13 }
  0xdb   :  { %1861 = vmatprep.mubr.f32.mxu1 %v8608_v6 }
  0xdc   :  { %v6372_v16 = vrot.slane %v287_v1, %v295_v2 }
  0xdd   :  { %4296 = vmatmul.mubr.msk.f32.gmra.mxu0 %vm309_vm0, %v204_v9 }
  0xde   :  { %4424 = vmatmul.mubr.msk.f32.gmra.mxu1 %vm309_vm0, %v204_v9  ;;  %1034 = vmatprep.mubr.f32.mxu0 %v8608_v6  ;;  %v303_v9 = vsub.s32 3, %v290_v13 }
  0xdf   :  { %1867 = vmatprep.mubr.f32.mxu1 %v8608_v6 }
  0xe0   :  { %v6375_v13 = vrot.slane %v287_v1, %v303_v9 }
  0xe1   :  { %4297 = vmatmul.mubr.msk.f32.gmra.mxu0 %vm309_vm0, %v205_v7 }
  0xe2   :  { %4425 = vmatmul.mubr.msk.f32.gmra.mxu1 %vm309_vm0, %v205_v7  ;;  %1040 = vmatprep.mubr.f32.mxu0 %v8608_v6  ;;  %v207_v7 = vld [vmem:[%s8516_s0 + $0x180] sm:$0xff] }
  0xe3   :  { %1873 = vmatprep.mubr.f32.mxu1 %v8608_v6 }
  0xe5   :  { %4298 = vmatmul.mubr.msk.f32.gmra.mxu0 %vm309_vm0, %v206_v3 }
  0xe6   :  { %4426 = vmatmul.mubr.msk.f32.gmra.mxu1 %vm309_vm0, %v206_v3  ;;  %1046 = vmatprep.mubr.f32.mxu0 %v8608_v6 }
  0xe7   :  { %1879 = vmatprep.mubr.f32.mxu1 %v8608_v6 }
  0xe9   :  { %v760_v11 = vpop.f32.mrf.mxu0  ;;  %4299 = vmatmul.mubr.msk.f32.gmra.mxu0 %vm309_vm0, %v207_v7 }
  0xea   :  { %v761_v3 = vadd.f32 %v760_v11, %v6364_v12  ;;  %v1593_v14 = vpop.f32.mrf.mxu1  ;;  %4427 = vmatmul.mubr.msk.f32.gmra.mxu1 %vm309_vm0, %v207_v7  ;;  %1052 = vmatprep.mubr.f32.mxu0 %v8608_v6 }
  0xeb   :  { %v1594_v8 = vadd.f32 %v1593_v14, %v6370_v10  ;;  %v762_v2 = vpop.f32.mrf.mxu0  ;;  %1885 = vmatprep.mubr.f32.mxu1 %v8608_v6  ;;  %v209_v14 = vld [vmem:[%s8516_s0 + $0x190] sm:$0xff] }
  0xec   :  { %2360 = vst [vmem:[#allocation2] sm:$0xff] %v761_v3  ;;  %v763_v1 = vadd.f32 %v762_v2, %v6372_v16  ;;  %v1595_v9 = vpop.f32.mrf.mxu1 }
  0xed   :  { %2362 = vst [vmem:[#allocation2 + $0x10] sm:$0xff] %v1594_v8  ;;  %v1596_v11 = vadd.f32 %v1595_v9, %v6375_v13  ;;  %v766_v17 = vpop.f32.mrf.mxu0  ;;  %4300 = vmatmul.mubr.msk.f32.gmra.mxu0 %vm309_vm0, %v208_v4 }
  0xee   :  { %2361 = vst [vmem:[#allocation2 + $0x8] sm:$0xff] %v763_v1  ;;  %v767_v7 = vadd.f32 %v766_v17, %v6364_v12  ;;  %v1599_v15 = vpop.f32.mrf.mxu1  ;;  %4428 = vmatmul.mubr.msk.f32.gmra.mxu1 %vm309_vm0, %v208_v4  ;;  %1058 = vmatprep.mubr.f32.mxu0 %v8608_v6 }
  0xef   :  { %2363 = vst [vmem:[#allocation2 + $0x18] sm:$0xff] %v1596_v11  ;;  %v1600_v3 = vadd.f32 %v1599_v15, %v6370_v10  ;;  %v768_v8 = vpop.f32.mrf.mxu0  ;;  %1891 = vmatprep.mubr.f32.mxu1 %v8608_v6  ;;  %v210_v15 = vld [vmem:[%s8516_s0 + $0x198] sm:$0xff] }
  0xf0   :  { %2364 = vst [vmem:[#allocation2 + $0x20] sm:$0xff] %v767_v7  ;;  %v769_v2 = vadd.f32 %v768_v8, %v6372_v16  ;;  %v1601_v1 = vpop.f32.mrf.mxu1 }
  0xf1   :  { %2366 = vst [vmem:[#allocation2 + $0x30] sm:$0xff] %v1600_v3  ;;  %v1602_v17 = vadd.f32 %v1601_v1, %v6375_v13  ;;  %v772_v4 = vpop.f32.mrf.mxu0  ;;  %4301 = vmatmul.mubr.msk.f32.gmra.mxu0 %vm309_vm0, %v209_v14 }
  0xf2   :  { %2365 = vst [vmem:[#allocation2 + $0x28] sm:$0xff] %v769_v2  ;;  %v773_v9 = vadd.f32 %v772_v4, %v6364_v12  ;;  %v1605_v20 = vpop.f32.mrf.mxu1  ;;  %4429 = vmatmul.mubr.msk.f32.gmra.mxu1 %vm309_vm0, %v209_v14  ;;  %1064 = vmatprep.mubr.f32.mxu0 %v8608_v6 }
  0xf3   :  { %2367 = vst [vmem:[#allocation2 + $0x38] sm:$0xff] %v1602_v17  ;;  %v1606_v11 = vadd.f32 %v1605_v20, %v6370_v10  ;;  %v774_v7 = vpop.f32.mrf.mxu0  ;;  %1897 = vmatprep.mubr.f32.mxu1 %v8608_v6  ;;  %v211_v20 = vld [vmem:[%s8516_s0 + $0x1a0] sm:$0xff] }
  0xf4   :  { %2368 = vst [vmem:[#allocation2 + $0x40] sm:$0xff] %v773_v9  ;;  %v775_v3 = vadd.f32 %v774_v7, %v6372_v16  ;;  %v1607_v8 = vpop.f32.mrf.mxu1 }
  0xf5   :  { %2370 = vst [vmem:[#allocation2 + $0x50] sm:$0xff] %v1606_v11  ;;  %v1608_v2 = vadd.f32 %v1607_v8, %v6375_v13  ;;  %v778_v14 = vpop.f32.mrf.mxu0  ;;  %4302 = vmatmul.mubr.msk.f32.gmra.mxu0 %vm309_vm0, %v210_v15 }
  0xf6   :  { %2369 = vst [vmem:[#allocation2 + $0x48] sm:$0xff] %v775_v3  ;;  %v779_v1 = vadd.f32 %v778_v14, %v6364_v12  ;;  %v1611_v4 = vpop.f32.mrf.mxu1  ;;  %4430 = vmatmul.mubr.msk.f32.gmra.mxu1 %vm309_vm0, %v210_v15  ;;  %1070 = vmatprep.mubr.f32.mxu0 %v8608_v6 }
  0xf7   :  { %2371 = vst [vmem:[#allocation2 + $0x58] sm:$0xff] %v1608_v2  ;;  %v1612_v17 = vadd.f32 %v1611_v4, %v6370_v10  ;;  %v780_v9 = vpop.f32.mrf.mxu0  ;;  %1903 = vmatprep.mubr.f32.mxu1 %v8608_v6  ;;  %v212_v2 = vld [vmem:[%s8516_s0 + $0x1a8] sm:$0xff] }
  0xf8   :  { %2372 = vst [vmem:[#allocation2 + $0x60] sm:$0xff] %v779_v1  ;;  %v781_v11 = vadd.f32 %v780_v9, %v6372_v16  ;;  %v1613_v7 = vpop.f32.mrf.mxu1 }
  0xf9   :  { %2374 = vst [vmem:[#allocation2 + $0x70] sm:$0xff] %v1612_v17  ;;  %v1614_v3 = vadd.f32 %v1613_v7, %v6375_v13  ;;  %v784_v15 = vpop.f32.mrf.mxu0  ;;  %4303 = vmatmul.mubr.msk.f32.gmra.mxu0 %vm309_vm0, %v211_v20 }
  0xfa   :  { %2373 = vst [vmem:[#allocation2 + $0x68] sm:$0xff] %v781_v11  ;;  %v785_v8 = vadd.f32 %v784_v15, %v6364_v12  ;;  %v1617_v14 = vpop.f32.mrf.mxu1  ;;  %4431 = vmatmul.mubr.msk.f32.gmra.mxu1 %vm309_vm0, %v211_v20  ;;  %1076 = vmatprep.mubr.f32.mxu0 %v8608_v6 }
  0xfb   :  { %2375 = vst [vmem:[#allocation2 + $0x78] sm:$0xff] %v1614_v3  ;;  %v1618_v1 = vadd.f32 %v1617_v14, %v6370_v10  ;;  %v786_v4 = vpop.f32.mrf.mxu0  ;;  %1909 = vmatprep.mubr.f32.mxu1 %v8608_v6  ;;  %v213_v3 = vld [vmem:[%s8516_s0 + $0x1b0] sm:$0xff] }
  0xfc   :  { %2376 = vst [vmem:[#allocation2 + $0x80] sm:$0xff] %v785_v8  ;;  %v787_v17 = vadd.f32 %v786_v4, %v6372_v16  ;;  %v1619_v9 = vpop.f32.mrf.mxu1 }
  0xfd   :  { %2378 = vst [vmem:[#allocation2 + $0x90] sm:$0xff] %v1618_v1  ;;  %v1620_v11 = vadd.f32 %v1619_v9, %v6375_v13  ;;  %v790_v20 = vpop.f32.mrf.mxu0  ;;  %4304 = vmatmul.mubr.msk.f32.gmra.mxu0 %vm309_vm0, %v212_v2 }
  0xfe   :  { %2377 = vst [vmem:[#allocation2 + $0x88] sm:$0xff] %v787_v17  ;;  %v791_v7 = vadd.f32 %v790_v20, %v6364_v12  ;;  %v1623_v15 = vpop.f32.mrf.mxu1  ;;  %4432 = vmatmul.mubr.msk.f32.gmra.mxu1 %vm309_vm0, %v212_v2  ;;  %1082 = vmatprep.mubr.f32.mxu0 %v8608_v6 }
  0xff   :  { %2379 = vst [vmem:[#allocation2 + $0x98] sm:$0xff] %v1620_v11  ;;  %v1624_v8 = vadd.f32 %v1623_v15, %v6370_v10  ;;  %v792_v14 = vpop.f32.mrf.mxu0  ;;  %1915 = vmatprep.mubr.f32.mxu1 %v8608_v6  ;;  %v214_v11 = vld [vmem:[%s8516_s0 + $0x1b8] sm:$0xff] }
 0x100   :  { %2380 = vst [vmem:[#allocation2 + $0xa0] sm:$0xff] %v791_v7  ;;  %v793_v1 = vadd.f32 %v792_v14, %v6372_v16  ;;  %v1625_v4 = vpop.f32.mrf.mxu1 }
 0x101   :  { %2382 = vst [vmem:[#allocation2 + $0xb0] sm:$0xff] %v1624_v8  ;;  %v1626_v17 = vadd.f32 %v1625_v4, %v6375_v13  ;;  %v796_v2 = vpop.f32.mrf.mxu0  ;;  %4305 = vmatmul.mubr.msk.f32.gmra.mxu0 %vm309_vm0, %v213_v3 }
 0x102   :  { %2381 = vst [vmem:[#allocation2 + $0xa8] sm:$0xff] %v793_v1  ;;  %v797_v9 = vadd.f32 %v796_v2, %v6364_v12  ;;  %v1629_v20 = vpop.f32.mrf.mxu1  ;;  %4433 = vmatmul.mubr.msk.f32.gmra.mxu1 %vm309_vm0, %v213_v3  ;;  %1088 = vmatprep.mubr.f32.mxu0 %v8608_v6 }
 0x103   :  { %2383 = vst [vmem:[#allocation2 + $0xb8] sm:$0xff] %v1626_v17  ;;  %v1630_v7 = vadd.f32 %v1629_v20, %v6370_v10  ;;  %v798_v15 = vpop.f32.mrf.mxu0  ;;  %1921 = vmatprep.mubr.f32.mxu1 %v8608_v6  ;;  %v6456_v17 = vld [vmem:[#allocation3 + $0x30] sm:$0xff]  ;;  %v215_v6 = vld [vmem:[%s8516_s0 + $0x1c0] sm:$0xff] }
 0x104   :  { %2384 = vst [vmem:[#allocation2 + $0xc0] sm:$0xff] %v797_v9  ;;  %v799_v8 = vadd.f32 %v798_v15, %v6372_v16  ;;  %v1631_v14 = vpop.f32.mrf.mxu1 }
 0x105   :  { %2386 = vst [vmem:[#allocation2 + $0xd0] sm:$0xff] %v1630_v7  ;;  %v1632_v1 = vadd.f32 %v1631_v14, %v6375_v13  ;;  %v802_v3 = vpop.f32.mrf.mxu0  ;;  %4306 = vmatmul.mubr.msk.f32.gmra.mxu0 %vm309_vm0, %v214_v11 }
 0x106   :  { %2385 = vst [vmem:[#allocation2 + $0xc8] sm:$0xff] %v799_v8  ;;  %v803_v4 = vadd.f32 %v802_v3, %v6364_v12  ;;  %v1635_v2 = vpop.f32.mrf.mxu1  ;;  %4434 = vmatmul.mubr.msk.f32.gmra.mxu1 %vm309_vm0, %v214_v11  ;;  %1094 = vmatprep.mubr.f32.mxu0 %v6456_v17 }
 0x107   :  { %2387 = vst [vmem:[#allocation2 + $0xd8] sm:$0xff] %v1632_v1  ;;  %v1636_v9 = vadd.f32 %v1635_v2, %v6370_v10  ;;  %v804_v20 = vpop.f32.mrf.mxu0  ;;  %1927 = vmatprep.mubr.f32.mxu1 %v6456_v17  ;;  %v216_v1 = vld [vmem:[%s8516_s0 + $0x1c8] sm:$0xff] }
 0x108   :  { %2388 = vst [vmem:[#allocation2 + $0xe0] sm:$0xff] %v803_v4  ;;  %v805_v7 = vadd.f32 %v804_v20, %v6372_v16  ;;  %v1637_v15 = vpop.f32.mrf.mxu1 }
 0x109   :  { %2390 = vst [vmem:[#allocation2 + $0xf0] sm:$0xff] %v1636_v9  ;;  %v1638_v11 = vadd.f32 %v1637_v15, %v6375_v13  ;;  %v808_v8 = vpop.f32.mrf.mxu0  ;;  %4307 = vmatmul.mubr.msk.f32.gmra.mxu0 %vm309_vm0, %v215_v6 }
 0x10a   :  { %2389 = vst [vmem:[#allocation2 + $0xe8] sm:$0xff] %v805_v7  ;;  %v809_v14 = vadd.f32 %v808_v8, %v6364_v12  ;;  %v1641_v3 = vpop.f32.mrf.mxu1  ;;  %4435 = vmatmul.mubr.msk.f32.gmra.mxu1 %vm309_vm0, %v215_v6  ;;  %1100 = vmatprep.mubr.f32.mxu0 %v6456_v17 }
 0x10b   :  { %2391 = vst [vmem:[#allocation2 + $0xf8] sm:$0xff] %v1638_v11  ;;  %v1642_v4 = vadd.f32 %v1641_v3, %v6370_v10  ;;  %v810_v2 = vpop.f32.mrf.mxu0  ;;  %1933 = vmatprep.mubr.f32.mxu1 %v6456_v17  ;;  %v217_v11 = vld [vmem:[%s8516_s0 + $0x1d0] sm:$0xff] }
 0x10c   :  { %2392 = vst [vmem:[#allocation2 + $0x100] sm:$0xff] %v809_v14  ;;  %v811_v9 = vadd.f32 %v810_v2, %v6372_v16  ;;  %v1643_v20 = vpop.f32.mrf.mxu1 }
 0x10d   :  { %2394 = vst [vmem:[#allocation2 + $0x110] sm:$0xff] %v1642_v4  ;;  %v1644_v7 = vadd.f32 %v1643_v20, %v6375_v13  ;;  %v814_v6 = vpop.f32.mrf.mxu0  ;;  %4308 = vmatmul.mubr.msk.f32.gmra.mxu0 %vm309_vm0, %v216_v1 }
 0x10e   :  { %2393 = vst [vmem:[#allocation2 + $0x108] sm:$0xff] %v811_v9  ;;  %v815_v15 = vadd.f32 %v814_v6, %v6364_v12  ;;  %v1647_v8 = vpop.f32.mrf.mxu1  ;;  %4436 = vmatmul.mubr.msk.f32.gmra.mxu1 %vm309_vm0, %v216_v1  ;;  %1106 = vmatprep.mubr.f32.mxu0 %v6456_v17 }
 0x10f   :  { %2395 = vst [vmem:[#allocation2 + $0x118] sm:$0xff] %v1644_v7  ;;  %v1648_v14 = vadd.f32 %v1647_v8, %v6370_v10  ;;  %v816_v3 = vpop.f32.mrf.mxu0  ;;  %1939 = vmatprep.mubr.f32.mxu1 %v6456_v17  ;;  %v218_v7 = vld [vmem:[%s8516_s0 + $0x1d8] sm:$0xff] }
 0x110   :  { %2396 = vst [vmem:[#allocation2 + $0x120] sm:$0xff] %v815_v15  ;;  %v817_v4 = vadd.f32 %v816_v3, %v6372_v16  ;;  %v1649_v2 = vpop.f32.mrf.mxu1 }
 0x111   :  { %2398 = vst [vmem:[#allocation2 + $0x130] sm:$0xff] %v1648_v14  ;;  %v1650_v9 = vadd.f32 %v1649_v2, %v6375_v13  ;;  %v820_v1 = vpop.f32.mrf.mxu0  ;;  %4309 = vmatmul.mubr.msk.f32.gmra.mxu0 %vm309_vm0, %v217_v11 }
 0x112   :  { %2397 = vst [vmem:[#allocation2 + $0x128] sm:$0xff] %v817_v4  ;;  %v821_v20 = vadd.f32 %v820_v1, %v6364_v12  ;;  %v1653_v6 = vpop.f32.mrf.mxu1  ;;  %4437 = vmatmul.mubr.msk.f32.gmra.mxu1 %vm309_vm0, %v217_v11  ;;  %1112 = vmatprep.mubr.f32.mxu0 %v6456_v17 }
 0x113   :  { %2399 = vst [vmem:[#allocation2 + $0x138] sm:$0xff] %v1650_v9  ;;  %v1654_v15 = vadd.f32 %v1653_v6, %v6370_v10  ;;  %v822_v8 = vpop.f32.mrf.mxu0  ;;  %1945 = vmatprep.mubr.f32.mxu1 %v6456_v17  ;;  %v219_v9 = vld [vmem:[%s8516_s0 + $0x1e0] sm:$0xff] }
 0x114   :  { %2400 = vst [vmem:[#allocation2 + $0x140] sm:$0xff] %v821_v20  ;;  %v823_v14 = vadd.f32 %v822_v8, %v6372_v16  ;;  %v1655_v3 = vpop.f32.mrf.mxu1 }
 0x115   :  { %2402 = vst [vmem:[#allocation2 + $0x150] sm:$0xff] %v1654_v15  ;;  %v1656_v4 = vadd.f32 %v1655_v3, %v6375_v13  ;;  %v826_v11 = vpop.f32.mrf.mxu0  ;;  %4310 = vmatmul.mubr.msk.f32.gmra.mxu0 %vm309_vm0, %v218_v7 }
 0x116   :  { %2401 = vst [vmem:[#allocation2 + $0x148] sm:$0xff] %v823_v14  ;;  %v827_v2 = vadd.f32 %v826_v11, %v6364_v12  ;;  %v1659_v1 = vpop.f32.mrf.mxu1  ;;  %4438 = vmatmul.mubr.msk.f32.gmra.mxu1 %vm309_vm0, %v218_v7  ;;  %1118 = vmatprep.mubr.f32.mxu0 %v6456_v17 }
 0x117   :  { %2403 = vst [vmem:[#allocation2 + $0x158] sm:$0xff] %v1656_v4  ;;  %v1660_v20 = vadd.f32 %v1659_v1, %v6370_v10  ;;  %v828_v6 = vpop.f32.mrf.mxu0  ;;  %1951 = vmatprep.mubr.f32.mxu1 %v6456_v17  ;;  %v220_v4 = vld [vmem:[%s8516_s0 + $0x1e8] sm:$0xff] }
 0x118   :  { %2404 = vst [vmem:[#allocation2 + $0x160] sm:$0xff] %v827_v2  ;;  %v829_v15 = vadd.f32 %v828_v6, %v6372_v16  ;;  %v1661_v8 = vpop.f32.mrf.mxu1 }
 0x119   :  { %2406 = vst [vmem:[#allocation2 + $0x170] sm:$0xff] %v1660_v20  ;;  %v1662_v14 = vadd.f32 %v1661_v8, %v6375_v13  ;;  %v832_v7 = vpop.f32.mrf.mxu0  ;;  %4311 = vmatmul.mubr.msk.f32.gmra.mxu0 %vm309_vm0, %v219_v9 }
 0x11a   :  { %2405 = vst [vmem:[#allocation2 + $0x168] sm:$0xff] %v829_v15  ;;  %v833_v3 = vadd.f32 %v832_v7, %v6364_v12  ;;  %v1665_v11 = vpop.f32.mrf.mxu1  ;;  %4439 = vmatmul.mubr.msk.f32.gmra.mxu1 %vm309_vm0, %v219_v9  ;;  %1124 = vmatprep.mubr.f32.mxu0 %v6456_v17 }
 0x11b   :  { %2407 = vst [vmem:[#allocation2 + $0x178] sm:$0xff] %v1662_v14  ;;  %v1666_v2 = vadd.f32 %v1665_v11, %v6370_v10  ;;  %v834_v1 = vpop.f32.mrf.mxu0  ;;  %1957 = vmatprep.mubr.f32.mxu1 %v6456_v17  ;;  %v221_v14 = vld [vmem:[%s8516_s0 + $0x1f0] sm:$0xff] }
 0x11c   :  { %2408 = vst [vmem:[#allocation2 + $0x180] sm:$0xff] %v833_v3  ;;  %v835_v20 = vadd.f32 %v834_v1, %v6372_v16  ;;  %v1667_v6 = vpop.f32.mrf.mxu1 }
 0x11d   :  { %2410 = vst [vmem:[#allocation2 + $0x190] sm:$0xff] %v1666_v2  ;;  %v1668_v15 = vadd.f32 %v1667_v6, %v6375_v13  ;;  %v838_v9 = vpop.f32.mrf.mxu0  ;;  %4312 = vmatmul.mubr.msk.f32.gmra.mxu0 %vm309_vm0, %v220_v4 }
 0x11e   :  { %2409 = vst [vmem:[#allocation2 + $0x188] sm:$0xff] %v835_v20  ;;  %v839_v8 = vadd.f32 %v838_v9, %v6364_v12  ;;  %v1671_v7 = vpop.f32.mrf.mxu1  ;;  %4440 = vmatmul.mubr.msk.f32.gmra.mxu1 %vm309_vm0, %v220_v4  ;;  %1130 = vmatprep.mubr.f32.mxu0 %v6456_v17 }
 0x11f   :  { %2411 = vst [vmem:[#allocation2 + $0x198] sm:$0xff] %v1668_v15  ;;  %v1672_v3 = vadd.f32 %v1671_v7, %v6370_v10  ;;  %v840_v11 = vpop.f32.mrf.mxu0  ;;  %1963 = vmatprep.mubr.f32.mxu1 %v6456_v17  ;;  %v222_v15 = vld [vmem:[%s8516_s0 + $0x1f8] sm:$0xff] }
 0x120   :  { %2412 = vst [vmem:[#allocation2 + $0x1a0] sm:$0xff] %v839_v8  ;;  %v841_v2 = vadd.f32 %v840_v11, %v6372_v16  ;;  %v1673_v1 = vpop.f32.mrf.mxu1 }
 0x121   :  { %2414 = vst [vmem:[#allocation2 + $0x1b0] sm:$0xff] %v1672_v3  ;;  %v1674_v20 = vadd.f32 %v1673_v1, %v6375_v13  ;;  %v844_v4 = vpop.f32.mrf.mxu0  ;;  %4313 = vmatmul.mubr.msk.f32.gmra.mxu0 %vm309_vm0, %v221_v14 }
 0x122   :  { %2413 = vst [vmem:[#allocation2 + $0x1a8] sm:$0xff] %v841_v2  ;;  %v845_v6 = vadd.f32 %v844_v4, %v6364_v12  ;;  %v1677_v9 = vpop.f32.mrf.mxu1  ;;  %4441 = vmatmul.mubr.msk.f32.gmra.mxu1 %vm309_vm0, %v221_v14  ;;  %1136 = vmatprep.mubr.f32.mxu0 %v6456_v17 }
 0x123   :  { %2415 = vst [vmem:[#allocation2 + $0x1b8] sm:$0xff] %v1674_v20  ;;  %v1678_v8 = vadd.f32 %v1677_v9, %v6370_v10  ;;  %v846_v7 = vpop.f32.mrf.mxu0  ;;  %1969 = vmatprep.mubr.f32.mxu1 %v6456_v17  ;;  %v223_v20 = vld [vmem:[%s8516_s0 + $0x200] sm:$0xff] }
 0x124   :  { %2416 = vst [vmem:[#allocation2 + $0x1c0] sm:$0xff] %v845_v6  ;;  %v847_v3 = vadd.f32 %v846_v7, %v6372_v16  ;;  %v1679_v11 = vpop.f32.mrf.mxu1 }
 0x125   :  { %2418 = vst [vmem:[#allocation2 + $0x1d0] sm:$0xff] %v1678_v8  ;;  %v1680_v2 = vadd.f32 %v1679_v11, %v6375_v13  ;;  %v850_v14 = vpop.f32.mrf.mxu0  ;;  %4314 = vmatmul.mubr.msk.f32.gmra.mxu0 %vm309_vm0, %v222_v15 }
 0x126   :  { %2417 = vst [vmem:[#allocation2 + $0x1c8] sm:$0xff] %v847_v3  ;;  %v851_v1 = vadd.f32 %v850_v14, %v6364_v12  ;;  %v1683_v4 = vpop.f32.mrf.mxu1  ;;  %4442 = vmatmul.mubr.msk.f32.gmra.mxu1 %vm309_vm0, %v222_v15  ;;  %1142 = vmatprep.mubr.f32.mxu0 %v6456_v17 }
 0x127   :  { %2419 = vst [vmem:[#allocation2 + $0x1d8] sm:$0xff] %v1680_v2  ;;  %v1684_v6 = vadd.f32 %v1683_v4, %v6370_v10  ;;  %v852_v9 = vpop.f32.mrf.mxu0  ;;  %1975 = vmatprep.mubr.f32.mxu1 %v6456_v17  ;;  %v224_v2 = vld [vmem:[%s8516_s0 + $0x208] sm:$0xff] }
 0x128   :  { %2420 = vst [vmem:[#allocation2 + $0x1e0] sm:$0xff] %v851_v1  ;;  %v853_v8 = vadd.f32 %v852_v9, %v6372_v16  ;;  %v1685_v7 = vpop.f32.mrf.mxu1 }
 0x129   :  { %2422 = vst [vmem:[#allocation2 + $0x1f0] sm:$0xff] %v1684_v6  ;;  %v1686_v3 = vadd.f32 %v1685_v7, %v6375_v13  ;;  %v856_v15 = vpop.f32.mrf.mxu0  ;;  %4315 = vmatmul.mubr.msk.f32.gmra.mxu0 %vm309_vm0, %v223_v20 }
 0x12a   :  { %2421 = vst [vmem:[#allocation2 + $0x1e8] sm:$0xff] %v853_v8  ;;  %v857_v11 = vadd.f32 %v856_v15, %v6364_v12  ;;  %v1689_v14 = vpop.f32.mrf.mxu1  ;;  %4443 = vmatmul.mubr.msk.f32.gmra.mxu1 %vm309_vm0, %v223_v20  ;;  %1148 = vmatprep.mubr.f32.mxu0 %v6456_v17 }
 0x12b   :  { %2423 = vst [vmem:[#allocation2 + $0x1f8] sm:$0xff] %v1686_v3  ;;  %v1690_v1 = vadd.f32 %v1689_v14, %v6370_v10  ;;  %v858_v4 = vpop.f32.mrf.mxu0  ;;  %1981 = vmatprep.mubr.f32.mxu1 %v6456_v17  ;;  %v225_v3 = vld [vmem:[%s8516_s0 + $0x210] sm:$0xff] }
 0x12c   :  { %2424 = vst [vmem:[#allocation2 + $0x200] sm:$0xff] %v857_v11  ;;  %v859_v6 = vadd.f32 %v858_v4, %v6372_v16  ;;  %v1691_v9 = vpop.f32.mrf.mxu1 }
 0x12d   :  { %2426 = vst [vmem:[#allocation2 + $0x210] sm:$0xff] %v1690_v1  ;;  %v1692_v8 = vadd.f32 %v1691_v9, %v6375_v13  ;;  %v862_v20 = vpop.f32.mrf.mxu0  ;;  %4316 = vmatmul.mubr.msk.f32.gmra.mxu0 %vm309_vm0, %v224_v2 }
 0x12e   :  { %2425 = vst [vmem:[#allocation2 + $0x208] sm:$0xff] %v859_v6  ;;  %v863_v7 = vadd.f32 %v862_v20, %v6364_v12  ;;  %v1695_v15 = vpop.f32.mrf.mxu1  ;;  %4444 = vmatmul.mubr.msk.f32.gmra.mxu1 %vm309_vm0, %v224_v2  ;;  %1154 = vmatprep.mubr.f32.mxu0 %v6456_v17 }
 0x12f   :  { %2427 = vst [vmem:[#allocation2 + $0x218] sm:$0xff] %v1692_v8  ;;  %v1696_v11 = vadd.f32 %v1695_v15, %v6370_v10  ;;  %v864_v14 = vpop.f32.mrf.mxu0  ;;  %1987 = vmatprep.mubr.f32.mxu1 %v6456_v17  ;;  %v226_v8 = vld [vmem:[%s8516_s0 + $0x218] sm:$0xff] }
 0x130   :  { %2428 = vst [vmem:[#allocation2 + $0x220] sm:$0xff] %v863_v7  ;;  %v865_v1 = vadd.f32 %v864_v14, %v6372_v16  ;;  %v1697_v4 = vpop.f32.mrf.mxu1 }
 0x131   :  { %2430 = vst [vmem:[#allocation2 + $0x230] sm:$0xff] %v1696_v11  ;;  %v1698_v6 = vadd.f32 %v1697_v4, %v6375_v13  ;;  %v868_v2 = vpop.f32.mrf.mxu0  ;;  %4317 = vmatmul.mubr.msk.f32.gmra.mxu0 %vm309_vm0, %v225_v3 }
 0x132   :  { %2429 = vst [vmem:[#allocation2 + $0x228] sm:$0xff] %v865_v1  ;;  %v869_v9 = vadd.f32 %v868_v2, %v6364_v12  ;;  %v1701_v20 = vpop.f32.mrf.mxu1  ;;  %4445 = vmatmul.mubr.msk.f32.gmra.mxu1 %vm309_vm0, %v225_v3  ;;  %1160 = vmatprep.mubr.f32.mxu0 %v6456_v17 }
 0x133   :  { %2431 = vst [vmem:[#allocation2 + $0x238] sm:$0xff] %v1698_v6  ;;  %v1702_v7 = vadd.f32 %v1701_v20, %v6370_v10  ;;  %v870_v15 = vpop.f32.mrf.mxu0  ;;  %1993 = vmatprep.mubr.f32.mxu1 %v6456_v17  ;;  %v227_v6 = vld [vmem:[%s8516_s0 + $0x220] sm:$0xff] }
 0x134   :  { %2432 = vst [vmem:[#allocation2 + $0x240] sm:$0xff] %v869_v9  ;;  %v871_v11 = vadd.f32 %v870_v15, %v6372_v16  ;;  %v1703_v14 = vpop.f32.mrf.mxu1 }
 0x135   :  { %2434 = vst [vmem:[#allocation2 + $0x250] sm:$0xff] %v1702_v7  ;;  %v1704_v1 = vadd.f32 %v1703_v14, %v6375_v13  ;;  %v874_v3 = vpop.f32.mrf.mxu0  ;;  %4318 = vmatmul.mubr.msk.f32.gmra.mxu0 %vm309_vm0, %v226_v8 }
 0x136   :  { %2433 = vst [vmem:[#allocation2 + $0x248] sm:$0xff] %v871_v11  ;;  %v875_v4 = vadd.f32 %v874_v3, %v6364_v12  ;;  %v1707_v2 = vpop.f32.mrf.mxu1  ;;  %4446 = vmatmul.mubr.msk.f32.gmra.mxu1 %vm309_vm0, %v226_v8  ;;  %1166 = vmatprep.mubr.f32.mxu0 %v6456_v17 }
 0x137   :  { %2435 = vst [vmem:[#allocation2 + $0x258] sm:$0xff] %v1704_v1  ;;  %v1708_v9 = vadd.f32 %v1707_v2, %v6370_v10  ;;  %v876_v20 = vpop.f32.mrf.mxu0  ;;  %1999 = vmatprep.mubr.f32.mxu1 %v6456_v17  ;;  %v228_v1 = vld [vmem:[%s8516_s0 + $0x228] sm:$0xff] }
 0x138   :  { %2436 = vst [vmem:[#allocation2 + $0x260] sm:$0xff] %v875_v4  ;;  %v877_v7 = vadd.f32 %v876_v20, %v6372_v16  ;;  %v1709_v15 = vpop.f32.mrf.mxu1 }
 0x139   :  { %2438 = vst [vmem:[#allocation2 + $0x270] sm:$0xff] %v1708_v9  ;;  %v1710_v11 = vadd.f32 %v1709_v15, %v6375_v13  ;;  %v880_v8 = vpop.f32.mrf.mxu0  ;;  %4319 = vmatmul.mubr.msk.f32.gmra.mxu0 %vm309_vm0, %v227_v6 }
 0x13a   :  { %2437 = vst [vmem:[#allocation2 + $0x268] sm:$0xff] %v877_v7  ;;  %v881_v14 = vadd.f32 %v880_v8, %v6364_v12  ;;  %v1713_v3 = vpop.f32.mrf.mxu1  ;;  %4447 = vmatmul.mubr.msk.f32.gmra.mxu1 %vm309_vm0, %v227_v6  ;;  %1172 = vmatprep.mubr.f32.mxu0 %v6456_v17 }
 0x13b   :  { %2439 = vst [vmem:[#allocation2 + $0x278] sm:$0xff] %v1710_v11  ;;  %v1714_v4 = vadd.f32 %v1713_v3, %v6370_v10  ;;  %v882_v2 = vpop.f32.mrf.mxu0  ;;  %2005 = vmatprep.mubr.f32.mxu1 %v6456_v17  ;;  %v229_v11 = vld [vmem:[%s8516_s0 + $0x230] sm:$0xff] }
 0x13c   :  { %2440 = vst [vmem:[#allocation2 + $0x280] sm:$0xff] %v881_v14  ;;  %v883_v9 = vadd.f32 %v882_v2, %v6372_v16  ;;  %v1715_v20 = vpop.f32.mrf.mxu1 }
 0x13d   :  { %2442 = vst [vmem:[#allocation2 + $0x290] sm:$0xff] %v1714_v4  ;;  %v1716_v7 = vadd.f32 %v1715_v20, %v6375_v13  ;;  %v886_v6 = vpop.f32.mrf.mxu0  ;;  %4320 = vmatmul.mubr.msk.f32.gmra.mxu0 %vm309_vm0, %v228_v1 }
 0x13e   :  { %2441 = vst [vmem:[#allocation2 + $0x288] sm:$0xff] %v883_v9  ;;  %v887_v15 = vadd.f32 %v886_v6, %v6364_v12  ;;  %v1719_v8 = vpop.f32.mrf.mxu1  ;;  %4448 = vmatmul.mubr.msk.f32.gmra.mxu1 %vm309_vm0, %v228_v1  ;;  %1178 = vmatprep.mubr.f32.mxu0 %v6456_v17 }
 0x13f   :  { %2443 = vst [vmem:[#allocation2 + $0x298] sm:$0xff] %v1716_v7  ;;  %v1720_v14 = vadd.f32 %v1719_v8, %v6370_v10  ;;  %v888_v3 = vpop.f32.mrf.mxu0  ;;  %2011 = vmatprep.mubr.f32.mxu1 %v6456_v17  ;;  %v230_v7 = vld [vmem:[%s8516_s0 + $0x238] sm:$0xff] }
 0x140   :  { %2444 = vst [vmem:[#allocation2 + $0x2a0] sm:$0xff] %v887_v15  ;;  %v889_v4 = vadd.f32 %v888_v3, %v6372_v16  ;;  %v1721_v2 = vpop.f32.mrf.mxu1 }
 0x141   :  { %2446 = vst [vmem:[#allocation2 + $0x2b0] sm:$0xff] %v1720_v14  ;;  %v1722_v9 = vadd.f32 %v1721_v2, %v6375_v13  ;;  %v892_v1 = vpop.f32.mrf.mxu0  ;;  %4321 = vmatmul.mubr.msk.f32.gmra.mxu0 %vm309_vm0, %v229_v11 }
 0x142   :  { %2445 = vst [vmem:[#allocation2 + $0x2a8] sm:$0xff] %v889_v4  ;;  %v893_v20 = vadd.f32 %v892_v1, %v6364_v12  ;;  %v1725_v6 = vpop.f32.mrf.mxu1  ;;  %4449 = vmatmul.mubr.msk.f32.gmra.mxu1 %vm309_vm0, %v229_v11  ;;  %1184 = vmatprep.mubr.f32.mxu0 %v6456_v17 }
 0x143   :  { %2447 = vst [vmem:[#allocation2 + $0x2b8] sm:$0xff] %v1722_v9  ;;  %v1726_v15 = vadd.f32 %v1725_v6, %v6370_v10  ;;  %v894_v8 = vpop.f32.mrf.mxu0  ;;  %2017 = vmatprep.mubr.f32.mxu1 %v6456_v17  ;;  %v231_v9 = vld [vmem:[%s8516_s0 + $0x240] sm:$0xff] }
 0x144   :  { %2448 = vst [vmem:[#allocation2 + $0x2c0] sm:$0xff] %v893_v20  ;;  %v895_v14 = vadd.f32 %v894_v8, %v6372_v16  ;;  %v1727_v3 = vpop.f32.mrf.mxu1 }
 0x145   :  { %2450 = vst [vmem:[#allocation2 + $0x2d0] sm:$0xff] %v1726_v15  ;;  %v1728_v4 = vadd.f32 %v1727_v3, %v6375_v13  ;;  %v898_v11 = vpop.f32.mrf.mxu0  ;;  %4322 = vmatmul.mubr.msk.f32.gmra.mxu0 %vm309_vm0, %v230_v7 }
 0x146   :  { %2449 = vst [vmem:[#allocation2 + $0x2c8] sm:$0xff] %v895_v14  ;;  %v899_v2 = vadd.f32 %v898_v11, %v6364_v12  ;;  %v1731_v1 = vpop.f32.mrf.mxu1  ;;  %4450 = vmatmul.mubr.msk.f32.gmra.mxu1 %vm309_vm0, %v230_v7  ;;  %1190 = vmatprep.mubr.f32.mxu0 %v6456_v17 }
 0x147   :  { %2451 = vst [vmem:[#allocation2 + $0x2d8] sm:$0xff] %v1728_v4  ;;  %v1732_v20 = vadd.f32 %v1731_v1, %v6370_v10  ;;  %v900_v6 = vpop.f32.mrf.mxu0  ;;  %2023 = vmatprep.mubr.f32.mxu1 %v6456_v17  ;;  %v232_v4 = vld [vmem:[%s8516_s0 + $0x248] sm:$0xff] }
 0x148   :  { %2452 = vst [vmem:[#allocation2 + $0x2e0] sm:$0xff] %v899_v2  ;;  %v901_v15 = vadd.f32 %v900_v6, %v6372_v16  ;;  %v1733_v8 = vpop.f32.mrf.mxu1 }
 0x149   :  { %2454 = vst [vmem:[#allocation2 + $0x2f0] sm:$0xff] %v1732_v20  ;;  %v1734_v14 = vadd.f32 %v1733_v8, %v6375_v13  ;;  %v904_v7 = vpop.f32.mrf.mxu0  ;;  %4323 = vmatmul.mubr.msk.f32.gmra.mxu0 %vm309_vm0, %v231_v9 }
 0x14a   :  { %2453 = vst [vmem:[#allocation2 + $0x2e8] sm:$0xff] %v901_v15  ;;  %v905_v3 = vadd.f32 %v904_v7, %v6364_v12  ;;  %v1737_v11 = vpop.f32.mrf.mxu1  ;;  %4451 = vmatmul.mubr.msk.f32.gmra.mxu1 %vm309_vm0, %v231_v9  ;;  %1196 = vmatprep.mubr.f32.mxu0 %v6456_v17 }
 0x14b   :  { %2455 = vst [vmem:[#allocation2 + $0x2f8] sm:$0xff] %v1734_v14  ;;  %v1738_v2 = vadd.f32 %v1737_v11, %v6370_v10  ;;  %v906_v1 = vpop.f32.mrf.mxu0  ;;  %2029 = vmatprep.mubr.f32.mxu1 %v6456_v17  ;;  %v233_v14 = vld [vmem:[%s8516_s0 + $0x250] sm:$0xff] }
 0x14c   :  { %2456 = vst [vmem:[#allocation2 + $0x300] sm:$0xff] %v905_v3  ;;  %v907_v20 = vadd.f32 %v906_v1, %v6372_v16  ;;  %v1739_v6 = vpop.f32.mrf.mxu1 }
 0x14d   :  { %2458 = vst [vmem:[#allocation2 + $0x310] sm:$0xff] %v1738_v2  ;;  %v1740_v15 = vadd.f32 %v1739_v6, %v6375_v13  ;;  %v910_v9 = vpop.f32.mrf.mxu0  ;;  %4324 = vmatmul.mubr.msk.f32.gmra.mxu0 %vm309_vm0, %v232_v4 }
 0x14e   :  { %2457 = vst [vmem:[#allocation2 + $0x308] sm:$0xff] %v907_v20  ;;  %v911_v8 = vadd.f32 %v910_v9, %v6364_v12  ;;  %v1743_v7 = vpop.f32.mrf.mxu1  ;;  %4452 = vmatmul.mubr.msk.f32.gmra.mxu1 %vm309_vm0, %v232_v4  ;;  %1202 = vmatprep.mubr.f32.mxu0 %v6456_v17 }
 0x14f   :  { %2459 = vst [vmem:[#allocation2 + $0x318] sm:$0xff] %v1740_v15  ;;  %v1744_v3 = vadd.f32 %v1743_v7, %v6370_v10  ;;  %v912_v11 = vpop.f32.mrf.mxu0  ;;  %2035 = vmatprep.mubr.f32.mxu1 %v6456_v17  ;;  %v234_v15 = vld [vmem:[%s8516_s0 + $0x258] sm:$0xff] }
 0x150   :  { %2460 = vst [vmem:[#allocation2 + $0x320] sm:$0xff] %v911_v8  ;;  %v913_v2 = vadd.f32 %v912_v11, %v6372_v16  ;;  %v1745_v1 = vpop.f32.mrf.mxu1 }
 0x151   :  { %2462 = vst [vmem:[#allocation2 + $0x330] sm:$0xff] %v1744_v3  ;;  %v1746_v20 = vadd.f32 %v1745_v1, %v6375_v13  ;;  %v916_v4 = vpop.f32.mrf.mxu0  ;;  %4325 = vmatmul.mubr.msk.f32.gmra.mxu0 %vm309_vm0, %v233_v14 }
 0x152   :  { %2461 = vst [vmem:[#allocation2 + $0x328] sm:$0xff] %v913_v2  ;;  %v917_v6 = vadd.f32 %v916_v4, %v6364_v12  ;;  %v1749_v9 = vpop.f32.mrf.mxu1  ;;  %4453 = vmatmul.mubr.msk.f32.gmra.mxu1 %vm309_vm0, %v233_v14  ;;  %1208 = vmatprep.mubr.f32.mxu0 %v6456_v17 }
 0x153   :  { %2463 = vst [vmem:[#allocation2 + $0x338] sm:$0xff] %v1746_v20  ;;  %v1750_v8 = vadd.f32 %v1749_v9, %v6370_v10  ;;  %v918_v7 = vpop.f32.mrf.mxu0  ;;  %2041 = vmatprep.mubr.f32.mxu1 %v6456_v17  ;;  %v235_v20 = vld [vmem:[%s8516_s0 + $0x260] sm:$0xff] }
 0x154   :  { %2464 = vst [vmem:[#allocation2 + $0x340] sm:$0xff] %v917_v6  ;;  %v919_v3 = vadd.f32 %v918_v7, %v6372_v16  ;;  %v1751_v11 = vpop.f32.mrf.mxu1 }
 0x155   :  { %2466 = vst [vmem:[#allocation2 + $0x350] sm:$0xff] %v1750_v8  ;;  %v1752_v2 = vadd.f32 %v1751_v11, %v6375_v13  ;;  %v922_v14 = vpop.f32.mrf.mxu0  ;;  %4326 = vmatmul.mubr.msk.f32.gmra.mxu0 %vm309_vm0, %v234_v15 }
 0x156   :  { %2465 = vst [vmem:[#allocation2 + $0x348] sm:$0xff] %v919_v3  ;;  %v923_v1 = vadd.f32 %v922_v14, %v6364_v12  ;;  %v1755_v4 = vpop.f32.mrf.mxu1  ;;  %4454 = vmatmul.mubr.msk.f32.gmra.mxu1 %vm309_vm0, %v234_v15  ;;  %1214 = vmatprep.mubr.f32.mxu0 %v6456_v17 }
 0x157   :  { %2467 = vst [vmem:[#allocation2 + $0x358] sm:$0xff] %v1752_v2  ;;  %v1756_v6 = vadd.f32 %v1755_v4, %v6370_v10  ;;  %v924_v9 = vpop.f32.mrf.mxu0  ;;  %2047 = vmatprep.mubr.f32.mxu1 %v6456_v17  ;;  %v236_v2 = vld [vmem:[%s8516_s0 + $0x268] sm:$0xff] }
 0x158   :  { %2468 = vst [vmem:[#allocation2 + $0x360] sm:$0xff] %v923_v1  ;;  %v925_v8 = vadd.f32 %v924_v9, %v6372_v16  ;;  %v1757_v7 = vpop.f32.mrf.mxu1 }
 0x159   :  { %2470 = vst [vmem:[#allocation2 + $0x370] sm:$0xff] %v1756_v6  ;;  %v1758_v3 = vadd.f32 %v1757_v7, %v6375_v13  ;;  %v928_v15 = vpop.f32.mrf.mxu0  ;;  %4327 = vmatmul.mubr.msk.f32.gmra.mxu0 %vm309_vm0, %v235_v20 }
 0x15a   :  { %2469 = vst [vmem:[#allocation2 + $0x368] sm:$0xff] %v925_v8  ;;  %v929_v11 = vadd.f32 %v928_v15, %v6364_v12  ;;  %v1761_v14 = vpop.f32.mrf.mxu1  ;;  %4455 = vmatmul.mubr.msk.f32.gmra.mxu1 %vm309_vm0, %v235_v20  ;;  %1220 = vmatprep.mubr.f32.mxu0 %v6456_v17 }
 0x15b   :  { %2471 = vst [vmem:[#allocation2 + $0x378] sm:$0xff] %v1758_v3  ;;  %v1762_v1 = vadd.f32 %v1761_v14, %v6370_v10  ;;  %v930_v4 = vpop.f32.mrf.mxu0  ;;  %2053 = vmatprep.mubr.f32.mxu1 %v6456_v17  ;;  %v237_v3 = vld [vmem:[%s8516_s0 + $0x270] sm:$0xff] }
 0x15c   :  { %2472 = vst [vmem:[#allocation2 + $0x380] sm:$0xff] %v929_v11  ;;  %v931_v6 = vadd.f32 %v930_v4, %v6372_v16  ;;  %v1763_v9 = vpop.f32.mrf.mxu1 }
 0x15d   :  { %2474 = vst [vmem:[#allocation2 + $0x390] sm:$0xff] %v1762_v1  ;;  %v1764_v8 = vadd.f32 %v1763_v9, %v6375_v13  ;;  %v934_v20 = vpop.f32.mrf.mxu0  ;;  %4328 = vmatmul.mubr.msk.f32.gmra.mxu0 %vm309_vm0, %v236_v2 }
 0x15e   :  { %2473 = vst [vmem:[#allocation2 + $0x388] sm:$0xff] %v931_v6  ;;  %v935_v7 = vadd.f32 %v934_v20, %v6364_v12  ;;  %v1767_v15 = vpop.f32.mrf.mxu1  ;;  %4456 = vmatmul.mubr.msk.f32.gmra.mxu1 %vm309_vm0, %v236_v2  ;;  %1226 = vmatprep.mubr.f32.mxu0 %v6456_v17 }
 0x15f   :  { %2475 = vst [vmem:[#allocation2 + $0x398] sm:$0xff] %v1764_v8  ;;  %v1768_v11 = vadd.f32 %v1767_v15, %v6370_v10  ;;  %v936_v14 = vpop.f32.mrf.mxu0  ;;  %2059 = vmatprep.mubr.f32.mxu1 %v6456_v17  ;;  %v238_v8 = vld [vmem:[%s8516_s0 + $0x278] sm:$0xff] }
 0x160   :  { %2476 = vst [vmem:[#allocation2 + $0x3a0] sm:$0xff] %v935_v7  ;;  %v937_v1 = vadd.f32 %v936_v14, %v6372_v16  ;;  %v1769_v4 = vpop.f32.mrf.mxu1 }
 0x161   :  { %2478 = vst [vmem:[#allocation2 + $0x3b0] sm:$0xff] %v1768_v11  ;;  %v1770_v6 = vadd.f32 %v1769_v4, %v6375_v13  ;;  %v940_v2 = vpop.f32.mrf.mxu0  ;;  %4329 = vmatmul.mubr.msk.f32.gmra.mxu0 %vm309_vm0, %v237_v3 }
 0x162   :  { %2477 = vst [vmem:[#allocation2 + $0x3a8] sm:$0xff] %v937_v1  ;;  %v941_v9 = vadd.f32 %v940_v2, %v6364_v12  ;;  %v1773_v20 = vpop.f32.mrf.mxu1  ;;  %4457 = vmatmul.mubr.msk.f32.gmra.mxu1 %vm309_vm0, %v237_v3  ;;  %1232 = vmatprep.mubr.f32.mxu0 %v6456_v17 }
 0x163   :  { %2479 = vst [vmem:[#allocation2 + $0x3b8] sm:$0xff] %v1770_v6  ;;  %v1774_v7 = vadd.f32 %v1773_v20, %v6370_v10  ;;  %v942_v15 = vpop.f32.mrf.mxu0  ;;  %2065 = vmatprep.mubr.f32.mxu1 %v6456_v17  ;;  %v239_v6 = vld [vmem:[%s8516_s0 + $0x280] sm:$0xff] }
 0x164   :  { %2480 = vst [vmem:[#allocation2 + $0x3c0] sm:$0xff] %v941_v9  ;;  %v943_v11 = vadd.f32 %v942_v15, %v6372_v16  ;;  %v1775_v14 = vpop.f32.mrf.mxu1 }
 0x165   :  { %2482 = vst [vmem:[#allocation2 + $0x3d0] sm:$0xff] %v1774_v7  ;;  %v1776_v1 = vadd.f32 %v1775_v14, %v6375_v13  ;;  %v946_v3 = vpop.f32.mrf.mxu0  ;;  %4330 = vmatmul.mubr.msk.f32.gmra.mxu0 %vm309_vm0, %v238_v8 }
 0x166   :  { %2481 = vst [vmem:[#allocation2 + $0x3c8] sm:$0xff] %v943_v11  ;;  %v947_v4 = vadd.f32 %v946_v3, %v6364_v12  ;;  %v1779_v2 = vpop.f32.mrf.mxu1  ;;  %4458 = vmatmul.mubr.msk.f32.gmra.mxu1 %vm309_vm0, %v238_v8  ;;  %1238 = vmatprep.mubr.f32.mxu0 %v6456_v17 }
 0x167   :  { %2483 = vst [vmem:[#allocation2 + $0x3d8] sm:$0xff] %v1776_v1  ;;  %v1780_v9 = vadd.f32 %v1779_v2, %v6370_v10  ;;  %v948_v20 = vpop.f32.mrf.mxu0  ;;  %2071 = vmatprep.mubr.f32.mxu1 %v6456_v17  ;;  %v240_v1 = vld [vmem:[%s8516_s0 + $0x288] sm:$0xff] }
 0x168   :  { %2484 = vst [vmem:[#allocation2 + $0x3e0] sm:$0xff] %v947_v4  ;;  %v949_v7 = vadd.f32 %v948_v20, %v6372_v16  ;;  %v1781_v15 = vpop.f32.mrf.mxu1 }
 0x169   :  { %2486 = vst [vmem:[#allocation2 + $0x3f0] sm:$0xff] %v1780_v9  ;;  %v1782_v11 = vadd.f32 %v1781_v15, %v6375_v13  ;;  %v952_v8 = vpop.f32.mrf.mxu0  ;;  %4331 = vmatmul.mubr.msk.f32.gmra.mxu0 %vm309_vm0, %v239_v6 }
 0x16a   :  { %2485 = vst [vmem:[#allocation2 + $0x3e8] sm:$0xff] %v949_v7  ;;  %v953_v14 = vadd.f32 %v952_v8, %v6364_v12  ;;  %v1785_v3 = vpop.f32.mrf.mxu1  ;;  %4459 = vmatmul.mubr.msk.f32.gmra.mxu1 %vm309_vm0, %v239_v6  ;;  %1244 = vmatprep.mubr.f32.mxu0 %v6456_v17 }
 0x16b   :  { %2487 = vst [vmem:[#allocation2 + $0x3f8] sm:$0xff] %v1782_v11  ;;  %v1786_v4 = vadd.f32 %v1785_v3, %v6370_v10  ;;  %v954_v2 = vpop.f32.mrf.mxu0  ;;  %2077 = vmatprep.mubr.f32.mxu1 %v6456_v17  ;;  %v241_v11 = vld [vmem:[%s8516_s0 + $0x290] sm:$0xff] }
 0x16c   :  { %2488 = vst [vmem:[#allocation2 + $0x400] sm:$0xff] %v953_v14  ;;  %v955_v9 = vadd.f32 %v954_v2, %v6372_v16  ;;  %v1787_v20 = vpop.f32.mrf.mxu1 }
 0x16d   :  { %2490 = vst [vmem:[#allocation2 + $0x410] sm:$0xff] %v1786_v4  ;;  %v1788_v7 = vadd.f32 %v1787_v20, %v6375_v13  ;;  %v958_v6 = vpop.f32.mrf.mxu0  ;;  %4332 = vmatmul.mubr.msk.f32.gmra.mxu0 %vm309_vm0, %v240_v1 }
 0x16e   :  { %2489 = vst [vmem:[#allocation2 + $0x408] sm:$0xff] %v955_v9  ;;  %v959_v15 = vadd.f32 %v958_v6, %v6364_v12  ;;  %v1791_v8 = vpop.f32.mrf.mxu1  ;;  %4460 = vmatmul.mubr.msk.f32.gmra.mxu1 %vm309_vm0, %v240_v1  ;;  %1250 = vmatprep.mubr.f32.mxu0 %v6456_v17 }
 0x16f   :  { %2491 = vst [vmem:[#allocation2 + $0x418] sm:$0xff] %v1788_v7  ;;  %v1792_v14 = vadd.f32 %v1791_v8, %v6370_v10  ;;  %v960_v3 = vpop.f32.mrf.mxu0  ;;  %2083 = vmatprep.mubr.f32.mxu1 %v6456_v17  ;;  %v242_v7 = vld [vmem:[%s8516_s0 + $0x298] sm:$0xff] }
 0x170   :  { %2492 = vst [vmem:[#allocation2 + $0x420] sm:$0xff] %v959_v15  ;;  %v961_v4 = vadd.f32 %v960_v3, %v6372_v16  ;;  %v1793_v2 = vpop.f32.mrf.mxu1 }
 0x171   :  { %2494 = vst [vmem:[#allocation2 + $0x430] sm:$0xff] %v1792_v14  ;;  %v1794_v9 = vadd.f32 %v1793_v2, %v6375_v13  ;;  %v964_v1 = vpop.f32.mrf.mxu0  ;;  %4333 = vmatmul.mubr.msk.f32.gmra.mxu0 %vm309_vm0, %v241_v11 }
 0x172   :  { %2493 = vst [vmem:[#allocation2 + $0x428] sm:$0xff] %v961_v4  ;;  %v965_v20 = vadd.f32 %v964_v1, %v6364_v12  ;;  %v1797_v6 = vpop.f32.mrf.mxu1  ;;  %4461 = vmatmul.mubr.msk.f32.gmra.mxu1 %vm309_vm0, %v241_v11  ;;  %1256 = vmatprep.mubr.f32.mxu0 %v6456_v17 }
 0x173   :  { %2495 = vst [vmem:[#allocation2 + $0x438] sm:$0xff] %v1794_v9  ;;  %v1798_v15 = vadd.f32 %v1797_v6, %v6370_v10  ;;  %v966_v8 = vpop.f32.mrf.mxu0  ;;  %2089 = vmatprep.mubr.f32.mxu1 %v6456_v17  ;;  %v243_v9 = vld [vmem:[%s8516_s0 + $0x2a0] sm:$0xff] }
 0x174   :  { %2496 = vst [vmem:[#allocation2 + $0x440] sm:$0xff] %v965_v20  ;;  %v967_v14 = vadd.f32 %v966_v8, %v6372_v16  ;;  %v1799_v3 = vpop.f32.mrf.mxu1 }
 0x175   :  { %2498 = vst [vmem:[#allocation2 + $0x450] sm:$0xff] %v1798_v15  ;;  %v1800_v4 = vadd.f32 %v1799_v3, %v6375_v13  ;;  %v970_v11 = vpop.f32.mrf.mxu0  ;;  %4334 = vmatmul.mubr.msk.f32.gmra.mxu0 %vm309_vm0, %v242_v7 }
 0x176   :  { %2497 = vst [vmem:[#allocation2 + $0x448] sm:$0xff] %v967_v14  ;;  %v971_v2 = vadd.f32 %v970_v11, %v6364_v12  ;;  %v1803_v1 = vpop.f32.mrf.mxu1  ;;  %4462 = vmatmul.mubr.msk.f32.gmra.mxu1 %vm309_vm0, %v242_v7  ;;  %1262 = vmatprep.mubr.f32.mxu0 %v6456_v17 }
 0x177   :  { %2499 = vst [vmem:[#allocation2 + $0x458] sm:$0xff] %v1800_v4  ;;  %v1804_v20 = vadd.f32 %v1803_v1, %v6370_v10  ;;  %v972_v6 = vpop.f32.mrf.mxu0  ;;  %2095 = vmatprep.mubr.f32.mxu1 %v6456_v17  ;;  %v244_v4 = vld [vmem:[%s8516_s0 + $0x2a8] sm:$0xff] }
 0x178   :  { %2500 = vst [vmem:[#allocation2 + $0x460] sm:$0xff] %v971_v2  ;;  %v973_v15 = vadd.f32 %v972_v6, %v6372_v16  ;;  %v1805_v8 = vpop.f32.mrf.mxu1 }
 0x179   :  { %2502 = vst [vmem:[#allocation2 + $0x470] sm:$0xff] %v1804_v20  ;;  %v1806_v14 = vadd.f32 %v1805_v8, %v6375_v13  ;;  %v976_v7 = vpop.f32.mrf.mxu0  ;;  %4335 = vmatmul.mubr.msk.f32.gmra.mxu0 %vm309_vm0, %v243_v9 }
 0x17a   :  { %2501 = vst [vmem:[#allocation2 + $0x468] sm:$0xff] %v973_v15  ;;  %v977_v3 = vadd.f32 %v976_v7, %v6364_v12  ;;  %v1809_v11 = vpop.f32.mrf.mxu1  ;;  %4463 = vmatmul.mubr.msk.f32.gmra.mxu1 %vm309_vm0, %v243_v9  ;;  %1268 = vmatprep.mubr.f32.mxu0 %v6456_v17 }
 0x17b   :  { %2503 = vst [vmem:[#allocation2 + $0x478] sm:$0xff] %v1806_v14  ;;  %v1810_v2 = vadd.f32 %v1809_v11, %v6370_v10  ;;  %v978_v1 = vpop.f32.mrf.mxu0  ;;  %2101 = vmatprep.mubr.f32.mxu1 %v6456_v17  ;;  %v245_v14 = vld [vmem:[%s8516_s0 + $0x2b0] sm:$0xff] }
 0x17c   :  { %2504 = vst [vmem:[#allocation2 + $0x480] sm:$0xff] %v977_v3  ;;  %v979_v20 = vadd.f32 %v978_v1, %v6372_v16  ;;  %v1811_v6 = vpop.f32.mrf.mxu1 }
 0x17d   :  { %2506 = vst [vmem:[#allocation2 + $0x490] sm:$0xff] %v1810_v2  ;;  %v1812_v15 = vadd.f32 %v1811_v6, %v6375_v13  ;;  %v982_v9 = vpop.f32.mrf.mxu0  ;;  %4336 = vmatmul.mubr.msk.f32.gmra.mxu0 %vm309_vm0, %v244_v4  ;;  %v6793_v2 = vld [vmem:[#allocation3 + $0x30] sm:$0xff] }
 0x17e   :  { %2505 = vst [vmem:[#allocation2 + $0x488] sm:$0xff] %v979_v20  ;;  %v983_v8 = vadd.f32 %v982_v9, %v6364_v12  ;;  %v1815_v7 = vpop.f32.mrf.mxu1  ;;  %4464 = vmatmul.mubr.msk.f32.gmra.mxu1 %vm309_vm0, %v244_v4  ;;  %1274 = vmatprep.mubr.f32.mxu0 %v6456_v17  ;;  %v246_v9 = vld [vmem:[%s8516_s0 + $0x2b8] sm:$0xff] }
 0x17f   :  { %2507 = vst [vmem:[#allocation2 + $0x498] sm:$0xff] %v1812_v15  ;;  %v1816_v3 = vadd.f32 %v1815_v7, %v6370_v10  ;;  %v984_v11 = vpop.f32.mrf.mxu0  ;;  %2107 = vmatprep.mubr.f32.mxu1 %v6793_v2 }
 0x180   :  { %2508 = vst [vmem:[#allocation2 + $0x4a0] sm:$0xff] %v983_v8  ;;  %v985_v1 = vadd.f32 %v984_v11, %v6372_v16  ;;  %v1817_v20 = vpop.f32.mrf.mxu1 }
 0x181   :  { %2510 = vst [vmem:[#allocation2 + $0x4b0] sm:$0xff] %v1816_v3  ;;  %v1818_v4 = vadd.f32 %v1817_v20, %v6375_v13  ;;  %v988_v17 = vpop.f32.mrf.mxu0  ;;  %4337 = vmatmul.mubr.msk.f32.gmra.mxu0 %vm309_vm0, %v245_v14 }
 0x182   :  { %2509 = vst [vmem:[#allocation2 + $0x4a8] sm:$0xff] %v985_v1  ;;  %v989_v6 = vadd.f32 %v988_v17, %v6364_v12  ;;  %v1821_v15 = vpop.f32.mrf.mxu1  ;;  %4465 = vmatmul.mubr.msk.f32.gmra.mxu1 %vm309_vm0, %v245_v14  ;;  %1280 = vmatprep.mubr.f32.mxu0 %v6793_v2 }
 0x183   :  { %2511 = vst [vmem:[#allocation2 + $0x4b8] sm:$0xff] %v1818_v4  ;;  %v1822_v8 = vadd.f32 %v1821_v15, %v6370_v10  ;;  %v990_v7 = vpop.f32.mrf.mxu0  ;;  %2113 = vmatprep.mubr.f32.mxu1 %v6793_v2  ;;  %v247_v4 = vld [vmem:[%s8516_s0 + $0x2c0] sm:$0xff] }
 0x184   :  { %2512 = vst [vmem:[#allocation2 + $0x4c0] sm:$0xff] %v989_v6  ;;  %v991_v3 = vadd.f32 %v990_v7, %v6372_v16  ;;  %v1823_v11 = vpop.f32.mrf.mxu1 }
 0x185   :  { %2514 = vst [vmem:[#allocation2 + $0x4d0] sm:$0xff] %v1822_v8  ;;  %v1824_v1 = vadd.f32 %v1823_v11, %v6375_v13  ;;  %v994_v14 = vpop.f32.mrf.mxu0  ;;  %4338 = vmatmul.mubr.msk.f32.gmra.mxu0 %vm309_vm0, %v246_v9 }
 0x186   :  { %2513 = vst [vmem:[#allocation2 + $0x4c8] sm:$0xff] %v991_v3  ;;  %v995_v20 = vadd.f32 %v994_v14, %v6364_v12  ;;  %v1827_v17 = vpop.f32.mrf.mxu1  ;;  %4466 = vmatmul.mubr.msk.f32.gmra.mxu1 %vm309_vm0, %v246_v9  ;;  %1286 = vmatprep.mubr.f32.mxu0 %v6793_v2 }
 0x187   :  { %2515 = vst [vmem:[#allocation2 + $0x4d8] sm:$0xff] %v1824_v1  ;;  %v1828_v6 = vadd.f32 %v1827_v17, %v6370_v10  ;;  %v996_v15 = vpop.f32.mrf.mxu0  ;;  %2119 = vmatprep.mubr.f32.mxu1 %v6793_v2  ;;  %v248_v1 = vld [vmem:[%s8516_s0 + $0x2c8] sm:$0xff] }
 0x188   :  { %2516 = vst [vmem:[#allocation2 + $0x4e0] sm:$0xff] %v995_v20  ;;  %v997_v8 = vadd.f32 %v996_v15, %v6372_v16  ;;  %v1829_v7 = vpop.f32.mrf.mxu1 }
 0x189   :  { %2518 = vst [vmem:[#allocation2 + $0x4f0] sm:$0xff] %v1828_v6  ;;  %v1830_v3 = vadd.f32 %v1829_v7, %v6375_v13  ;;  %v1000_v9 = vpop.f32.mrf.mxu0  ;;  %4339 = vmatmul.mubr.msk.f32.gmra.mxu0 %vm309_vm0, %v247_v4 }
 0x18a   :  { %2517 = vst [vmem:[#allocation2 + $0x4e8] sm:$0xff] %v997_v8  ;;  %v1001_v11 = vadd.f32 %v1000_v9, %v6364_v12  ;;  %v1833_v14 = vpop.f32.mrf.mxu1  ;;  %4467 = vmatmul.mubr.msk.f32.gmra.mxu1 %vm309_vm0, %v247_v4  ;;  %1292 = vmatprep.mubr.f32.mxu0 %v6793_v2 }
 0x18b   :  { %2519 = vst [vmem:[#allocation2 + $0x4f8] sm:$0xff] %v1830_v3  ;;  %v1834_v20 = vadd.f32 %v1833_v14, %v6370_v10  ;;  %v1002_v17 = vpop.f32.mrf.mxu0  ;;  %2125 = vmatprep.mubr.f32.mxu1 %v6793_v2  ;;  %v249_v3 = vld [vmem:[%s8516_s0 + $0x2d0] sm:$0xff] }
 0x18c   :  { %2520 = vst [vmem:[#allocation2 + $0x500] sm:$0xff] %v1001_v11  ;;  %v1003_v6 = vadd.f32 %v1002_v17, %v6372_v16  ;;  %v1835_v15 = vpop.f32.mrf.mxu1 }
 0x18d   :  { %2522 = vst [vmem:[#allocation2 + $0x510] sm:$0xff] %v1834_v20  ;;  %v1836_v8 = vadd.f32 %v1835_v15, %v6375_v13  ;;  %v1006_v4 = vpop.f32.mrf.mxu0  ;;  %4340 = vmatmul.mubr.msk.f32.gmra.mxu0 %vm309_vm0, %v248_v1 }
 0x18e   :  { %2521 = vst [vmem:[#allocation2 + $0x508] sm:$0xff] %v1003_v6  ;;  %v1007_v7 = vadd.f32 %v1006_v4, %v6364_v12  ;;  %v1839_v9 = vpop.f32.mrf.mxu1  ;;  %4468 = vmatmul.mubr.msk.f32.gmra.mxu1 %vm309_vm0, %v248_v1  ;;  %1298 = vmatprep.mubr.f32.mxu0 %v6793_v2 }
 0x18f   :  { %2523 = vst [vmem:[#allocation2 + $0x518] sm:$0xff] %v1836_v8  ;;  %v1840_v11 = vadd.f32 %v1839_v9, %v6370_v10  ;;  %v1008_v14 = vpop.f32.mrf.mxu0  ;;  %2131 = vmatprep.mubr.f32.mxu1 %v6793_v2  ;;  %v250_v8 = vld [vmem:[%s8516_s0 + $0x2d8] sm:$0xff] }
 0x190   :  { %2524 = vst [vmem:[#allocation2 + $0x520] sm:$0xff] %v1007_v7  ;;  %v1009_v20 = vadd.f32 %v1008_v14, %v6372_v16  ;;  %v1841_v17 = vpop.f32.mrf.mxu1 }
 0x191   :  { %2526 = vst [vmem:[#allocation2 + $0x530] sm:$0xff] %v1840_v11  ;;  %v1842_v6 = vadd.f32 %v1841_v17, %v6375_v13  ;;  %v1012_v1 = vpop.f32.mrf.mxu0  ;;  %4341 = vmatmul.mubr.msk.f32.gmra.mxu0 %vm309_vm0, %v249_v3 }
 0x192   :  { %2525 = vst [vmem:[#allocation2 + $0x528] sm:$0xff] %v1009_v20  ;;  %v1013_v15 = vadd.f32 %v1012_v1, %v6364_v12  ;;  %v1845_v4 = vpop.f32.mrf.mxu1  ;;  %4469 = vmatmul.mubr.msk.f32.gmra.mxu1 %vm309_vm0, %v249_v3  ;;  %1304 = vmatprep.mubr.f32.mxu0 %v6793_v2 }
 0x193   :  { %2527 = vst [vmem:[#allocation2 + $0x538] sm:$0xff] %v1842_v6  ;;  %v1846_v7 = vadd.f32 %v1845_v4, %v6370_v10  ;;  %v1014_v9 = vpop.f32.mrf.mxu0  ;;  %2137 = vmatprep.mubr.f32.mxu1 %v6793_v2  ;;  %v251_v6 = vld [vmem:[%s8516_s0 + $0x2e0] sm:$0xff] }
 0x194   :  { %2528 = vst [vmem:[#allocation2 + $0x540] sm:$0xff] %v1013_v15  ;;  %v1015_v11 = vadd.f32 %v1014_v9, %v6372_v16  ;;  %v1847_v14 = vpop.f32.mrf.mxu1 }
 0x195   :  { %2530 = vst [vmem:[#allocation2 + $0x550] sm:$0xff] %v1846_v7  ;;  %v1848_v20 = vadd.f32 %v1847_v14, %v6375_v13  ;;  %v1018_v3 = vpop.f32.mrf.mxu0  ;;  %4342 = vmatmul.mubr.msk.f32.gmra.mxu0 %vm309_vm0, %v250_v8 }
 0x196   :  { %2529 = vst [vmem:[#allocation2 + $0x548] sm:$0xff] %v1015_v11  ;;  %v1019_v17 = vadd.f32 %v1018_v3, %v6364_v12  ;;  %v1851_v1 = vpop.f32.mrf.mxu1  ;;  %4470 = vmatmul.mubr.msk.f32.gmra.mxu1 %vm309_vm0, %v250_v8  ;;  %1310 = vmatprep.mubr.f32.mxu0 %v6793_v2 }
 0x197   :  { %2531 = vst [vmem:[#allocation2 + $0x558] sm:$0xff] %v1848_v20  ;;  %v1852_v15 = vadd.f32 %v1851_v1, %v6370_v10  ;;  %v1020_v4 = vpop.f32.mrf.mxu0  ;;  %2143 = vmatprep.mubr.f32.mxu1 %v6793_v2  ;;  %v252_v20 = vld [vmem:[%s8516_s0 + $0x2e8] sm:$0xff] }
 0x198   :  { %2532 = vst [vmem:[#allocation2 + $0x560] sm:$0xff] %v1019_v17  ;;  %v1021_v7 = vadd.f32 %v1020_v4, %v6372_v16  ;;  %v1853_v9 = vpop.f32.mrf.mxu1 }
 0x199   :  { %2534 = vst [vmem:[#allocation2 + $0x570] sm:$0xff] %v1852_v15  ;;  %v1854_v11 = vadd.f32 %v1853_v9, %v6375_v13  ;;  %v1024_v8 = vpop.f32.mrf.mxu0  ;;  %4343 = vmatmul.mubr.msk.f32.gmra.mxu0 %vm309_vm0, %v251_v6 }
 0x19a   :  { %2533 = vst [vmem:[#allocation2 + $0x568] sm:$0xff] %v1021_v7  ;;  %v1025_v14 = vadd.f32 %v1024_v8, %v6364_v12  ;;  %v1857_v3 = vpop.f32.mrf.mxu1  ;;  %4471 = vmatmul.mubr.msk.f32.gmra.mxu1 %vm309_vm0, %v251_v6  ;;  %1316 = vmatprep.mubr.f32.mxu0 %v6793_v2 }
 0x19b   :  { %2535 = vst [vmem:[#allocation2 + $0x578] sm:$0xff] %v1854_v11  ;;  %v1858_v17 = vadd.f32 %v1857_v3, %v6370_v10  ;;  %v1026_v1 = vpop.f32.mrf.mxu0  ;;  %2149 = vmatprep.mubr.f32.mxu1 %v6793_v2  ;;  %v253_v11 = vld [vmem:[%s8516_s0 + $0x2f0] sm:$0xff] }
 0x19c   :  { %2536 = vst [vmem:[#allocation2 + $0x580] sm:$0xff] %v1025_v14  ;;  %v1027_v15 = vadd.f32 %v1026_v1, %v6372_v16  ;;  %v1859_v4 = vpop.f32.mrf.mxu1 }
 0x19d   :  { %2538 = vst [vmem:[#allocation2 + $0x590] sm:$0xff] %v1858_v17  ;;  %v1860_v7 = vadd.f32 %v1859_v4, %v6375_v13  ;;  %v1030_v6 = vpop.f32.mrf.mxu0  ;;  %4344 = vmatmul.mubr.msk.f32.gmra.mxu0 %vm309_vm0, %v252_v20 }
 0x19e   :  { %2537 = vst [vmem:[#allocation2 + $0x588] sm:$0xff] %v1027_v15  ;;  %v1031_v9 = vadd.f32 %v1030_v6, %v6364_v12  ;;  %v1863_v8 = vpop.f32.mrf.mxu1  ;;  %4472 = vmatmul.mubr.msk.f32.gmra.mxu1 %vm309_vm0, %v252_v20  ;;  %1322 = vmatprep.mubr.f32.mxu0 %v6793_v2 }
 0x19f   :  { %2539 = vst [vmem:[#allocation2 + $0x598] sm:$0xff] %v1860_v7  ;;  %v1864_v14 = vadd.f32 %v1863_v8, %v6370_v10  ;;  %v1032_v3 = vpop.f32.mrf.mxu0  ;;  %2155 = vmatprep.mubr.f32.mxu1 %v6793_v2  ;;  %v254_v7 = vld [vmem:[%s8516_s0 + $0x2f8] sm:$0xff] }
 0x1a0   :  { %2540 = vst [vmem:[#allocation2 + $0x5a0] sm:$0xff] %v1031_v9  ;;  %v1033_v17 = vadd.f32 %v1032_v3, %v6372_v16  ;;  %v1865_v1 = vpop.f32.mrf.mxu1 }
 0x1a1   :  { %2542 = vst [vmem:[#allocation2 + $0x5b0] sm:$0xff] %v1864_v14  ;;  %v1866_v15 = vadd.f32 %v1865_v1, %v6375_v13  ;;  %v1036_v20 = vpop.f32.mrf.mxu0  ;;  %4345 = vmatmul.mubr.msk.f32.gmra.mxu0 %vm309_vm0, %v253_v11 }
 0x1a2   :  { %2541 = vst [vmem:[#allocation2 + $0x5a8] sm:$0xff] %v1033_v17  ;;  %v1037_v4 = vadd.f32 %v1036_v20, %v6364_v12  ;;  %v1869_v6 = vpop.f32.mrf.mxu1  ;;  %4473 = vmatmul.mubr.msk.f32.gmra.mxu1 %vm309_vm0, %v253_v11  ;;  %1328 = vmatprep.mubr.f32.mxu0 %v6793_v2 }
 0x1a3   :  { %2543 = vst [vmem:[#allocation2 + $0x5b8] sm:$0xff] %v1866_v15  ;;  %v1870_v9 = vadd.f32 %v1869_v6, %v6370_v10  ;;  %v1038_v8 = vpop.f32.mrf.mxu0  ;;  %2161 = vmatprep.mubr.f32.mxu1 %v6793_v2  ;;  %v255_v15 = vld [vmem:[%s8516_s0 + $0x300] sm:$0xff] }
 0x1a4   :  { %2544 = vst [vmem:[#allocation2 + $0x5c0] sm:$0xff] %v1037_v4  ;;  %v1039_v14 = vadd.f32 %v1038_v8, %v6372_v16  ;;  %v1871_v3 = vpop.f32.mrf.mxu1 }
 0x1a5   :  { %2546 = vst [vmem:[#allocation2 + $0x5d0] sm:$0xff] %v1870_v9  ;;  %v1872_v17 = vadd.f32 %v1871_v3, %v6375_v13  ;;  %v1042_v11 = vpop.f32.mrf.mxu0  ;;  %4346 = vmatmul.mubr.msk.f32.gmra.mxu0 %vm309_vm0, %v254_v7 }
 0x1a6   :  { %2545 = vst [vmem:[#allocation2 + $0x5c8] sm:$0xff] %v1039_v14  ;;  %v1043_v1 = vadd.f32 %v1042_v11, %v6364_v12  ;;  %v1875_v20 = vpop.f32.mrf.mxu1  ;;  %4474 = vmatmul.mubr.msk.f32.gmra.mxu1 %vm309_vm0, %v254_v7  ;;  %1334 = vmatprep.mubr.f32.mxu0 %v6793_v2 }
 0x1a7   :  { %2547 = vst [vmem:[#allocation2 + $0x5d8] sm:$0xff] %v1872_v17  ;;  %v1876_v4 = vadd.f32 %v1875_v20, %v6370_v10  ;;  %v1044_v6 = vpop.f32.mrf.mxu0  ;;  %2167 = vmatprep.mubr.f32.mxu1 %v6793_v2  ;;  %v256_v17 = vld [vmem:[%s8516_s0 + $0x308] sm:$0xff] }
 0x1a8   :  { %2548 = vst [vmem:[#allocation2 + $0x5e0] sm:$0xff] %v1043_v1  ;;  %v1045_v9 = vadd.f32 %v1044_v6, %v6372_v16  ;;  %v1877_v8 = vpop.f32.mrf.mxu1 }
 0x1a9   :  { %2550 = vst [vmem:[#allocation2 + $0x5f0] sm:$0xff] %v1876_v4  ;;  %v1878_v14 = vadd.f32 %v1877_v8, %v6375_v13  ;;  %v1048_v7 = vpop.f32.mrf.mxu0  ;;  %4347 = vmatmul.mubr.msk.f32.gmra.mxu0 %vm309_vm0, %v255_v15 }
 0x1aa   :  { %2549 = vst [vmem:[#allocation2 + $0x5e8] sm:$0xff] %v1045_v9  ;;  %v1049_v3 = vadd.f32 %v1048_v7, %v6364_v12  ;;  %v1881_v11 = vpop.f32.mrf.mxu1  ;;  %4475 = vmatmul.mubr.msk.f32.gmra.mxu1 %vm309_vm0, %v255_v15  ;;  %1340 = vmatprep.mubr.f32.mxu0 %v6793_v2 }
 0x1ab   :  { %2551 = vst [vmem:[#allocation2 + $0x5f8] sm:$0xff] %v1878_v14  ;;  %v1882_v1 = vadd.f32 %v1881_v11, %v6370_v10  ;;  %v1050_v20 = vpop.f32.mrf.mxu0  ;;  %2173 = vmatprep.mubr.f32.mxu1 %v6793_v2  ;;  %v257_v14 = vld [vmem:[%s8516_s0 + $0x310] sm:$0xff] }
 0x1ac   :  { %2552 = vst [vmem:[#allocation2 + $0x600] sm:$0xff] %v1049_v3  ;;  %v1051_v4 = vadd.f32 %v1050_v20, %v6372_v16  ;;  %v1883_v6 = vpop.f32.mrf.mxu1 }
 0x1ad   :  { %2554 = vst [vmem:[#allocation2 + $0x610] sm:$0xff] %v1882_v1  ;;  %v1884_v9 = vadd.f32 %v1883_v6, %v6375_v13  ;;  %v1054_v15 = vpop.f32.mrf.mxu0  ;;  %4348 = vmatmul.mubr.msk.f32.gmra.mxu0 %vm309_vm0, %v256_v17 }
 0x1ae   :  { %2553 = vst [vmem:[#allocation2 + $0x608] sm:$0xff] %v1051_v4  ;;  %v1055_v8 = vadd.f32 %v1054_v15, %v6364_v12  ;;  %v1887_v7 = vpop.f32.mrf.mxu1  ;;  %4476 = vmatmul.mubr.msk.f32.gmra.mxu1 %vm309_vm0, %v256_v17  ;;  %1346 = vmatprep.mubr.f32.mxu0 %v6793_v2 }
 0x1af   :  { %2555 = vst [vmem:[#allocation2 + $0x618] sm:$0xff] %v1884_v9  ;;  %v1888_v3 = vadd.f32 %v1887_v7, %v6370_v10  ;;  %v1056_v11 = vpop.f32.mrf.mxu0  ;;  %2179 = vmatprep.mubr.f32.mxu1 %v6793_v2  ;;  %v258_v9 = vld [vmem:[%s8516_s0 + $0x318] sm:$0xff] }
 0x1b0   :  { %2556 = vst [vmem:[#allocation2 + $0x620] sm:$0xff] %v1055_v8  ;;  %v1057_v1 = vadd.f32 %v1056_v11, %v6372_v16  ;;  %v1889_v20 = vpop.f32.mrf.mxu1 }
 0x1b1   :  { %2558 = vst [vmem:[#allocation2 + $0x630] sm:$0xff] %v1888_v3  ;;  %v1890_v4 = vadd.f32 %v1889_v20, %v6375_v13  ;;  %v1060_v17 = vpop.f32.mrf.mxu0  ;;  %4349 = vmatmul.mubr.msk.f32.gmra.mxu0 %vm309_vm0, %v257_v14 }
 0x1b2   :  { %2557 = vst [vmem:[#allocation2 + $0x628] sm:$0xff] %v1057_v1  ;;  %v1061_v6 = vadd.f32 %v1060_v17, %v6364_v12  ;;  %v1893_v15 = vpop.f32.mrf.mxu1  ;;  %4477 = vmatmul.mubr.msk.f32.gmra.mxu1 %vm309_vm0, %v257_v14  ;;  %1352 = vmatprep.mubr.f32.mxu0 %v6793_v2 }
 0x1b3   :  { %2559 = vst [vmem:[#allocation2 + $0x638] sm:$0xff] %v1890_v4  ;;  %v1894_v8 = vadd.f32 %v1893_v15, %v6370_v10  ;;  %v1062_v7 = vpop.f32.mrf.mxu0  ;;  %2185 = vmatprep.mubr.f32.mxu1 %v6793_v2  ;;  %v259_v4 = vld [vmem:[%s8516_s0 + $0x320] sm:$0xff] }
 0x1b4   :  { %2560 = vst [vmem:[#allocation2 + $0x640] sm:$0xff] %v1061_v6  ;;  %v1063_v3 = vadd.f32 %v1062_v7, %v6372_v16  ;;  %v1895_v11 = vpop.f32.mrf.mxu1 }
 0x1b5   :  { %2562 = vst [vmem:[#allocation2 + $0x650] sm:$0xff] %v1894_v8  ;;  %v1896_v1 = vadd.f32 %v1895_v11, %v6375_v13  ;;  %v1066_v14 = vpop.f32.mrf.mxu0  ;;  %4350 = vmatmul.mubr.msk.f32.gmra.mxu0 %vm309_vm0, %v258_v9 }
 0x1b6   :  { %2561 = vst [vmem:[#allocation2 + $0x648] sm:$0xff] %v1063_v3  ;;  %v1067_v20 = vadd.f32 %v1066_v14, %v6364_v12  ;;  %v1899_v17 = vpop.f32.mrf.mxu1  ;;  %4478 = vmatmul.mubr.msk.f32.gmra.mxu1 %vm309_vm0, %v258_v9  ;;  %1358 = vmatprep.mubr.f32.mxu0 %v6793_v2 }
 0x1b7   :  { %2563 = vst [vmem:[#allocation2 + $0x658] sm:$0xff] %v1896_v1  ;;  %v1900_v6 = vadd.f32 %v1899_v17, %v6370_v10  ;;  %v1068_v15 = vpop.f32.mrf.mxu0  ;;  %2191 = vmatprep.mubr.f32.mxu1 %v6793_v2  ;;  %v260_v1 = vld [vmem:[%s8516_s0 + $0x328] sm:$0xff] }
 0x1b8   :  { %2564 = vst [vmem:[#allocation2 + $0x660] sm:$0xff] %v1067_v20  ;;  %v1069_v8 = vadd.f32 %v1068_v15, %v6372_v16  ;;  %v1901_v7 = vpop.f32.mrf.mxu1 }
 0x1b9   :  { %2566 = vst [vmem:[#allocation2 + $0x670] sm:$0xff] %v1900_v6  ;;  %v1902_v3 = vadd.f32 %v1901_v7, %v6375_v13  ;;  %v1072_v9 = vpop.f32.mrf.mxu0  ;;  %4351 = vmatmul.mubr.msk.f32.gmra.mxu0 %vm309_vm0, %v259_v4 }
 0x1ba   :  { %2565 = vst [vmem:[#allocation2 + $0x668] sm:$0xff] %v1069_v8  ;;  %v1073_v11 = vadd.f32 %v1072_v9, %v6364_v12  ;;  %v1905_v14 = vpop.f32.mrf.mxu1  ;;  %4479 = vmatmul.mubr.msk.f32.gmra.mxu1 %vm309_vm0, %v259_v4  ;;  %1364 = vmatprep.mubr.f32.mxu0 %v6793_v2 }
 0x1bb   :  { %2567 = vst [vmem:[#allocation2 + $0x678] sm:$0xff] %v1902_v3  ;;  %v1906_v20 = vadd.f32 %v1905_v14, %v6370_v10  ;;  %v1074_v17 = vpop.f32.mrf.mxu0  ;;  %2197 = vmatprep.mubr.f32.mxu1 %v6793_v2  ;;  %v261_v3 = vld [vmem:[%s8516_s0 + $0x330] sm:$0xff] }
 0x1bc   :  { %2568 = vst [vmem:[#allocation2 + $0x680] sm:$0xff] %v1073_v11  ;;  %v1075_v6 = vadd.f32 %v1074_v17, %v6372_v16  ;;  %v1907_v15 = vpop.f32.mrf.mxu1 }
 0x1bd   :  { %2570 = vst [vmem:[#allocation2 + $0x690] sm:$0xff] %v1906_v20  ;;  %v1908_v8 = vadd.f32 %v1907_v15, %v6375_v13  ;;  %v1078_v4 = vpop.f32.mrf.mxu0  ;;  %4352 = vmatmul.mubr.msk.f32.gmra.mxu0 %vm309_vm0, %v260_v1 }
 0x1be   :  { %2569 = vst [vmem:[#allocation2 + $0x688] sm:$0xff] %v1075_v6  ;;  %v1079_v7 = vadd.f32 %v1078_v4, %v6364_v12  ;;  %v1911_v9 = vpop.f32.mrf.mxu1  ;;  %4480 = vmatmul.mubr.msk.f32.gmra.mxu1 %vm309_vm0, %v260_v1  ;;  %1370 = vmatprep.mubr.f32.mxu0 %v6793_v2 }
 0x1bf   :  { %2571 = vst [vmem:[#allocation2 + $0x698] sm:$0xff] %v1908_v8  ;;  %v1912_v11 = vadd.f32 %v1911_v9, %v6370_v10  ;;  %v1080_v14 = vpop.f32.mrf.mxu0  ;;  %2203 = vmatprep.mubr.f32.mxu1 %v6793_v2  ;;  %v262_v8 = vld [vmem:[%s8516_s0 + $0x338] sm:$0xff] }
 0x1c0   :  { %2572 = vst [vmem:[#allocation2 + $0x6a0] sm:$0xff] %v1079_v7  ;;  %v1081_v20 = vadd.f32 %v1080_v14, %v6372_v16  ;;  %v1913_v17 = vpop.f32.mrf.mxu1 }
 0x1c1   :  { %2574 = vst [vmem:[#allocation2 + $0x6b0] sm:$0xff] %v1912_v11  ;;  %v1914_v6 = vadd.f32 %v1913_v17, %v6375_v13  ;;  %v1084_v1 = vpop.f32.mrf.mxu0  ;;  %4353 = vmatmul.mubr.msk.f32.gmra.mxu0 %vm309_vm0, %v261_v3 }
 0x1c2   :  { %2573 = vst [vmem:[#allocation2 + $0x6a8] sm:$0xff] %v1081_v20  ;;  %v1085_v15 = vadd.f32 %v1084_v1, %v6364_v12  ;;  %v1917_v4 = vpop.f32.mrf.mxu1  ;;  %4481 = vmatmul.mubr.msk.f32.gmra.mxu1 %vm309_vm0, %v261_v3  ;;  %1376 = vmatprep.mubr.f32.mxu0 %v6793_v2 }
 0x1c3   :  { %2575 = vst [vmem:[#allocation2 + $0x6b8] sm:$0xff] %v1914_v6  ;;  %v1918_v7 = vadd.f32 %v1917_v4, %v6370_v10  ;;  %v1086_v9 = vpop.f32.mrf.mxu0  ;;  %2209 = vmatprep.mubr.f32.mxu1 %v6793_v2  ;;  %v263_v6 = vld [vmem:[%s8516_s0 + $0x340] sm:$0xff] }
 0x1c4   :  { %2576 = vst [vmem:[#allocation2 + $0x6c0] sm:$0xff] %v1085_v15  ;;  %v1087_v11 = vadd.f32 %v1086_v9, %v6372_v16  ;;  %v1919_v14 = vpop.f32.mrf.mxu1 }
 0x1c5   :  { %2578 = vst [vmem:[#allocation2 + $0x6d0] sm:$0xff] %v1918_v7  ;;  %v1920_v20 = vadd.f32 %v1919_v14, %v6375_v13  ;;  %v1090_v3 = vpop.f32.mrf.mxu0  ;;  %4354 = vmatmul.mubr.msk.f32.gmra.mxu0 %vm309_vm0, %v262_v8 }
 0x1c6   :  { %2577 = vst [vmem:[#allocation2 + $0x6c8] sm:$0xff] %v1087_v11  ;;  %v1091_v17 = vadd.f32 %v1090_v3, %v6364_v12  ;;  %v1923_v1 = vpop.f32.mrf.mxu1  ;;  %4482 = vmatmul.mubr.msk.f32.gmra.mxu1 %vm309_vm0, %v262_v8  ;;  %1382 = vmatprep.mubr.f32.mxu0 %v6793_v2 }
 0x1c7   :  { %2579 = vst [vmem:[#allocation2 + $0x6d8] sm:$0xff] %v1920_v20  ;;  %v1924_v15 = vadd.f32 %v1923_v1, %v6370_v10  ;;  %v1092_v4 = vpop.f32.mrf.mxu0  ;;  %2215 = vmatprep.mubr.f32.mxu1 %v6793_v2  ;;  %v264_v20 = vld [vmem:[%s8516_s0 + $0x348] sm:$0xff] }
 0x1c8   :  { %2580 = vst [vmem:[#allocation2 + $0x6e0] sm:$0xff] %v1091_v17  ;;  %v1093_v7 = vadd.f32 %v1092_v4, %v6372_v16  ;;  %v1925_v9 = vpop.f32.mrf.mxu1 }
 0x1c9   :  { %2582 = vst [vmem:[#allocation2 + $0x6f0] sm:$0xff] %v1924_v15  ;;  %v1926_v11 = vadd.f32 %v1925_v9, %v6375_v13  ;;  %v1096_v8 = vpop.f32.mrf.mxu0  ;;  %4355 = vmatmul.mubr.msk.f32.gmra.mxu0 %vm309_vm0, %v263_v6 }
 0x1ca   :  { %2581 = vst [vmem:[#allocation2 + $0x6e8] sm:$0xff] %v1093_v7  ;;  %v1097_v14 = vadd.f32 %v1096_v8, %v6364_v12  ;;  %v1929_v3 = vpop.f32.mrf.mxu1  ;;  %4483 = vmatmul.mubr.msk.f32.gmra.mxu1 %vm309_vm0, %v263_v6  ;;  %1388 = vmatprep.mubr.f32.mxu0 %v6793_v2 }
 0x1cb   :  { %2583 = vst [vmem:[#allocation2 + $0x6f8] sm:$0xff] %v1926_v11  ;;  %v1930_v17 = vadd.f32 %v1929_v3, %v6370_v10  ;;  %v1098_v1 = vpop.f32.mrf.mxu0  ;;  %2221 = vmatprep.mubr.f32.mxu1 %v6793_v2  ;;  %v265_v11 = vld [vmem:[%s8516_s0 + $0x350] sm:$0xff] }
 0x1cc   :  { %2584 = vst [vmem:[#allocation2 + $0x700] sm:$0xff] %v1097_v14  ;;  %v1099_v15 = vadd.f32 %v1098_v1, %v6372_v16  ;;  %v1931_v4 = vpop.f32.mrf.mxu1 }
 0x1cd   :  { %2586 = vst [vmem:[#allocation2 + $0x710] sm:$0xff] %v1930_v17  ;;  %v1932_v7 = vadd.f32 %v1931_v4, %v6375_v13  ;;  %v1102_v6 = vpop.f32.mrf.mxu0  ;;  %4356 = vmatmul.mubr.msk.f32.gmra.mxu0 %vm309_vm0, %v264_v20 }
 0x1ce   :  { %2585 = vst [vmem:[#allocation2 + $0x708] sm:$0xff] %v1099_v15  ;;  %v1103_v9 = vadd.f32 %v1102_v6, %v6364_v12  ;;  %v1935_v8 = vpop.f32.mrf.mxu1  ;;  %4484 = vmatmul.mubr.msk.f32.gmra.mxu1 %vm309_vm0, %v264_v20  ;;  %1394 = vmatprep.mubr.f32.mxu0 %v6793_v2 }
 0x1cf   :  { %2587 = vst [vmem:[#allocation2 + $0x718] sm:$0xff] %v1932_v7  ;;  %v1936_v14 = vadd.f32 %v1935_v8, %v6370_v10  ;;  %v1104_v3 = vpop.f32.mrf.mxu0  ;;  %2227 = vmatprep.mubr.f32.mxu1 %v6793_v2  ;;  %v266_v7 = vld [vmem:[%s8516_s0 + $0x358] sm:$0xff] }
 0x1d0   :  { %2588 = vst [vmem:[#allocation2 + $0x720] sm:$0xff] %v1103_v9  ;;  %v1105_v17 = vadd.f32 %v1104_v3, %v6372_v16  ;;  %v1937_v1 = vpop.f32.mrf.mxu1 }
 0x1d1   :  { %2590 = vst [vmem:[#allocation2 + $0x730] sm:$0xff] %v1936_v14  ;;  %v1938_v15 = vadd.f32 %v1937_v1, %v6375_v13  ;;  %v1108_v20 = vpop.f32.mrf.mxu0  ;;  %4357 = vmatmul.mubr.msk.f32.gmra.mxu0 %vm309_vm0, %v265_v11 }
 0x1d2   :  { %2589 = vst [vmem:[#allocation2 + $0x728] sm:$0xff] %v1105_v17  ;;  %v1109_v4 = vadd.f32 %v1108_v20, %v6364_v12  ;;  %v1941_v6 = vpop.f32.mrf.mxu1  ;;  %4485 = vmatmul.mubr.msk.f32.gmra.mxu1 %vm309_vm0, %v265_v11  ;;  %1400 = vmatprep.mubr.f32.mxu0 %v6793_v2 }
 0x1d3   :  { %2591 = vst [vmem:[#allocation2 + $0x738] sm:$0xff] %v1938_v15  ;;  %v1942_v9 = vadd.f32 %v1941_v6, %v6370_v10  ;;  %v1110_v8 = vpop.f32.mrf.mxu0  ;;  %2233 = vmatprep.mubr.f32.mxu1 %v6793_v2  ;;  %v267_v15 = vld [vmem:[%s8516_s0 + $0x360] sm:$0xff] }
 0x1d4   :  { %2592 = vst [vmem:[#allocation2 + $0x740] sm:$0xff] %v1109_v4  ;;  %v1111_v14 = vadd.f32 %v1110_v8, %v6372_v16  ;;  %v1943_v3 = vpop.f32.mrf.mxu1 }
 0x1d5   :  { %2594 = vst [vmem:[#allocation2 + $0x750] sm:$0xff] %v1942_v9  ;;  %v1944_v17 = vadd.f32 %v1943_v3, %v6375_v13  ;;  %v1114_v11 = vpop.f32.mrf.mxu0  ;;  %4358 = vmatmul.mubr.msk.f32.gmra.mxu0 %vm309_vm0, %v266_v7 }
 0x1d6   :  { %2593 = vst [vmem:[#allocation2 + $0x748] sm:$0xff] %v1111_v14  ;;  %v1115_v1 = vadd.f32 %v1114_v11, %v6364_v12  ;;  %v1947_v20 = vpop.f32.mrf.mxu1  ;;  %4486 = vmatmul.mubr.msk.f32.gmra.mxu1 %vm309_vm0, %v266_v7  ;;  %1406 = vmatprep.mubr.f32.mxu0 %v6793_v2 }
 0x1d7   :  { %2595 = vst [vmem:[#allocation2 + $0x758] sm:$0xff] %v1944_v17  ;;  %v1948_v4 = vadd.f32 %v1947_v20, %v6370_v10  ;;  %v1116_v6 = vpop.f32.mrf.mxu0  ;;  %2239 = vmatprep.mubr.f32.mxu1 %v6793_v2  ;;  %v268_v17 = vld [vmem:[%s8516_s0 + $0x368] sm:$0xff] }
 0x1d8   :  { %2596 = vst [vmem:[#allocation2 + $0x760] sm:$0xff] %v1115_v1  ;;  %v1117_v9 = vadd.f32 %v1116_v6, %v6372_v16  ;;  %v1949_v8 = vpop.f32.mrf.mxu1 }
 0x1d9   :  { %2598 = vst [vmem:[#allocation2 + $0x770] sm:$0xff] %v1948_v4  ;;  %v1950_v14 = vadd.f32 %v1949_v8, %v6375_v13  ;;  %v1120_v7 = vpop.f32.mrf.mxu0  ;;  %4359 = vmatmul.mubr.msk.f32.gmra.mxu0 %vm309_vm0, %v267_v15 }
 0x1da   :  { %2597 = vst [vmem:[#allocation2 + $0x768] sm:$0xff] %v1117_v9  ;;  %v1121_v3 = vadd.f32 %v1120_v7, %v6364_v12  ;;  %v1953_v11 = vpop.f32.mrf.mxu1  ;;  %4487 = vmatmul.mubr.msk.f32.gmra.mxu1 %vm309_vm0, %v267_v15  ;;  %1412 = vmatprep.mubr.f32.mxu0 %v6793_v2 }
 0x1db   :  { %2599 = vst [vmem:[#allocation2 + $0x778] sm:$0xff] %v1950_v14  ;;  %v1954_v1 = vadd.f32 %v1953_v11, %v6370_v10  ;;  %v1122_v20 = vpop.f32.mrf.mxu0  ;;  %2245 = vmatprep.mubr.f32.mxu1 %v6793_v2  ;;  %v269_v14 = vld [vmem:[%s8516_s0 + $0x370] sm:$0xff] }
 0x1dc   :  { %2600 = vst [vmem:[#allocation2 + $0x780] sm:$0xff] %v1121_v3  ;;  %v1123_v4 = vadd.f32 %v1122_v20, %v6372_v16  ;;  %v1955_v6 = vpop.f32.mrf.mxu1 }
 0x1dd   :  { %2602 = vst [vmem:[#allocation2 + $0x790] sm:$0xff] %v1954_v1  ;;  %v1956_v9 = vadd.f32 %v1955_v6, %v6375_v13  ;;  %v1126_v15 = vpop.f32.mrf.mxu0  ;;  %4360 = vmatmul.mubr.msk.f32.gmra.mxu0 %vm309_vm0, %v268_v17 }
 0x1de   :  { %2601 = vst [vmem:[#allocation2 + $0x788] sm:$0xff] %v1123_v4  ;;  %v1127_v8 = vadd.f32 %v1126_v15, %v6364_v12  ;;  %v1959_v7 = vpop.f32.mrf.mxu1  ;;  %4488 = vmatmul.mubr.msk.f32.gmra.mxu1 %vm309_vm0, %v268_v17  ;;  %1418 = vmatprep.mubr.f32.mxu0 %v6793_v2 }
 0x1df   :  { %2603 = vst [vmem:[#allocation2 + $0x798] sm:$0xff] %v1956_v9  ;;  %v1960_v3 = vadd.f32 %v1959_v7, %v6370_v10  ;;  %v1128_v11 = vpop.f32.mrf.mxu0  ;;  %2251 = vmatprep.mubr.f32.mxu1 %v6793_v2  ;;  %v270_v9 = vld [vmem:[%s8516_s0 + $0x378] sm:$0xff] }
 0x1e0   :  { %2604 = vst [vmem:[#allocation2 + $0x7a0] sm:$0xff] %v1127_v8  ;;  %v1129_v1 = vadd.f32 %v1128_v11, %v6372_v16  ;;  %v1961_v20 = vpop.f32.mrf.mxu1 }
 0x1e1   :  { %2606 = vst [vmem:[#allocation2 + $0x7b0] sm:$0xff] %v1960_v3  ;;  %v1962_v4 = vadd.f32 %v1961_v20, %v6375_v13  ;;  %v1132_v17 = vpop.f32.mrf.mxu0  ;;  %4361 = vmatmul.mubr.msk.f32.gmra.mxu0 %vm309_vm0, %v269_v14 }
 0x1e2   :  { %2605 = vst [vmem:[#allocation2 + $0x7a8] sm:$0xff] %v1129_v1  ;;  %v1133_v6 = vadd.f32 %v1132_v17, %v6364_v12  ;;  %v1965_v15 = vpop.f32.mrf.mxu1  ;;  %4489 = vmatmul.mubr.msk.f32.gmra.mxu1 %vm309_vm0, %v269_v14  ;;  %1424 = vmatprep.mubr.f32.mxu0 %v6793_v2 }
 0x1e3   :  { %2607 = vst [vmem:[#allocation2 + $0x7b8] sm:$0xff] %v1962_v4  ;;  %v1966_v8 = vadd.f32 %v1965_v15, %v6370_v10  ;;  %v1134_v7 = vpop.f32.mrf.mxu0  ;;  %2257 = vmatprep.mubr.f32.mxu1 %v6793_v2  ;;  %v271_v4 = vld [vmem:[%s8516_s0 + $0x380] sm:$0xff] }
 0x1e4   :  { %2608 = vst [vmem:[#allocation2 + $0x7c0] sm:$0xff] %v1133_v6  ;;  %v1135_v3 = vadd.f32 %v1134_v7, %v6372_v16  ;;  %v1967_v11 = vpop.f32.mrf.mxu1 }
 0x1e5   :  { %2610 = vst [vmem:[#allocation2 + $0x7d0] sm:$0xff] %v1966_v8  ;;  %v1968_v1 = vadd.f32 %v1967_v11, %v6375_v13  ;;  %v1138_v14 = vpop.f32.mrf.mxu0  ;;  %4362 = vmatmul.mubr.msk.f32.gmra.mxu0 %vm309_vm0, %v270_v9 }
 0x1e6   :  { %2609 = vst [vmem:[#allocation2 + $0x7c8] sm:$0xff] %v1135_v3  ;;  %v1139_v20 = vadd.f32 %v1138_v14, %v6364_v12  ;;  %v1971_v17 = vpop.f32.mrf.mxu1  ;;  %4490 = vmatmul.mubr.msk.f32.gmra.mxu1 %vm309_vm0, %v270_v9  ;;  %1430 = vmatprep.mubr.f32.mxu0 %v6793_v2 }
 0x1e7   :  { %2611 = vst [vmem:[#allocation2 + $0x7d8] sm:$0xff] %v1968_v1  ;;  %v1972_v6 = vadd.f32 %v1971_v17, %v6370_v10  ;;  %v1140_v15 = vpop.f32.mrf.mxu0  ;;  %2263 = vmatprep.mubr.f32.mxu1 %v6793_v2  ;;  %v272_v1 = vld [vmem:[%s8516_s0 + $0x388] sm:$0xff] }
 0x1e8   :  { %2612 = vst [vmem:[#allocation2 + $0x7e0] sm:$0xff] %v1139_v20  ;;  %v1141_v8 = vadd.f32 %v1140_v15, %v6372_v16  ;;  %v1973_v7 = vpop.f32.mrf.mxu1 }
 0x1e9   :  { %2614 = vst [vmem:[#allocation2 + $0x7f0] sm:$0xff] %v1972_v6  ;;  %v1974_v3 = vadd.f32 %v1973_v7, %v6375_v13  ;;  %v1144_v9 = vpop.f32.mrf.mxu0  ;;  %4363 = vmatmul.mubr.msk.f32.gmra.mxu0 %vm309_vm0, %v271_v4 }
 0x1ea   :  { %2613 = vst [vmem:[#allocation2 + $0x7e8] sm:$0xff] %v1141_v8  ;;  %v1145_v11 = vadd.f32 %v1144_v9, %v6364_v12  ;;  %v1977_v14 = vpop.f32.mrf.mxu1  ;;  %4491 = vmatmul.mubr.msk.f32.gmra.mxu1 %vm309_vm0, %v271_v4  ;;  %1436 = vmatprep.mubr.f32.mxu0 %v6793_v2 }
 0x1eb   :  { %2615 = vst [vmem:[#allocation2 + $0x7f8] sm:$0xff] %v1974_v3  ;;  %v1978_v20 = vadd.f32 %v1977_v14, %v6370_v10  ;;  %v1146_v17 = vpop.f32.mrf.mxu0  ;;  %2269 = vmatprep.mubr.f32.mxu1 %v6793_v2  ;;  %v273_v3 = vld [vmem:[%s8516_s0 + $0x390] sm:$0xff] }
 0x1ec   :  { %2616 = vst [vmem:[#allocation2 + $0x800] sm:$0xff] %v1145_v11  ;;  %v1147_v6 = vadd.f32 %v1146_v17, %v6372_v16  ;;  %v1979_v15 = vpop.f32.mrf.mxu1 }
 0x1ed   :  { %2618 = vst [vmem:[#allocation2 + $0x810] sm:$0xff] %v1978_v20  ;;  %v1980_v8 = vadd.f32 %v1979_v15, %v6375_v13  ;;  %v1150_v4 = vpop.f32.mrf.mxu0  ;;  %4364 = vmatmul.mubr.msk.f32.gmra.mxu0 %vm309_vm0, %v272_v1 }
 0x1ee   :  { %2617 = vst [vmem:[#allocation2 + $0x808] sm:$0xff] %v1147_v6  ;;  %v1151_v7 = vadd.f32 %v1150_v4, %v6364_v12  ;;  %v1983_v9 = vpop.f32.mrf.mxu1  ;;  %4492 = vmatmul.mubr.msk.f32.gmra.mxu1 %vm309_vm0, %v272_v1  ;;  %1442 = vmatprep.mubr.f32.mxu0 %v6793_v2 }
 0x1ef   :  { %2619 = vst [vmem:[#allocation2 + $0x818] sm:$0xff] %v1980_v8  ;;  %v1984_v11 = vadd.f32 %v1983_v9, %v6370_v10  ;;  %v1152_v14 = vpop.f32.mrf.mxu0  ;;  %2275 = vmatprep.mubr.f32.mxu1 %v6793_v2  ;;  %v274_v8 = vld [vmem:[%s8516_s0 + $0x398] sm:$0xff] }
 0x1f0   :  { %2620 = vst [vmem:[#allocation2 + $0x820] sm:$0xff] %v1151_v7  ;;  %v1153_v20 = vadd.f32 %v1152_v14, %v6372_v16  ;;  %v1985_v17 = vpop.f32.mrf.mxu1 }
 0x1f1   :  { %2622 = vst [vmem:[#allocation2 + $0x830] sm:$0xff] %v1984_v11  ;;  %v1986_v6 = vadd.f32 %v1985_v17, %v6375_v13  ;;  %v1156_v1 = vpop.f32.mrf.mxu0  ;;  %4365 = vmatmul.mubr.msk.f32.gmra.mxu0 %vm309_vm0, %v273_v3 }
 0x1f2   :  { %2621 = vst [vmem:[#allocation2 + $0x828] sm:$0xff] %v1153_v20  ;;  %v1157_v15 = vadd.f32 %v1156_v1, %v6364_v12  ;;  %v1989_v4 = vpop.f32.mrf.mxu1  ;;  %4493 = vmatmul.mubr.msk.f32.gmra.mxu1 %vm309_vm0, %v273_v3  ;;  %1448 = vmatprep.mubr.f32.mxu0 %v6793_v2 }
 0x1f3   :  { %2623 = vst [vmem:[#allocation2 + $0x838] sm:$0xff] %v1986_v6  ;;  %v1990_v7 = vadd.f32 %v1989_v4, %v6370_v10  ;;  %v1158_v9 = vpop.f32.mrf.mxu0  ;;  %2281 = vmatprep.mubr.f32.mxu1 %v6793_v2  ;;  %v275_v6 = vld [vmem:[%s8516_s0 + $0x3a0] sm:$0xff] }
 0x1f4   :  { %2624 = vst [vmem:[#allocation2 + $0x840] sm:$0xff] %v1157_v15  ;;  %v1159_v11 = vadd.f32 %v1158_v9, %v6372_v16  ;;  %v1991_v14 = vpop.f32.mrf.mxu1 }
 0x1f5   :  { %2626 = vst [vmem:[#allocation2 + $0x850] sm:$0xff] %v1990_v7  ;;  %v1992_v20 = vadd.f32 %v1991_v14, %v6375_v13  ;;  %v1162_v3 = vpop.f32.mrf.mxu0  ;;  %4366 = vmatmul.mubr.msk.f32.gmra.mxu0 %vm309_vm0, %v274_v8 }
 0x1f6   :  { %2625 = vst [vmem:[#allocation2 + $0x848] sm:$0xff] %v1159_v11  ;;  %v1163_v17 = vadd.f32 %v1162_v3, %v6364_v12  ;;  %v1995_v1 = vpop.f32.mrf.mxu1  ;;  %4494 = vmatmul.mubr.msk.f32.gmra.mxu1 %vm309_vm0, %v274_v8  ;;  %1454 = vmatprep.mubr.f32.mxu0 %v6793_v2 }
 0x1f7   :  { %2627 = vst [vmem:[#allocation2 + $0x858] sm:$0xff] %v1992_v20  ;;  %v1996_v15 = vadd.f32 %v1995_v1, %v6370_v10  ;;  %v1164_v4 = vpop.f32.mrf.mxu0  ;;  %2287 = vmatprep.mubr.f32.mxu1 %v6793_v2  ;;  %v7131_v20 = vld [vmem:[#allocation3 + $0x30] sm:$0xff]  ;;  %v276_v2 = vld [vmem:[%s8516_s0 + $0x3a8] sm:$0xff] }
 0x1f8   :  { %2628 = vst [vmem:[#allocation2 + $0x860] sm:$0xff] %v1163_v17  ;;  %v1165_v7 = vadd.f32 %v1164_v4, %v6372_v16  ;;  %v1997_v9 = vpop.f32.mrf.mxu1 }
 0x1f9   :  { %2630 = vst [vmem:[#allocation2 + $0x870] sm:$0xff] %v1996_v15  ;;  %v1998_v11 = vadd.f32 %v1997_v9, %v6375_v13  ;;  %v1168_v8 = vpop.f32.mrf.mxu0  ;;  %4367 = vmatmul.mubr.msk.f32.gmra.mxu0 %vm309_vm0, %v275_v6 }
 0x1fa   :  { %2629 = vst [vmem:[#allocation2 + $0x868] sm:$0xff] %v1165_v7  ;;  %v1169_v14 = vadd.f32 %v1168_v8, %v6364_v12  ;;  %v2001_v3 = vpop.f32.mrf.mxu1  ;;  %4495 = vmatmul.mubr.msk.f32.gmra.mxu1 %vm309_vm0, %v275_v6  ;;  %1460 = vmatprep.mubr.f32.mxu0 %v7131_v20 }
 0x1fb   :  { %2631 = vst [vmem:[#allocation2 + $0x878] sm:$0xff] %v1998_v11  ;;  %v2002_v17 = vadd.f32 %v2001_v3, %v6370_v10  ;;  %v1170_v1 = vpop.f32.mrf.mxu0  ;;  %2293 = vmatprep.mubr.f32.mxu1 %v7131_v20  ;;  %v277_v11 = vld [vmem:[%s8516_s0 + $0x3b0] sm:$0xff] }
 0x1fc   :  { %2632 = vst [vmem:[#allocation2 + $0x880] sm:$0xff] %v1169_v14  ;;  %v1171_v15 = vadd.f32 %v1170_v1, %v6372_v16  ;;  %v2003_v4 = vpop.f32.mrf.mxu1 }
 0x1fd   :  { %2634 = vst [vmem:[#allocation2 + $0x890] sm:$0xff] %v2002_v17  ;;  %v2004_v6 = vadd.f32 %v2003_v4, %v6375_v13  ;;  %v1174_v7 = vpop.f32.mrf.mxu0  ;;  %4368 = vmatmul.mubr.msk.f32.gmra.mxu0 %vm309_vm0, %v276_v2 }
 0x1fe   :  { %2633 = vst [vmem:[#allocation2 + $0x888] sm:$0xff] %v1171_v15  ;;  %v1175_v9 = vadd.f32 %v1174_v7, %v6364_v12  ;;  %v2007_v8 = vpop.f32.mrf.mxu1  ;;  %4496 = vmatmul.mubr.msk.f32.gmra.mxu1 %vm309_vm0, %v276_v2  ;;  %1466 = vmatprep.mubr.f32.mxu0 %v7131_v20 }
 0x1ff   :  { %2635 = vst [vmem:[#allocation2 + $0x898] sm:$0xff] %v2004_v6  ;;  %v2008_v14 = vadd.f32 %v2007_v8, %v6370_v10  ;;  %v1176_v3 = vpop.f32.mrf.mxu0  ;;  %2299 = vmatprep.mubr.f32.mxu1 %v7131_v20  ;;  %v278_v6 = vld [vmem:[%s8516_s0 + $0x3b8] sm:$0xff] }
 0x200   :  { %2636 = vst [vmem:[#allocation2 + $0x8a0] sm:$0xff] %v1175_v9  ;;  %v1177_v17 = vadd.f32 %v1176_v3, %v6372_v16  ;;  %v2009_v1 = vpop.f32.mrf.mxu1 }
 0x201   :  { %2638 = vst [vmem:[#allocation2 + $0x8b0] sm:$0xff] %v2008_v14  ;;  %v2010_v15 = vadd.f32 %v2009_v1, %v6375_v13  ;;  %v1180_v2 = vpop.f32.mrf.mxu0  ;;  %4369 = vmatmul.mubr.msk.f32.gmra.mxu0 %vm309_vm0, %v277_v11 }
 0x202   :  { %2637 = vst [vmem:[#allocation2 + $0x8a8] sm:$0xff] %v1177_v17  ;;  %v1181_v4 = vadd.f32 %v1180_v2, %v6364_v12  ;;  %v2013_v7 = vpop.f32.mrf.mxu1  ;;  %4497 = vmatmul.mubr.msk.f32.gmra.mxu1 %vm309_vm0, %v277_v11  ;;  %1472 = vmatprep.mubr.f32.mxu0 %v7131_v20 }
 0x203   :  { %2639 = vst [vmem:[#allocation2 + $0x8b8] sm:$0xff] %v2010_v15  ;;  %v2014_v9 = vadd.f32 %v2013_v7, %v6370_v10  ;;  %v1182_v8 = vpop.f32.mrf.mxu0  ;;  %2305 = vmatprep.mubr.f32.mxu1 %v7131_v20  ;;  %v279_v15 = vld [vmem:[%s8516_s0 + $0x3c0] sm:$0xff] }
 0x204   :  { %2640 = vst [vmem:[#allocation2 + $0x8c0] sm:$0xff] %v1181_v4  ;;  %v1183_v14 = vadd.f32 %v1182_v8, %v6372_v16  ;;  %v2015_v3 = vpop.f32.mrf.mxu1 }
 0x205   :  { %2642 = vst [vmem:[#allocation2 + $0x8d0] sm:$0xff] %v2014_v9  ;;  %v2016_v17 = vadd.f32 %v2015_v3, %v6375_v13  ;;  %v1186_v11 = vpop.f32.mrf.mxu0  ;;  %4370 = vmatmul.mubr.msk.f32.gmra.mxu0 %vm309_vm0, %v278_v6 }
 0x206   :  { %2641 = vst [vmem:[#allocation2 + $0x8c8] sm:$0xff] %v1183_v14  ;;  %v1187_v1 = vadd.f32 %v1186_v11, %v6364_v12  ;;  %v2019_v2 = vpop.f32.mrf.mxu1  ;;  %4498 = vmatmul.mubr.msk.f32.gmra.mxu1 %vm309_vm0, %v278_v6  ;;  %1478 = vmatprep.mubr.f32.mxu0 %v7131_v20 }
 0x207   :  { %2643 = vst [vmem:[#allocation2 + $0x8d8] sm:$0xff] %v2016_v17  ;;  %v2020_v4 = vadd.f32 %v2019_v2, %v6370_v10  ;;  %v1188_v7 = vpop.f32.mrf.mxu0  ;;  %2311 = vmatprep.mubr.f32.mxu1 %v7131_v20  ;;  %v280_v17 = vld [vmem:[%s8516_s0 + $0x3c8] sm:$0xff] }
 0x208   :  { %2644 = vst [vmem:[#allocation2 + $0x8e0] sm:$0xff] %v1187_v1  ;;  %v1189_v9 = vadd.f32 %v1188_v7, %v6372_v16  ;;  %v2021_v8 = vpop.f32.mrf.mxu1 }
 0x209   :  { %2646 = vst [vmem:[#allocation2 + $0x8f0] sm:$0xff] %v2020_v4  ;;  %v2022_v14 = vadd.f32 %v2021_v8, %v6375_v13  ;;  %v1192_v6 = vpop.f32.mrf.mxu0  ;;  %4371 = vmatmul.mubr.msk.f32.gmra.mxu0 %vm309_vm0, %v279_v15 }
 0x20a   :  { %2645 = vst [vmem:[#allocation2 + $0x8e8] sm:$0xff] %v1189_v9  ;;  %v1193_v3 = vadd.f32 %v1192_v6, %v6364_v12  ;;  %v2025_v11 = vpop.f32.mrf.mxu1  ;;  %4499 = vmatmul.mubr.msk.f32.gmra.mxu1 %vm309_vm0, %v279_v15  ;;  %1484 = vmatprep.mubr.f32.mxu0 %v7131_v20 }
 0x20b   :  { %2647 = vst [vmem:[#allocation2 + $0x8f8] sm:$0xff] %v2022_v14  ;;  %v2026_v1 = vadd.f32 %v2025_v11, %v6370_v10  ;;  %v1194_v2 = vpop.f32.mrf.mxu0  ;;  %2317 = vmatprep.mubr.f32.mxu1 %v7131_v20  ;;  %v281_v14 = vld [vmem:[%s8516_s0 + $0x3d0] sm:$0xff] }
 0x20c   :  { %2648 = vst [vmem:[#allocation2 + $0x900] sm:$0xff] %v1193_v3  ;;  %v1195_v4 = vadd.f32 %v1194_v2, %v6372_v16  ;;  %v2027_v7 = vpop.f32.mrf.mxu1 }
 0x20d   :  { %2650 = vst [vmem:[#allocation2 + $0x910] sm:$0xff] %v2026_v1  ;;  %v2028_v9 = vadd.f32 %v2027_v7, %v6375_v13  ;;  %v1198_v15 = vpop.f32.mrf.mxu0  ;;  %4372 = vmatmul.mubr.msk.f32.gmra.mxu0 %vm309_vm0, %v280_v17 }
 0x20e   :  { %2649 = vst [vmem:[#allocation2 + $0x908] sm:$0xff] %v1195_v4  ;;  %v1199_v8 = vadd.f32 %v1198_v15, %v6364_v12  ;;  %v2031_v6 = vpop.f32.mrf.mxu1  ;;  %4500 = vmatmul.mubr.msk.f32.gmra.mxu1 %vm309_vm0, %v280_v17  ;;  %1490 = vmatprep.mubr.f32.mxu0 %v7131_v20 }
 0x20f   :  { %2651 = vst [vmem:[#allocation2 + $0x918] sm:$0xff] %v2028_v9  ;;  %v2032_v3 = vadd.f32 %v2031_v6, %v6370_v10  ;;  %v1200_v11 = vpop.f32.mrf.mxu0  ;;  %2323 = vmatprep.mubr.f32.mxu1 %v7131_v20  ;;  %v282_v9 = vld [vmem:[%s8516_s0 + $0x3d8] sm:$0xff] }
 0x210   :  { %2652 = vst [vmem:[#allocation2 + $0x920] sm:$0xff] %v1199_v8  ;;  %v1201_v1 = vadd.f32 %v1200_v11, %v6372_v16  ;;  %v2033_v2 = vpop.f32.mrf.mxu1 }
 0x211   :  { %2654 = vst [vmem:[#allocation2 + $0x930] sm:$0xff] %v2032_v3  ;;  %v2034_v4 = vadd.f32 %v2033_v2, %v6375_v13  ;;  %v1204_v17 = vpop.f32.mrf.mxu0  ;;  %4373 = vmatmul.mubr.msk.f32.gmra.mxu0 %vm309_vm0, %v281_v14 }
 0x212   :  { %2653 = vst [vmem:[#allocation2 + $0x928] sm:$0xff] %v1201_v1  ;;  %v1205_v7 = vadd.f32 %v1204_v17, %v6364_v12  ;;  %v2037_v15 = vpop.f32.mrf.mxu1  ;;  %4501 = vmatmul.mubr.msk.f32.gmra.mxu1 %vm309_vm0, %v281_v14  ;;  %1496 = vmatprep.mubr.f32.mxu0 %v7131_v20 }
 0x213   :  { %2655 = vst [vmem:[#allocation2 + $0x938] sm:$0xff] %v2034_v4  ;;  %v2038_v8 = vadd.f32 %v2037_v15, %v6370_v10  ;;  %v1206_v6 = vpop.f32.mrf.mxu0  ;;  %2329 = vmatprep.mubr.f32.mxu1 %v7131_v20  ;;  %v283_v4 = vld [vmem:[%s8516_s0 + $0x3e0] sm:$0xff] }
 0x214   :  { %2656 = vst [vmem:[#allocation2 + $0x940] sm:$0xff] %v1205_v7  ;;  %v1207_v3 = vadd.f32 %v1206_v6, %v6372_v16  ;;  %v2039_v11 = vpop.f32.mrf.mxu1 }
 0x215   :  { %2658 = vst [vmem:[#allocation2 + $0x950] sm:$0xff] %v2038_v8  ;;  %v2040_v1 = vadd.f32 %v2039_v11, %v6375_v13  ;;  %v1210_v14 = vpop.f32.mrf.mxu0  ;;  %4374 = vmatmul.mubr.msk.f32.gmra.mxu0 %vm309_vm0, %v282_v9 }
 0x216   :  { %2657 = vst [vmem:[#allocation2 + $0x948] sm:$0xff] %v1207_v3  ;;  %v1211_v2 = vadd.f32 %v1210_v14, %v6364_v12  ;;  %v2043_v17 = vpop.f32.mrf.mxu1  ;;  %4502 = vmatmul.mubr.msk.f32.gmra.mxu1 %vm309_vm0, %v282_v9  ;;  %1502 = vmatprep.mubr.f32.mxu0 %v7131_v20 }
 0x217   :  { %2659 = vst [vmem:[#allocation2 + $0x958] sm:$0xff] %v2040_v1  ;;  %v2044_v7 = vadd.f32 %v2043_v17, %v6370_v10  ;;  %v1212_v15 = vpop.f32.mrf.mxu0  ;;  %2335 = vmatprep.mubr.f32.mxu1 %v7131_v20  ;;  %v284_v1 = vld [vmem:[%s8516_s0 + $0x3e8] sm:$0xff] }
 0x218   :  { %2660 = vst [vmem:[#allocation2 + $0x960] sm:$0xff] %v1211_v2  ;;  %v1213_v8 = vadd.f32 %v1212_v15, %v6372_v16  ;;  %v2045_v6 = vpop.f32.mrf.mxu1 }
 0x219   :  { %2662 = vst [vmem:[#allocation2 + $0x970] sm:$0xff] %v2044_v7  ;;  %v2046_v3 = vadd.f32 %v2045_v6, %v6375_v13  ;;  %v1216_v9 = vpop.f32.mrf.mxu0  ;;  %4375 = vmatmul.mubr.msk.f32.gmra.mxu0 %vm309_vm0, %v283_v4 }
 0x21a   :  { %2661 = vst [vmem:[#allocation2 + $0x968] sm:$0xff] %v1213_v8  ;;  %v1217_v11 = vadd.f32 %v1216_v9, %v6364_v12  ;;  %v2049_v14 = vpop.f32.mrf.mxu1  ;;  %4503 = vmatmul.mubr.msk.f32.gmra.mxu1 %vm309_vm0, %v283_v4  ;;  %1508 = vmatprep.mubr.f32.mxu0 %v7131_v20 }
 0x21b   :  { %2663 = vst [vmem:[#allocation2 + $0x978] sm:$0xff] %v2046_v3  ;;  %v2050_v2 = vadd.f32 %v2049_v14, %v6370_v10  ;;  %v1218_v17 = vpop.f32.mrf.mxu0  ;;  %2341 = vmatprep.mubr.f32.mxu1 %v7131_v20  ;;  %v285_v3 = vld [vmem:[%s8516_s0 + $0x3f0] sm:$0xff] }
 0x21c   :  { %2664 = vst [vmem:[#allocation2 + $0x980] sm:$0xff] %v1217_v11  ;;  %v1219_v7 = vadd.f32 %v1218_v17, %v6372_v16  ;;  %v2051_v15 = vpop.f32.mrf.mxu1 }
 0x21d   :  { %2666 = vst [vmem:[#allocation2 + $0x990] sm:$0xff] %v2050_v2  ;;  %v2052_v8 = vadd.f32 %v2051_v15, %v6375_v13  ;;  %v1222_v4 = vpop.f32.mrf.mxu0  ;;  %4376 = vmatmul.mubr.msk.f32.gmra.mxu0 %vm309_vm0, %v284_v1 }
 0x21e   :  { %2665 = vst [vmem:[#allocation2 + $0x988] sm:$0xff] %v1219_v7  ;;  %v1223_v6 = vadd.f32 %v1222_v4, %v6364_v12  ;;  %v2055_v9 = vpop.f32.mrf.mxu1  ;;  %4504 = vmatmul.mubr.msk.f32.gmra.mxu1 %vm309_vm0, %v284_v1  ;;  %1514 = vmatprep.mubr.f32.mxu0 %v7131_v20 }
 0x21f   :  { %2667 = vst [vmem:[#allocation2 + $0x998] sm:$0xff] %v2052_v8  ;;  %v2056_v11 = vadd.f32 %v2055_v9, %v6370_v10  ;;  %v1224_v14 = vpop.f32.mrf.mxu0  ;;  %2347 = vmatprep.mubr.f32.mxu1 %v7131_v20  ;;  %v286_v8 = vld [vmem:[%s8516_s0 + $0x3f8] sm:$0xff] }
 0x220   :  { %2668 = vst [vmem:[#allocation2 + $0x9a0] sm:$0xff] %v1223_v6  ;;  %v1225_v2 = vadd.f32 %v1224_v14, %v6372_v16  ;;  %v2057_v17 = vpop.f32.mrf.mxu1 }
 0x221   :  { %2670 = vst [vmem:[#allocation2 + $0x9b0] sm:$0xff] %v2056_v11  ;;  %v2058_v7 = vadd.f32 %v2057_v17, %v6375_v13  ;;  %v1228_v1 = vpop.f32.mrf.mxu0  ;;  %4377 = vmatmul.mubr.msk.f32.gmra.mxu0 %vm309_vm0, %v285_v3 }
 0x222   :  { %2669 = vst [vmem:[#allocation2 + $0x9a8] sm:$0xff] %v1225_v2  ;;  %v1229_v15 = vadd.f32 %v1228_v1, %v6364_v12  ;;  %v2061_v4 = vpop.f32.mrf.mxu1  ;;  %4505 = vmatmul.mubr.msk.f32.gmra.mxu1 %vm309_vm0, %v285_v3  ;;  %1520 = vmatprep.mubr.f32.mxu0 %v7131_v20 }
 0x223   :  { %2671 = vst [vmem:[#allocation2 + $0x9b8] sm:$0xff] %v2058_v7  ;;  %v2062_v6 = vadd.f32 %v2061_v4, %v6370_v10  ;;  %v1230_v9 = vpop.f32.mrf.mxu0  ;;  %2353 = vmatprep.mubr.f32.mxu1 %v7131_v20 }
 0x224   :  { %2672 = vst [vmem:[#allocation2 + $0x9c0] sm:$0xff] %v1229_v15  ;;  %v1231_v11 = vadd.f32 %v1230_v9, %v6372_v16  ;;  %v2063_v14 = vpop.f32.mrf.mxu1 }
 0x225   :  { %2674 = vst [vmem:[#allocation2 + $0x9d0] sm:$0xff] %v2062_v6  ;;  %v2064_v2 = vadd.f32 %v2063_v14, %v6375_v13  ;;  %v1234_v3 = vpop.f32.mrf.mxu0  ;;  %4378 = vmatmul.mubr.msk.f32.gmra.mxu0 %vm309_vm0, %v286_v8 }
 0x226   :  { %2673 = vst [vmem:[#allocation2 + $0x9c8] sm:$0xff] %v1231_v11  ;;  %v1235_v17 = vadd.f32 %v1234_v3, %v6364_v12  ;;  %v2067_v1 = vpop.f32.mrf.mxu1  ;;  %4506 = vmatmul.mubr.msk.f32.gmra.mxu1 %vm309_vm0, %v286_v8 }
 0x227   :  { %2675 = vst [vmem:[#allocation2 + $0x9d8] sm:$0xff] %v2064_v2  ;;  %v2068_v7 = vadd.f32 %v2067_v1, %v6370_v10  ;;  %v1236_v20 = vpop.f32.mrf.mxu0 }
 0x228   :  { %2676 = vst [vmem:[#allocation2 + $0x9e0] sm:$0xff] %v1235_v17  ;;  %v1237_v15 = vadd.f32 %v1236_v20, %v6372_v16  ;;  %v2069_v4 = vpop.f32.mrf.mxu1 }
 0x229   :  { %2678 = vst [vmem:[#allocation2 + $0x9f0] sm:$0xff] %v2068_v7  ;;  %v2070_v6 = vadd.f32 %v2069_v4, %v6375_v13  ;;  %v1240_v9 = vpop.f32.mrf.mxu0 }
 0x22a   :  { %2677 = vst [vmem:[#allocation2 + $0x9e8] sm:$0xff] %v1237_v15  ;;  %v1241_v11 = vadd.f32 %v1240_v9, %v6364_v12  ;;  %v2073_v14 = vpop.f32.mrf.mxu1 }
 0x22b   :  { %2679 = vst [vmem:[#allocation2 + $0x9f8] sm:$0xff] %v2070_v6  ;;  %v2074_v3 = vadd.f32 %v2073_v14, %v6370_v10  ;;  %v1242_v8 = vpop.f32.mrf.mxu0 }
 0x22c   :  { %2680 = vst [vmem:[#allocation2 + $0xa00] sm:$0xff] %v1241_v11  ;;  %v1243_v2 = vadd.f32 %v1242_v8, %v6372_v16  ;;  %v2075_v1 = vpop.f32.mrf.mxu1 }
 0x22d   :  { %2682 = vst [vmem:[#allocation2 + $0xa10] sm:$0xff] %v2074_v3  ;;  %v2076_v17 = vadd.f32 %v2075_v1, %v6375_v13  ;;  %v1246_v20 = vpop.f32.mrf.mxu0 }
 0x22e   :  { %2681 = vst [vmem:[#allocation2 + $0xa08] sm:$0xff] %v1243_v2  ;;  %v1247_v7 = vadd.f32 %v1246_v20, %v6364_v12  ;;  %v2079_v4 = vpop.f32.mrf.mxu1 }
 0x22f   :  { %2683 = vst [vmem:[#allocation2 + $0xa18] sm:$0xff] %v2076_v17  ;;  %v2080_v15 = vadd.f32 %v2079_v4, %v6370_v10  ;;  %v1248_v9 = vpop.f32.mrf.mxu0 }
 0x230   :  { %2684 = vst [vmem:[#allocation2 + $0xa20] sm:$0xff] %v1247_v7  ;;  %v1249_v6 = vadd.f32 %v1248_v9, %v6372_v16  ;;  %v2081_v14 = vpop.f32.mrf.mxu1 }
 0x231   :  { %2686 = vst [vmem:[#allocation2 + $0xa30] sm:$0xff] %v2080_v15  ;;  %v2082_v11 = vadd.f32 %v2081_v14, %v6375_v13  ;;  %v1252_v8 = vpop.f32.mrf.mxu0 }
 0x232   :  { %2685 = vst [vmem:[#allocation2 + $0xa28] sm:$0xff] %v1249_v6  ;;  %v1253_v3 = vadd.f32 %v1252_v8, %v6364_v12  ;;  %v2085_v1 = vpop.f32.mrf.mxu1 }
 0x233   :  { %2687 = vst [vmem:[#allocation2 + $0xa38] sm:$0xff] %v2082_v11  ;;  %v2086_v2 = vadd.f32 %v2085_v1, %v6370_v10  ;;  %v1254_v20 = vpop.f32.mrf.mxu0 }
 0x234   :  { %2688 = vst [vmem:[#allocation2 + $0xa40] sm:$0xff] %v1253_v3  ;;  %v1255_v17 = vadd.f32 %v1254_v20, %v6372_v16  ;;  %v2087_v4 = vpop.f32.mrf.mxu1 }
 0x235   :  { %2690 = vst [vmem:[#allocation2 + $0xa50] sm:$0xff] %v2086_v2  ;;  %v2088_v7 = vadd.f32 %v2087_v4, %v6375_v13  ;;  %v1258_v9 = vpop.f32.mrf.mxu0 }
 0x236   :  { %2689 = vst [vmem:[#allocation2 + $0xa48] sm:$0xff] %v1255_v17  ;;  %v1259_v15 = vadd.f32 %v1258_v9, %v6364_v12  ;;  %v2091_v14 = vpop.f32.mrf.mxu1 }
 0x237   :  { %2691 = vst [vmem:[#allocation2 + $0xa58] sm:$0xff] %v2088_v7  ;;  %v2092_v6 = vadd.f32 %v2091_v14, %v6370_v10  ;;  %v1260_v8 = vpop.f32.mrf.mxu0 }
 0x238   :  { %2692 = vst [vmem:[#allocation2 + $0xa60] sm:$0xff] %v1259_v15  ;;  %v1261_v11 = vadd.f32 %v1260_v8, %v6372_v16  ;;  %v2093_v1 = vpop.f32.mrf.mxu1 }
 0x239   :  { %2694 = vst [vmem:[#allocation2 + $0xa70] sm:$0xff] %v2092_v6  ;;  %v2094_v3 = vadd.f32 %v2093_v1, %v6375_v13  ;;  %v1264_v20 = vpop.f32.mrf.mxu0 }
 0x23a   :  { %2693 = vst [vmem:[#allocation2 + $0xa68] sm:$0xff] %v1261_v11  ;;  %v1265_v2 = vadd.f32 %v1264_v20, %v6364_v12  ;;  %v2097_v4 = vpop.f32.mrf.mxu1 }
 0x23b   :  { %2695 = vst [vmem:[#allocation2 + $0xa78] sm:$0xff] %v2094_v3  ;;  %v2098_v17 = vadd.f32 %v2097_v4, %v6370_v10  ;;  %v1266_v9 = vpop.f32.mrf.mxu0 }
 0x23c   :  { %2696 = vst [vmem:[#allocation2 + $0xa80] sm:$0xff] %v1265_v2  ;;  %v1267_v7 = vadd.f32 %v1266_v9, %v6372_v16  ;;  %v2099_v14 = vpop.f32.mrf.mxu1 }
 0x23d   :  { %2698 = vst [vmem:[#allocation2 + $0xa90] sm:$0xff] %v2098_v17  ;;  %v2100_v15 = vadd.f32 %v2099_v14, %v6375_v13  ;;  %v1270_v8 = vpop.f32.mrf.mxu0 }
 0x23e   :  { %2697 = vst [vmem:[#allocation2 + $0xa88] sm:$0xff] %v1267_v7  ;;  %v1271_v6 = vadd.f32 %v1270_v8, %v6364_v12  ;;  %v2103_v1 = vpop.f32.mrf.mxu1 }
 0x23f   :  { %2699 = vst [vmem:[#allocation2 + $0xa98] sm:$0xff] %v2100_v15  ;;  %v2104_v11 = vadd.f32 %v2103_v1, %v6370_v10  ;;  %v1272_v20 = vpop.f32.mrf.mxu0 }
 0x240   :  { %2700 = vst [vmem:[#allocation2 + $0xaa0] sm:$0xff] %v1271_v6  ;;  %v1273_v3 = vadd.f32 %v1272_v20, %v6372_v16  ;;  %v2105_v4 = vpop.f32.mrf.mxu1 }
 0x241   :  { %2702 = vst [vmem:[#allocation2 + $0xab0] sm:$0xff] %v2104_v11  ;;  %v2106_v2 = vadd.f32 %v2105_v4, %v6375_v13  ;;  %v1276_v9 = vpop.f32.mrf.mxu0 }
 0x242   :  { %2701 = vst [vmem:[#allocation2 + $0xaa8] sm:$0xff] %v1273_v3  ;;  %v1277_v17 = vadd.f32 %v1276_v9, %v6364_v12  ;;  %v2109_v14 = vpop.f32.mrf.mxu1 }
 0x243   :  { %2703 = vst [vmem:[#allocation2 + $0xab8] sm:$0xff] %v2106_v2  ;;  %v2110_v7 = vadd.f32 %v2109_v14, %v6370_v10  ;;  %v1278_v8 = vpop.f32.mrf.mxu0 }
 0x244   :  { %2704 = vst [vmem:[#allocation2 + $0xac0] sm:$0xff] %v1277_v17  ;;  %v1279_v15 = vadd.f32 %v1278_v8, %v6372_v16  ;;  %v2111_v1 = vpop.f32.mrf.mxu1 }
 0x245   :  { %2706 = vst [vmem:[#allocation2 + $0xad0] sm:$0xff] %v2110_v7  ;;  %v2112_v6 = vadd.f32 %v2111_v1, %v6375_v13  ;;  %v1282_v20 = vpop.f32.mrf.mxu0 }
 0x246   :  { %2705 = vst [vmem:[#allocation2 + $0xac8] sm:$0xff] %v1279_v15  ;;  %v1283_v11 = vadd.f32 %v1282_v20, %v6364_v12  ;;  %v2115_v4 = vpop.f32.mrf.mxu1 }
 0x247   :  { %2707 = vst [vmem:[#allocation2 + $0xad8] sm:$0xff] %v2112_v6  ;;  %v2116_v3 = vadd.f32 %v2115_v4, %v6370_v10  ;;  %v1284_v9 = vpop.f32.mrf.mxu0 }
 0x248   :  { %2708 = vst [vmem:[#allocation2 + $0xae0] sm:$0xff] %v1283_v11  ;;  %v1285_v2 = vadd.f32 %v1284_v9, %v6372_v16  ;;  %v2117_v14 = vpop.f32.mrf.mxu1 }
 0x249   :  { %2710 = vst [vmem:[#allocation2 + $0xaf0] sm:$0xff] %v2116_v3  ;;  %v2118_v17 = vadd.f32 %v2117_v14, %v6375_v13  ;;  %v1288_v8 = vpop.f32.mrf.mxu0 }
 0x24a   :  { %2709 = vst [vmem:[#allocation2 + $0xae8] sm:$0xff] %v1285_v2  ;;  %v1289_v7 = vadd.f32 %v1288_v8, %v6364_v12  ;;  %v2121_v1 = vpop.f32.mrf.mxu1 }
 0x24b   :  { %2711 = vst [vmem:[#allocation2 + $0xaf8] sm:$0xff] %v2118_v17  ;;  %v2122_v15 = vadd.f32 %v2121_v1, %v6370_v10  ;;  %v1290_v20 = vpop.f32.mrf.mxu0 }
 0x24c   :  { %2712 = vst [vmem:[#allocation2 + $0xb00] sm:$0xff] %v1289_v7  ;;  %v1291_v6 = vadd.f32 %v1290_v20, %v6372_v16  ;;  %v2123_v4 = vpop.f32.mrf.mxu1 }
 0x24d   :  { %2714 = vst [vmem:[#allocation2 + $0xb10] sm:$0xff] %v2122_v15  ;;  %v2124_v11 = vadd.f32 %v2123_v4, %v6375_v13  ;;  %v1294_v9 = vpop.f32.mrf.mxu0 }
 0x24e   :  { %2713 = vst [vmem:[#allocation2 + $0xb08] sm:$0xff] %v1291_v6  ;;  %v1295_v3 = vadd.f32 %v1294_v9, %v6364_v12  ;;  %v2127_v14 = vpop.f32.mrf.mxu1 }
 0x24f   :  { %2715 = vst [vmem:[#allocation2 + $0xb18] sm:$0xff] %v2124_v11  ;;  %v2128_v2 = vadd.f32 %v2127_v14, %v6370_v10  ;;  %v1296_v8 = vpop.f32.mrf.mxu0 }
 0x250   :  { %2716 = vst [vmem:[#allocation2 + $0xb20] sm:$0xff] %v1295_v3  ;;  %v1297_v17 = vadd.f32 %v1296_v8, %v6372_v16  ;;  %v2129_v1 = vpop.f32.mrf.mxu1 }
 0x251   :  { %2718 = vst [vmem:[#allocation2 + $0xb30] sm:$0xff] %v2128_v2  ;;  %v2130_v7 = vadd.f32 %v2129_v1, %v6375_v13  ;;  %v1300_v20 = vpop.f32.mrf.mxu0 }
 0x252   :  { %2717 = vst [vmem:[#allocation2 + $0xb28] sm:$0xff] %v1297_v17  ;;  %v1301_v15 = vadd.f32 %v1300_v20, %v6364_v12  ;;  %v2133_v4 = vpop.f32.mrf.mxu1 }
 0x253   :  { %2719 = vst [vmem:[#allocation2 + $0xb38] sm:$0xff] %v2130_v7  ;;  %v2134_v6 = vadd.f32 %v2133_v4, %v6370_v10  ;;  %v1302_v9 = vpop.f32.mrf.mxu0 }
 0x254   :  { %2720 = vst [vmem:[#allocation2 + $0xb40] sm:$0xff] %v1301_v15  ;;  %v1303_v11 = vadd.f32 %v1302_v9, %v6372_v16  ;;  %v2135_v14 = vpop.f32.mrf.mxu1 }
 0x255   :  { %2722 = vst [vmem:[#allocation2 + $0xb50] sm:$0xff] %v2134_v6  ;;  %v2136_v3 = vadd.f32 %v2135_v14, %v6375_v13  ;;  %v1306_v8 = vpop.f32.mrf.mxu0 }
 0x256   :  { %2721 = vst [vmem:[#allocation2 + $0xb48] sm:$0xff] %v1303_v11  ;;  %v1307_v2 = vadd.f32 %v1306_v8, %v6364_v12  ;;  %v2139_v1 = vpop.f32.mrf.mxu1 }
 0x257   :  { %2723 = vst [vmem:[#allocation2 + $0xb58] sm:$0xff] %v2136_v3  ;;  %v2140_v17 = vadd.f32 %v2139_v1, %v6370_v10  ;;  %v1308_v20 = vpop.f32.mrf.mxu0 }
 0x258   :  { %2724 = vst [vmem:[#allocation2 + $0xb60] sm:$0xff] %v1307_v2  ;;  %v1309_v7 = vadd.f32 %v1308_v20, %v6372_v16  ;;  %v2141_v4 = vpop.f32.mrf.mxu1 }
 0x259   :  { %2726 = vst [vmem:[#allocation2 + $0xb70] sm:$0xff] %v2140_v17  ;;  %v2142_v15 = vadd.f32 %v2141_v4, %v6375_v13  ;;  %v1312_v9 = vpop.f32.mrf.mxu0 }
 0x25a   :  { %2725 = vst [vmem:[#allocation2 + $0xb68] sm:$0xff] %v1309_v7  ;;  %v1313_v6 = vadd.f32 %v1312_v9, %v6364_v12  ;;  %v2145_v14 = vpop.f32.mrf.mxu1 }
 0x25b   :  { %2727 = vst [vmem:[#allocation2 + $0xb78] sm:$0xff] %v2142_v15  ;;  %v2146_v11 = vadd.f32 %v2145_v14, %v6370_v10  ;;  %v1314_v8 = vpop.f32.mrf.mxu0 }
 0x25c   :  { %2728 = vst [vmem:[#allocation2 + $0xb80] sm:$0xff] %v1313_v6  ;;  %v1315_v3 = vadd.f32 %v1314_v8, %v6372_v16  ;;  %v2147_v1 = vpop.f32.mrf.mxu1 }
 0x25d   :  { %2730 = vst [vmem:[#allocation2 + $0xb90] sm:$0xff] %v2146_v11  ;;  %v2148_v2 = vadd.f32 %v2147_v1, %v6375_v13  ;;  %v1318_v20 = vpop.f32.mrf.mxu0 }
 0x25e   :  { %2729 = vst [vmem:[#allocation2 + $0xb88] sm:$0xff] %v1315_v3  ;;  %v1319_v17 = vadd.f32 %v1318_v20, %v6364_v12  ;;  %v2151_v4 = vpop.f32.mrf.mxu1 }
 0x25f   :  { %2731 = vst [vmem:[#allocation2 + $0xb98] sm:$0xff] %v2148_v2  ;;  %v2152_v7 = vadd.f32 %v2151_v4, %v6370_v10  ;;  %v1320_v9 = vpop.f32.mrf.mxu0 }
 0x260   :  { %2732 = vst [vmem:[#allocation2 + $0xba0] sm:$0xff] %v1319_v17  ;;  %v1321_v15 = vadd.f32 %v1320_v9, %v6372_v16  ;;  %v2153_v14 = vpop.f32.mrf.mxu1 }
 0x261   :  { %2734 = vst [vmem:[#allocation2 + $0xbb0] sm:$0xff] %v2152_v7  ;;  %v2154_v6 = vadd.f32 %v2153_v14, %v6375_v13  ;;  %v1324_v8 = vpop.f32.mrf.mxu0 }
 0x262   :  { %2733 = vst [vmem:[#allocation2 + $0xba8] sm:$0xff] %v1321_v15  ;;  %v1325_v11 = vadd.f32 %v1324_v8, %v6364_v12  ;;  %v2157_v1 = vpop.f32.mrf.mxu1 }
 0x263   :  { %2735 = vst [vmem:[#allocation2 + $0xbb8] sm:$0xff] %v2154_v6  ;;  %v2158_v3 = vadd.f32 %v2157_v1, %v6370_v10  ;;  %v1326_v20 = vpop.f32.mrf.mxu0 }
 0x264   :  { %2736 = vst [vmem:[#allocation2 + $0xbc0] sm:$0xff] %v1325_v11  ;;  %v1327_v2 = vadd.f32 %v1326_v20, %v6372_v16  ;;  %v2159_v4 = vpop.f32.mrf.mxu1 }
 0x265   :  { %2738 = vst [vmem:[#allocation2 + $0xbd0] sm:$0xff] %v2158_v3  ;;  %v2160_v17 = vadd.f32 %v2159_v4, %v6375_v13  ;;  %v1330_v9 = vpop.f32.mrf.mxu0 }
 0x266   :  { %2737 = vst [vmem:[#allocation2 + $0xbc8] sm:$0xff] %v1327_v2  ;;  %v1331_v7 = vadd.f32 %v1330_v9, %v6364_v12  ;;  %v2163_v14 = vpop.f32.mrf.mxu1 }
 0x267   :  { %2739 = vst [vmem:[#allocation2 + $0xbd8] sm:$0xff] %v2160_v17  ;;  %v2164_v15 = vadd.f32 %v2163_v14, %v6370_v10  ;;  %v1332_v8 = vpop.f32.mrf.mxu0  ;;  %v7326_v17 = vld [vmem:[%s8517_s1] sm:$0xff]  ;;  %v7336_v14 = vld [vmem:[%s8517_s1 + $0x10] sm:$0xff] }
 0x268   :  { %2740 = vst [vmem:[#allocation2 + $0xbe0] sm:$0xff] %v1331_v7  ;;  %v1333_v6 = vadd.f32 %v1332_v8, %v6372_v16  ;;  %v2165_v1 = vpop.f32.mrf.mxu1  ;;  %8609 = vst [vmem:[#allocation73_spill] sm:$0xff] %v7326_v17  ;;  %v7331_v7 = vld [vmem:[%s8517_s1 + $0x8] sm:$0xff] }
 0x269   :  { %2742 = vst [vmem:[#allocation2 + $0xbf0] sm:$0xff] %v2164_v15  ;;  %v2166_v11 = vadd.f32 %v2165_v1, %v6375_v13  ;;  %v1336_v20 = vpop.f32.mrf.mxu0  ;;  %8610 = vst [vmem:[#allocation74_spill] sm:$0xff] %v7331_v7  ;;  %v7347_v1 = vld [vmem:[%s8517_s1 + $0x20] sm:$0xff] }
 0x26a   :  { %2741 = vst [vmem:[#allocation2 + $0xbe8] sm:$0xff] %v1333_v6  ;;  %v1337_v3 = vadd.f32 %v1336_v20, %v6364_v12  ;;  %v2169_v4 = vpop.f32.mrf.mxu1  ;;  %8611 = vst [vmem:[#allocation75_spill] sm:$0xff] %v7336_v14  ;;  %v7342_v6 = vld [vmem:[%s8517_s1 + $0x18] sm:$0xff] }
 0x26b   :  { %2743 = vst [vmem:[#allocation2 + $0xbf8] sm:$0xff] %v2166_v11  ;;  %v2170_v2 = vadd.f32 %v2169_v4, %v6370_v10  ;;  %v1338_v9 = vpop.f32.mrf.mxu0  ;;  %8612 = vst [vmem:[#allocation76_spill] sm:$0xff] %v7342_v6  ;;  %v7352_v11 = vld [vmem:[%s8517_s1 + $0x28] sm:$0xff]  ;;  %v7358_v4 = vld [vmem:[%s8517_s1 + $0x30] sm:$0xff] }
 0x26c   :  { %2744 = vst [vmem:[#allocation2 + $0xc00] sm:$0xff] %v1337_v3  ;;  %v1339_v15 = vadd.f32 %v1338_v9, %v6372_v16  ;;  %v2171_v8 = vpop.f32.mrf.mxu1  ;;  %8613 = vst [vmem:[#allocation77_spill] sm:$0xff] %v7347_v1  ;;  %v7363_v9 = vld [vmem:[%s8517_s1 + $0x38] sm:$0xff]  ;;  %v7368_v1 = vld [vmem:[%s8517_s1 + $0x40] sm:$0xff] }
 0x26d   :  { %8614 = vst [vmem:[#allocation78_spill] sm:$0xff] %v7352_v11  ;;  %2746 = vst [vmem:[#allocation2 + $0xc10] sm:$0xff] %v2170_v2  ;;  %v2172_v20 = vadd.f32 %v2171_v8, %v6375_v13  ;;  %v1342_v3 = vpop.f32.mrf.mxu0  ;;  %v7374_v11 = vld [vmem:[%s8517_s1 + $0x48] sm:$0xff] }
 0x26e   :  { %8615 = vst [vmem:[#allocation79_spill] sm:$0xff] %v7358_v4  ;;  %8616 = vst [vmem:[#allocation80_spill] sm:$0xff] %v7363_v9  ;;  %v1343_v2 = vadd.f32 %v1342_v3, %v6364_v12  ;;  %v2175_v8 = vpop.f32.mrf.mxu1  ;;  %v7379_v4 = vld [vmem:[%s8517_s1 + $0x50] sm:$0xff]  ;;  %v7384_v9 = vld [vmem:[%s8517_s1 + $0x58] sm:$0xff] }
 0x26f   :  { %8617 = vst [vmem:[#allocation81_spill] sm:$0xff] %v7368_v1  ;;  %2745 = vst [vmem:[#allocation2 + $0xc08] sm:$0xff] %v1339_v15  ;;  %v2176_v15 = vadd.f32 %v2175_v8, %v6370_v10  ;;  %v1344_v3 = vpop.f32.mrf.mxu0  ;;  %v7390_v1 = vld [vmem:[%s8517_s1 + $0x60] sm:$0xff] }
 0x270   :  { %8618 = vst [vmem:[#allocation82_spill] sm:$0xff] %v7374_v11  ;;  %8619 = vst [vmem:[#allocation83_spill] sm:$0xff] %v7379_v4  ;;  %v7395_v11 = vld [vmem:[%s8517_s1 + $0x68] sm:$0xff]  ;;  %v7400_v4 = vld [vmem:[%s8517_s1 + $0x70] sm:$0xff]  ;;  %v2177_v8 = vpop.f32.mrf.mxu1 }
 0x271   :  { %8620 = vst [vmem:[#allocation84_spill] sm:$0xff] %v7384_v9  ;;  %2747 = vst [vmem:[#allocation2 + $0xc18] sm:$0xff] %v2172_v20  ;;  %v1345_v20 = vadd.f32 %v1344_v3, %v6372_v16  ;;  %v7406_v9 = vld [vmem:[%s8517_s1 + $0x78] sm:$0xff]  ;;  %v1348_v6 = vpop.f32.mrf.mxu0  ;;  %s7625_s1 = smov 0  }
 0x272   :  { %8621 = vst [vmem:[#allocation85_spill] sm:$0xff] %v7390_v1  ;;  %8622 = vst [vmem:[#allocation86_spill] sm:$0xff] %v7395_v11  ;;  %v2178_v1 = vadd.f32 %v2177_v8, %v6375_v13  ;;  %v1349_v11 = vadd.f32 %v1348_v6, %v6364_v12  ;;  %v2181_v7 = vpop.f32.mrf.mxu1 }
 0x273   :  { %8623 = vst [vmem:[#allocation87_spill] sm:$0xff] %v7400_v4  ;;  %2748 = vst [vmem:[#allocation2 + $0xc20] sm:$0xff] %v1343_v2  ;;  %v2182_v4 = vadd.f32 %v2181_v7, %v6370_v10  ;;  %v1350_v2 = vpop.f32.mrf.mxu0 }
 0x274   :  { %8624 = vst [vmem:[#allocation88_spill] sm:$0xff] %v7406_v9  ;;  %2750 = vst [vmem:[#allocation2 + $0xc30] sm:$0xff] %v2176_v15  ;;  %v1351_v3 = vadd.f32 %v1350_v2, %v6372_v16  ;;  %v2183_v14 = vpop.f32.mrf.mxu1 }
 0x275   :  { %2749 = vst [vmem:[#allocation2 + $0xc28] sm:$0xff] %v1345_v20  ;;  %2751 = vst [vmem:[#allocation2 + $0xc38] sm:$0xff] %v2178_v1  ;;  %v2184_v17 = vadd.f32 %v2183_v14, %v6375_v13  ;;  %v1354_v9 = vpop.f32.mrf.mxu0 }
 0x276   :  { %2752 = vst [vmem:[#allocation2 + $0xc40] sm:$0xff] %v1349_v11  ;;  %2754 = vst [vmem:[#allocation2 + $0xc50] sm:$0xff] %v2182_v4  ;;  %v1355_v15 = vadd.f32 %v1354_v9, %v6364_v12  ;;  %v2187_v8 = vpop.f32.mrf.mxu1 }
 0x277   :  { %2753 = vst [vmem:[#allocation2 + $0xc48] sm:$0xff] %v1351_v3  ;;  %2755 = vst [vmem:[#allocation2 + $0xc58] sm:$0xff] %v2184_v17  ;;  %v2188_v6 = vadd.f32 %v2187_v8, %v6370_v10  ;;  %v1356_v20 = vpop.f32.mrf.mxu0 }
 0x278   :  { %2756 = vst [vmem:[#allocation2 + $0xc60] sm:$0xff] %v1355_v15  ;;  %v1357_v7 = vadd.f32 %v1356_v20, %v6372_v16  ;;  %v2189_v1 = vpop.f32.mrf.mxu1 }
 0x279   :  { %2758 = vst [vmem:[#allocation2 + $0xc70] sm:$0xff] %v2188_v6  ;;  %v2190_v11 = vadd.f32 %v2189_v1, %v6375_v13  ;;  %v1360_v2 = vpop.f32.mrf.mxu0 }
 0x27a   :  { %2757 = vst [vmem:[#allocation2 + $0xc68] sm:$0xff] %v1357_v7  ;;  %v1361_v14 = vadd.f32 %v1360_v2, %v6364_v12  ;;  %v2193_v4 = vpop.f32.mrf.mxu1 }
 0x27b   :  { %2759 = vst [vmem:[#allocation2 + $0xc78] sm:$0xff] %v2190_v11  ;;  %v2194_v9 = vadd.f32 %v2193_v4, %v6370_v10  ;;  %v1362_v3 = vpop.f32.mrf.mxu0 }
 0x27c   :  { %2760 = vst [vmem:[#allocation2 + $0xc80] sm:$0xff] %v1361_v14  ;;  %v1363_v17 = vadd.f32 %v1362_v3, %v6372_v16  ;;  %v2195_v8 = vpop.f32.mrf.mxu1 }
 0x27d   :  { %2762 = vst [vmem:[#allocation2 + $0xc90] sm:$0xff] %v2194_v9  ;;  %v2196_v15 = vadd.f32 %v2195_v8, %v6375_v13  ;;  %v1366_v20 = vpop.f32.mrf.mxu0 }
 0x27e   :  { %2761 = vst [vmem:[#allocation2 + $0xc88] sm:$0xff] %v1363_v17  ;;  %v1367_v6 = vadd.f32 %v1366_v20, %v6364_v12  ;;  %v2199_v1 = vpop.f32.mrf.mxu1 }
 0x27f   :  { %2763 = vst [vmem:[#allocation2 + $0xc98] sm:$0xff] %v2196_v15  ;;  %v2200_v7 = vadd.f32 %v2199_v1, %v6370_v10  ;;  %v1368_v2 = vpop.f32.mrf.mxu0 }
 0x280   :  { %2764 = vst [vmem:[#allocation2 + $0xca0] sm:$0xff] %v1367_v6  ;;  %v1369_v11 = vadd.f32 %v1368_v2, %v6372_v16  ;;  %v2201_v4 = vpop.f32.mrf.mxu1 }
 0x281   :  { %2766 = vst [vmem:[#allocation2 + $0xcb0] sm:$0xff] %v2200_v7  ;;  %v2202_v14 = vadd.f32 %v2201_v4, %v6375_v13  ;;  %v1372_v3 = vpop.f32.mrf.mxu0 }
 0x282   :  { %2765 = vst [vmem:[#allocation2 + $0xca8] sm:$0xff] %v1369_v11  ;;  %v1373_v9 = vadd.f32 %v1372_v3, %v6364_v12  ;;  %v2205_v8 = vpop.f32.mrf.mxu1 }
 0x283   :  { %2767 = vst [vmem:[#allocation2 + $0xcb8] sm:$0xff] %v2202_v14  ;;  %v2206_v17 = vadd.f32 %v2205_v8, %v6370_v10  ;;  %v1374_v20 = vpop.f32.mrf.mxu0 }
 0x284   :  { %2768 = vst [vmem:[#allocation2 + $0xcc0] sm:$0xff] %v1373_v9  ;;  %v1375_v15 = vadd.f32 %v1374_v20, %v6372_v16  ;;  %v2207_v1 = vpop.f32.mrf.mxu1 }
 0x285   :  { %2770 = vst [vmem:[#allocation2 + $0xcd0] sm:$0xff] %v2206_v17  ;;  %v2208_v6 = vadd.f32 %v2207_v1, %v6375_v13  ;;  %v1378_v2 = vpop.f32.mrf.mxu0 }
 0x286   :  { %2769 = vst [vmem:[#allocation2 + $0xcc8] sm:$0xff] %v1375_v15  ;;  %v1379_v7 = vadd.f32 %v1378_v2, %v6364_v12  ;;  %v2211_v4 = vpop.f32.mrf.mxu1 }
 0x287   :  { %2771 = vst [vmem:[#allocation2 + $0xcd8] sm:$0xff] %v2208_v6  ;;  %v2212_v11 = vadd.f32 %v2211_v4, %v6370_v10  ;;  %v1380_v3 = vpop.f32.mrf.mxu0 }
 0x288   :  { %2772 = vst [vmem:[#allocation2 + $0xce0] sm:$0xff] %v1379_v7  ;;  %v1381_v14 = vadd.f32 %v1380_v3, %v6372_v16  ;;  %v2213_v8 = vpop.f32.mrf.mxu1 }
 0x289   :  { %2774 = vst [vmem:[#allocation2 + $0xcf0] sm:$0xff] %v2212_v11  ;;  %v2214_v9 = vadd.f32 %v2213_v8, %v6375_v13  ;;  %v1384_v20 = vpop.f32.mrf.mxu0 }
 0x28a   :  { %2773 = vst [vmem:[#allocation2 + $0xce8] sm:$0xff] %v1381_v14  ;;  %v1385_v17 = vadd.f32 %v1384_v20, %v6364_v12  ;;  %v2217_v1 = vpop.f32.mrf.mxu1 }
 0x28b   :  { %2775 = vst [vmem:[#allocation2 + $0xcf8] sm:$0xff] %v2214_v9  ;;  %v2218_v15 = vadd.f32 %v2217_v1, %v6370_v10  ;;  %v1386_v2 = vpop.f32.mrf.mxu0 }
 0x28c   :  { %2776 = vst [vmem:[#allocation2 + $0xd00] sm:$0xff] %v1385_v17  ;;  %v1387_v6 = vadd.f32 %v1386_v2, %v6372_v16  ;;  %v2219_v4 = vpop.f32.mrf.mxu1 }
 0x28d   :  { %2778 = vst [vmem:[#allocation2 + $0xd10] sm:$0xff] %v2218_v15  ;;  %v2220_v7 = vadd.f32 %v2219_v4, %v6375_v13  ;;  %v1390_v3 = vpop.f32.mrf.mxu0 }
 0x28e   :  { %2777 = vst [vmem:[#allocation2 + $0xd08] sm:$0xff] %v1387_v6  ;;  %v1391_v11 = vadd.f32 %v1390_v3, %v6364_v12  ;;  %v2223_v8 = vpop.f32.mrf.mxu1 }
 0x28f   :  { %2779 = vst [vmem:[#allocation2 + $0xd18] sm:$0xff] %v2220_v7  ;;  %v2224_v14 = vadd.f32 %v2223_v8, %v6370_v10  ;;  %v1392_v20 = vpop.f32.mrf.mxu0 }
 0x290   :  { %2780 = vst [vmem:[#allocation2 + $0xd20] sm:$0xff] %v1391_v11  ;;  %v1393_v9 = vadd.f32 %v1392_v20, %v6372_v16  ;;  %v2225_v1 = vpop.f32.mrf.mxu1 }
 0x291   :  { %2782 = vst [vmem:[#allocation2 + $0xd30] sm:$0xff] %v2224_v14  ;;  %v2226_v17 = vadd.f32 %v2225_v1, %v6375_v13  ;;  %v1396_v2 = vpop.f32.mrf.mxu0 }
 0x292   :  { %2781 = vst [vmem:[#allocation2 + $0xd28] sm:$0xff] %v1393_v9  ;;  %v1397_v15 = vadd.f32 %v1396_v2, %v6364_v12  ;;  %v2229_v4 = vpop.f32.mrf.mxu1 }
 0x293   :  { %2783 = vst [vmem:[#allocation2 + $0xd38] sm:$0xff] %v2226_v17  ;;  %v2230_v6 = vadd.f32 %v2229_v4, %v6370_v10  ;;  %v1398_v3 = vpop.f32.mrf.mxu0 }
 0x294   :  { %2784 = vst [vmem:[#allocation2 + $0xd40] sm:$0xff] %v1397_v15  ;;  %v1399_v7 = vadd.f32 %v1398_v3, %v6372_v16  ;;  %v2231_v8 = vpop.f32.mrf.mxu1 }
 0x295   :  { %2786 = vst [vmem:[#allocation2 + $0xd50] sm:$0xff] %v2230_v6  ;;  %v2232_v11 = vadd.f32 %v2231_v8, %v6375_v13  ;;  %v1402_v20 = vpop.f32.mrf.mxu0 }
 0x296   :  { %2785 = vst [vmem:[#allocation2 + $0xd48] sm:$0xff] %v1399_v7  ;;  %v1403_v14 = vadd.f32 %v1402_v20, %v6364_v12  ;;  %v2235_v1 = vpop.f32.mrf.mxu1 }
 0x297   :  { %2787 = vst [vmem:[#allocation2 + $0xd58] sm:$0xff] %v2232_v11  ;;  %v2236_v9 = vadd.f32 %v2235_v1, %v6370_v10  ;;  %v1404_v2 = vpop.f32.mrf.mxu0 }
 0x298   :  { %2788 = vst [vmem:[#allocation2 + $0xd60] sm:$0xff] %v1403_v14  ;;  %v1405_v17 = vadd.f32 %v1404_v2, %v6372_v16  ;;  %v2237_v4 = vpop.f32.mrf.mxu1 }
 0x299   :  { %2790 = vst [vmem:[#allocation2 + $0xd70] sm:$0xff] %v2236_v9  ;;  %v2238_v15 = vadd.f32 %v2237_v4, %v6375_v13  ;;  %v1408_v3 = vpop.f32.mrf.mxu0 }
 0x29a   :  { %2789 = vst [vmem:[#allocation2 + $0xd68] sm:$0xff] %v1405_v17  ;;  %v1409_v6 = vadd.f32 %v1408_v3, %v6364_v12  ;;  %v2241_v8 = vpop.f32.mrf.mxu1 }
 0x29b   :  { %2791 = vst [vmem:[#allocation2 + $0xd78] sm:$0xff] %v2238_v15  ;;  %v2242_v7 = vadd.f32 %v2241_v8, %v6370_v10  ;;  %v1410_v20 = vpop.f32.mrf.mxu0 }
 0x29c   :  { %2792 = vst [vmem:[#allocation2 + $0xd80] sm:$0xff] %v1409_v6  ;;  %v1411_v11 = vadd.f32 %v1410_v20, %v6372_v16  ;;  %v2243_v1 = vpop.f32.mrf.mxu1 }
 0x29d   :  { %2794 = vst [vmem:[#allocation2 + $0xd90] sm:$0xff] %v2242_v7  ;;  %v2244_v14 = vadd.f32 %v2243_v1, %v6375_v13  ;;  %v1414_v2 = vpop.f32.mrf.mxu0 }
 0x29e   :  { %2793 = vst [vmem:[#allocation2 + $0xd88] sm:$0xff] %v1411_v11  ;;  %v1415_v9 = vadd.f32 %v1414_v2, %v6364_v12  ;;  %v2247_v4 = vpop.f32.mrf.mxu1 }
 0x29f   :  { %2795 = vst [vmem:[#allocation2 + $0xd98] sm:$0xff] %v2244_v14  ;;  %v2248_v17 = vadd.f32 %v2247_v4, %v6370_v10  ;;  %v1416_v3 = vpop.f32.mrf.mxu0 }
 0x2a0   :  { %2796 = vst [vmem:[#allocation2 + $0xda0] sm:$0xff] %v1415_v9  ;;  %v1417_v15 = vadd.f32 %v1416_v3, %v6372_v16  ;;  %v2249_v8 = vpop.f32.mrf.mxu1 }
 0x2a1   :  { %2798 = vst [vmem:[#allocation2 + $0xdb0] sm:$0xff] %v2248_v17  ;;  %v2250_v6 = vadd.f32 %v2249_v8, %v6375_v13  ;;  %v1420_v20 = vpop.f32.mrf.mxu0 }
 0x2a2   :  { %2797 = vst [vmem:[#allocation2 + $0xda8] sm:$0xff] %v1417_v15  ;;  %v1421_v7 = vadd.f32 %v1420_v20, %v6364_v12  ;;  %v2253_v1 = vpop.f32.mrf.mxu1 }
 0x2a3   :  { %2799 = vst [vmem:[#allocation2 + $0xdb8] sm:$0xff] %v2250_v6  ;;  %v2254_v11 = vadd.f32 %v2253_v1, %v6370_v10  ;;  %v1422_v2 = vpop.f32.mrf.mxu0 }
 0x2a4   :  { %2800 = vst [vmem:[#allocation2 + $0xdc0] sm:$0xff] %v1421_v7  ;;  %v1423_v14 = vadd.f32 %v1422_v2, %v6372_v16  ;;  %v2255_v4 = vpop.f32.mrf.mxu1 }
 0x2a5   :  { %2802 = vst [vmem:[#allocation2 + $0xdd0] sm:$0xff] %v2254_v11  ;;  %v2256_v9 = vadd.f32 %v2255_v4, %v6375_v13  ;;  %v1426_v3 = vpop.f32.mrf.mxu0 }
 0x2a6   :  { %2801 = vst [vmem:[#allocation2 + $0xdc8] sm:$0xff] %v1423_v14  ;;  %v1427_v17 = vadd.f32 %v1426_v3, %v6364_v12  ;;  %v2259_v8 = vpop.f32.mrf.mxu1 }
 0x2a7   :  { %2803 = vst [vmem:[#allocation2 + $0xdd8] sm:$0xff] %v2256_v9  ;;  %v2260_v15 = vadd.f32 %v2259_v8, %v6370_v10  ;;  %v1428_v20 = vpop.f32.mrf.mxu0 }
 0x2a8   :  { %2804 = vst [vmem:[#allocation2 + $0xde0] sm:$0xff] %v1427_v17  ;;  %v1429_v6 = vadd.f32 %v1428_v20, %v6372_v16  ;;  %v2261_v1 = vpop.f32.mrf.mxu1 }
 0x2a9   :  { %2806 = vst [vmem:[#allocation2 + $0xdf0] sm:$0xff] %v2260_v15  ;;  %v2262_v7 = vadd.f32 %v2261_v1, %v6375_v13  ;;  %v1432_v2 = vpop.f32.mrf.mxu0 }
 0x2aa   :  { %2805 = vst [vmem:[#allocation2 + $0xde8] sm:$0xff] %v1429_v6  ;;  %v1433_v11 = vadd.f32 %v1432_v2, %v6364_v12  ;;  %v2265_v4 = vpop.f32.mrf.mxu1 }
 0x2ab   :  { %2807 = vst [vmem:[#allocation2 + $0xdf8] sm:$0xff] %v2262_v7  ;;  %v2266_v14 = vadd.f32 %v2265_v4, %v6370_v10  ;;  %v1434_v3 = vpop.f32.mrf.mxu0 }
 0x2ac   :  { %2808 = vst [vmem:[#allocation2 + $0xe00] sm:$0xff] %v1433_v11  ;;  %v1435_v9 = vadd.f32 %v1434_v3, %v6372_v16  ;;  %v2267_v8 = vpop.f32.mrf.mxu1 }
 0x2ad   :  { %2810 = vst [vmem:[#allocation2 + $0xe10] sm:$0xff] %v2266_v14  ;;  %v2268_v17 = vadd.f32 %v2267_v8, %v6375_v13  ;;  %v1438_v20 = vpop.f32.mrf.mxu0 }
 0x2ae   :  { %2809 = vst [vmem:[#allocation2 + $0xe08] sm:$0xff] %v1435_v9  ;;  %v1439_v15 = vadd.f32 %v1438_v20, %v6364_v12  ;;  %v2271_v1 = vpop.f32.mrf.mxu1 }
 0x2af   :  { %2811 = vst [vmem:[#allocation2 + $0xe18] sm:$0xff] %v2268_v17  ;;  %v2272_v6 = vadd.f32 %v2271_v1, %v6370_v10  ;;  %v1440_v2 = vpop.f32.mrf.mxu0 }
 0x2b0   :  { %2812 = vst [vmem:[#allocation2 + $0xe20] sm:$0xff] %v1439_v15  ;;  %v1441_v7 = vadd.f32 %v1440_v2, %v6372_v16  ;;  %v2273_v4 = vpop.f32.mrf.mxu1 }
 0x2b1   :  { %2814 = vst [vmem:[#allocation2 + $0xe30] sm:$0xff] %v2272_v6  ;;  %v2274_v11 = vadd.f32 %v2273_v4, %v6375_v13  ;;  %v1444_v3 = vpop.f32.mrf.mxu0 }
 0x2b2   :  { %2813 = vst [vmem:[#allocation2 + $0xe28] sm:$0xff] %v1441_v7  ;;  %v1445_v14 = vadd.f32 %v1444_v3, %v6364_v12  ;;  %v2277_v8 = vpop.f32.mrf.mxu1 }
 0x2b3   :  { %2815 = vst [vmem:[#allocation2 + $0xe38] sm:$0xff] %v2274_v11  ;;  %v2278_v9 = vadd.f32 %v2277_v8, %v6370_v10  ;;  %v1446_v20 = vpop.f32.mrf.mxu0 }
 0x2b4   :  { %2816 = vst [vmem:[#allocation2 + $0xe40] sm:$0xff] %v1445_v14  ;;  %v1447_v17 = vadd.f32 %v1446_v20, %v6372_v16  ;;  %v2279_v1 = vpop.f32.mrf.mxu1 }
 0x2b5   :  { %2818 = vst [vmem:[#allocation2 + $0xe50] sm:$0xff] %v2278_v9  ;;  %v2280_v15 = vadd.f32 %v2279_v1, %v6375_v13  ;;  %v1450_v2 = vpop.f32.mrf.mxu0 }
 0x2b6   :  { %2817 = vst [vmem:[#allocation2 + $0xe48] sm:$0xff] %v1447_v17  ;;  %v1451_v6 = vadd.f32 %v1450_v2, %v6364_v12  ;;  %v2283_v4 = vpop.f32.mrf.mxu1 }
 0x2b7   :  { %2819 = vst [vmem:[#allocation2 + $0xe58] sm:$0xff] %v2280_v15  ;;  %v2284_v7 = vadd.f32 %v2283_v4, %v6370_v10  ;;  %v1452_v3 = vpop.f32.mrf.mxu0 }
 0x2b8   :  { %2820 = vst [vmem:[#allocation2 + $0xe60] sm:$0xff] %v1451_v6  ;;  %v1453_v11 = vadd.f32 %v1452_v3, %v6372_v16  ;;  %v2285_v8 = vpop.f32.mrf.mxu1 }
 0x2b9   :  { %2822 = vst [vmem:[#allocation2 + $0xe70] sm:$0xff] %v2284_v7  ;;  %v2286_v14 = vadd.f32 %v2285_v8, %v6375_v13  ;;  %v1456_v20 = vpop.f32.mrf.mxu0 }
 0x2ba   :  { %2821 = vst [vmem:[#allocation2 + $0xe68] sm:$0xff] %v1453_v11  ;;  %v1457_v9 = vadd.f32 %v1456_v20, %v6364_v12  ;;  %v2289_v1 = vpop.f32.mrf.mxu1 }
 0x2bb   :  { %2823 = vst [vmem:[#allocation2 + $0xe78] sm:$0xff] %v2286_v14  ;;  %v2290_v17 = vadd.f32 %v2289_v1, %v6370_v10  ;;  %v1458_v2 = vpop.f32.mrf.mxu0 }
 0x2bc   :  { %2824 = vst [vmem:[#allocation2 + $0xe80] sm:$0xff] %v1457_v9  ;;  %v1459_v15 = vadd.f32 %v1458_v2, %v6372_v16  ;;  %v2291_v4 = vpop.f32.mrf.mxu1 }
 0x2bd   :  { %2826 = vst [vmem:[#allocation2 + $0xe90] sm:$0xff] %v2290_v17  ;;  %v2292_v6 = vadd.f32 %v2291_v4, %v6375_v13  ;;  %v1462_v3 = vpop.f32.mrf.mxu0 }
 0x2be   :  { %2825 = vst [vmem:[#allocation2 + $0xe88] sm:$0xff] %v1459_v15  ;;  %v1463_v7 = vadd.f32 %v1462_v3, %v6364_v12  ;;  %v2295_v8 = vpop.f32.mrf.mxu1 }
 0x2bf   :  { %2827 = vst [vmem:[#allocation2 + $0xe98] sm:$0xff] %v2292_v6  ;;  %v2296_v11 = vadd.f32 %v2295_v8, %v6370_v10  ;;  %v1464_v20 = vpop.f32.mrf.mxu0 }
 0x2c0   :  { %2828 = vst [vmem:[#allocation2 + $0xea0] sm:$0xff] %v1463_v7  ;;  %v1465_v14 = vadd.f32 %v1464_v20, %v6372_v16  ;;  %v2297_v1 = vpop.f32.mrf.mxu1 }
 0x2c1   :  { %2830 = vst [vmem:[#allocation2 + $0xeb0] sm:$0xff] %v2296_v11  ;;  %v2298_v9 = vadd.f32 %v2297_v1, %v6375_v13  ;;  %v1468_v2 = vpop.f32.mrf.mxu0 }
 0x2c2   :  { %2829 = vst [vmem:[#allocation2 + $0xea8] sm:$0xff] %v1465_v14  ;;  %v1469_v17 = vadd.f32 %v1468_v2, %v6364_v12  ;;  %v2301_v4 = vpop.f32.mrf.mxu1 }
 0x2c3   :  { %2831 = vst [vmem:[#allocation2 + $0xeb8] sm:$0xff] %v2298_v9  ;;  %v2302_v15 = vadd.f32 %v2301_v4, %v6370_v10  ;;  %v1470_v3 = vpop.f32.mrf.mxu0 }
 0x2c4   :  { %2832 = vst [vmem:[#allocation2 + $0xec0] sm:$0xff] %v1469_v17  ;;  %v1471_v6 = vadd.f32 %v1470_v3, %v6372_v16  ;;  %v2303_v8 = vpop.f32.mrf.mxu1 }
 0x2c5   :  { %2834 = vst [vmem:[#allocation2 + $0xed0] sm:$0xff] %v2302_v15  ;;  %v2304_v7 = vadd.f32 %v2303_v8, %v6375_v13  ;;  %v1474_v20 = vpop.f32.mrf.mxu0 }
 0x2c6   :  { %2833 = vst [vmem:[#allocation2 + $0xec8] sm:$0xff] %v1471_v6  ;;  %v1475_v11 = vadd.f32 %v1474_v20, %v6364_v12  ;;  %v2307_v1 = vpop.f32.mrf.mxu1 }
 0x2c7   :  { %2835 = vst [vmem:[#allocation2 + $0xed8] sm:$0xff] %v2304_v7  ;;  %v2308_v14 = vadd.f32 %v2307_v1, %v6370_v10  ;;  %v1476_v2 = vpop.f32.mrf.mxu0 }
 0x2c8   :  { %2836 = vst [vmem:[#allocation2 + $0xee0] sm:$0xff] %v1475_v11  ;;  %v1477_v9 = vadd.f32 %v1476_v2, %v6372_v16  ;;  %v2309_v4 = vpop.f32.mrf.mxu1 }
 0x2c9   :  { %2838 = vst [vmem:[#allocation2 + $0xef0] sm:$0xff] %v2308_v14  ;;  %v2310_v17 = vadd.f32 %v2309_v4, %v6375_v13  ;;  %v1480_v3 = vpop.f32.mrf.mxu0 }
 0x2ca   :  { %2837 = vst [vmem:[#allocation2 + $0xee8] sm:$0xff] %v1477_v9  ;;  %v1481_v15 = vadd.f32 %v1480_v3, %v6364_v12  ;;  %v2313_v8 = vpop.f32.mrf.mxu1 }
 0x2cb   :  { %2839 = vst [vmem:[#allocation2 + $0xef8] sm:$0xff] %v2310_v17  ;;  %v2314_v6 = vadd.f32 %v2313_v8, %v6370_v10  ;;  %v1482_v20 = vpop.f32.mrf.mxu0 }
 0x2cc   :  { %2840 = vst [vmem:[#allocation2 + $0xf00] sm:$0xff] %v1481_v15  ;;  %v1483_v7 = vadd.f32 %v1482_v20, %v6372_v16  ;;  %v2315_v1 = vpop.f32.mrf.mxu1 }
 0x2cd   :  { %2842 = vst [vmem:[#allocation2 + $0xf10] sm:$0xff] %v2314_v6  ;;  %v2316_v11 = vadd.f32 %v2315_v1, %v6375_v13  ;;  %v1486_v2 = vpop.f32.mrf.mxu0 }
 0x2ce   :  { %2841 = vst [vmem:[#allocation2 + $0xf08] sm:$0xff] %v1483_v7  ;;  %v1487_v14 = vadd.f32 %v1486_v2, %v6364_v12  ;;  %v2319_v4 = vpop.f32.mrf.mxu1 }
 0x2cf   :  { %2843 = vst [vmem:[#allocation2 + $0xf18] sm:$0xff] %v2316_v11  ;;  %v2320_v9 = vadd.f32 %v2319_v4, %v6370_v10  ;;  %v1488_v3 = vpop.f32.mrf.mxu0 }
 0x2d0   :  { %2844 = vst [vmem:[#allocation2 + $0xf20] sm:$0xff] %v1487_v14  ;;  %v1489_v17 = vadd.f32 %v1488_v3, %v6372_v16  ;;  %v2321_v8 = vpop.f32.mrf.mxu1 }
 0x2d1   :  { %2846 = vst [vmem:[#allocation2 + $0xf30] sm:$0xff] %v2320_v9  ;;  %v2322_v15 = vadd.f32 %v2321_v8, %v6375_v13  ;;  %v1492_v20 = vpop.f32.mrf.mxu0 }
 0x2d2   :  { %2845 = vst [vmem:[#allocation2 + $0xf28] sm:$0xff] %v1489_v17  ;;  %v1493_v6 = vadd.f32 %v1492_v20, %v6364_v12  ;;  %v2325_v1 = vpop.f32.mrf.mxu1 }
 0x2d3   :  { %2847 = vst [vmem:[#allocation2 + $0xf38] sm:$0xff] %v2322_v15  ;;  %v2326_v7 = vadd.f32 %v2325_v1, %v6370_v10  ;;  %v1494_v2 = vpop.f32.mrf.mxu0 }
 0x2d4   :  { %2848 = vst [vmem:[#allocation2 + $0xf40] sm:$0xff] %v1493_v6  ;;  %v1495_v11 = vadd.f32 %v1494_v2, %v6372_v16  ;;  %v2327_v4 = vpop.f32.mrf.mxu1 }
 0x2d5   :  { %2850 = vst [vmem:[#allocation2 + $0xf50] sm:$0xff] %v2326_v7  ;;  %v2328_v14 = vadd.f32 %v2327_v4, %v6375_v13  ;;  %v1498_v3 = vpop.f32.mrf.mxu0 }
 0x2d6   :  { %2849 = vst [vmem:[#allocation2 + $0xf48] sm:$0xff] %v1495_v11  ;;  %v1499_v9 = vadd.f32 %v1498_v3, %v6364_v12  ;;  %v2331_v8 = vpop.f32.mrf.mxu1 }
 0x2d7   :  { %2851 = vst [vmem:[#allocation2 + $0xf58] sm:$0xff] %v2328_v14  ;;  %v2332_v17 = vadd.f32 %v2331_v8, %v6370_v10  ;;  %v1500_v20 = vpop.f32.mrf.mxu0 }
 0x2d8   :  { %2852 = vst [vmem:[#allocation2 + $0xf60] sm:$0xff] %v1499_v9  ;;  %v1501_v15 = vadd.f32 %v1500_v20, %v6372_v16  ;;  %v2333_v1 = vpop.f32.mrf.mxu1 }
 0x2d9   :  { %2854 = vst [vmem:[#allocation2 + $0xf70] sm:$0xff] %v2332_v17  ;;  %v2334_v6 = vadd.f32 %v2333_v1, %v6375_v13  ;;  %v1504_v2 = vpop.f32.mrf.mxu0 }
 0x2da   :  { %2853 = vst [vmem:[#allocation2 + $0xf68] sm:$0xff] %v1501_v15  ;;  %v1505_v7 = vadd.f32 %v1504_v2, %v6364_v12  ;;  %v2337_v4 = vpop.f32.mrf.mxu1 }
 0x2db   :  { %2855 = vst [vmem:[#allocation2 + $0xf78] sm:$0xff] %v2334_v6  ;;  %v2338_v11 = vadd.f32 %v2337_v4, %v6370_v10  ;;  %v1506_v3 = vpop.f32.mrf.mxu0 }
 0x2dc   :  { %2856 = vst [vmem:[#allocation2 + $0xf80] sm:$0xff] %v1505_v7  ;;  %v1507_v14 = vadd.f32 %v1506_v3, %v6372_v16  ;;  %v2339_v8 = vpop.f32.mrf.mxu1 }
 0x2dd   :  { %2858 = vst [vmem:[#allocation2 + $0xf90] sm:$0xff] %v2338_v11  ;;  %v2340_v9 = vadd.f32 %v2339_v8, %v6375_v13  ;;  %v1510_v20 = vpop.f32.mrf.mxu0 }
 0x2de   :  { %2857 = vst [vmem:[#allocation2 + $0xf88] sm:$0xff] %v1507_v14  ;;  %v1511_v17 = vadd.f32 %v1510_v20, %v6364_v12  ;;  %v2343_v1 = vpop.f32.mrf.mxu1 }
 0x2df   :  { %2859 = vst [vmem:[#allocation2 + $0xf98] sm:$0xff] %v2340_v9  ;;  %v2344_v15 = vadd.f32 %v2343_v1, %v6370_v10  ;;  %v1512_v2 = vpop.f32.mrf.mxu0 }
 0x2e0   :  { %2860 = vst [vmem:[#allocation2 + $0xfa0] sm:$0xff] %v1511_v17  ;;  %v1513_v6 = vadd.f32 %v1512_v2, %v6372_v16  ;;  %v2345_v4 = vpop.f32.mrf.mxu1 }
 0x2e1   :  { %2862 = vst [vmem:[#allocation2 + $0xfb0] sm:$0xff] %v2344_v15  ;;  %v2346_v7 = vadd.f32 %v2345_v4, %v6375_v13  ;;  %v1516_v3 = vpop.f32.mrf.mxu0 }
 0x2e2   :  { %2861 = vst [vmem:[#allocation2 + $0xfa8] sm:$0xff] %v1513_v6  ;;  %v1517_v11 = vadd.f32 %v1516_v3, %v6364_v12  ;;  %v2349_v8 = vpop.f32.mrf.mxu1 }
 0x2e3   :  { %2863 = vst [vmem:[#allocation2 + $0xfb8] sm:$0xff] %v2346_v7  ;;  %v2350_v14 = vadd.f32 %v2349_v8, %v6370_v10  ;;  %v1518_v20 = vpop.f32.mrf.mxu0 }
 0x2e4   :  { %2864 = vst [vmem:[#allocation2 + $0xfc0] sm:$0xff] %v1517_v11  ;;  %v1519_v9 = vadd.f32 %v1518_v20, %v6372_v16  ;;  %v2351_v1 = vpop.f32.mrf.mxu1  ;;  %v7531_v20 = vmov 0.0  }
 0x2e5   :  { %2866 = vst [vmem:[#allocation2 + $0xfd0] sm:$0xff] %v2350_v14  ;;  %v2352_v17 = vadd.f32 %v2351_v1, %v6375_v13  ;;  %v1522_v2 = vpop.f32.mrf.mxu0  ;;  %v7529_v14 = vmov 0.0   ;;  %v7537_v1 = vmov 0.0  }
 0x2e6   :  { %2865 = vst [vmem:[#allocation2 + $0xfc8] sm:$0xff] %v1519_v9  ;;  %v1523_v15 = vadd.f32 %v1522_v2, %v6364_v12  ;;  %v2355_v4 = vpop.f32.mrf.mxu1  ;;  %v7533_v9 = vmov 0.0   ;;  %v7535_v12 = vmov 0.0   ;;  %v7545_v2 = vmov 0.0  }
 0x2e7   :  { %2867 = vst [vmem:[#allocation2 + $0xfd8] sm:$0xff] %v2352_v17  ;;  %v2356_v6 = vadd.f32 %v2355_v4, %v6370_v10  ;;  %v1524_v3 = vpop.f32.mrf.mxu0  ;;  %v7539_v10 = vmov 0.0   ;;  %v7541_v17 = vmov 0.0   ;;  %v7551_v4 = vmov 0.0  }
 0x2e8   :  { %2868 = vst [vmem:[#allocation2 + $0xfe0] sm:$0xff] %v1523_v15  ;;  %v1525_v7 = vadd.f32 %v1524_v3, %v6372_v16  ;;  %v2357_v8 = vpop.f32.mrf.mxu1  ;;  %v7543_v16 = vmov 0.0   ;;  %v7549_v15 = vmov 0.0   ;;  %v7555_v3 = vmov 0.0  }
 0x2e9   :  { %2870 = vst [vmem:[#allocation2 + $0xff0] sm:$0xff] %v2356_v6  ;;  %v2358_v11 = vadd.f32 %v2357_v8, %v6375_v13  ;;  %v7547_v13 = vmov 0.0   ;;  %v7553_v6 = vmov 0.0   ;;  %v7559_v8 = vmov 0.0  }
 0x2ea   :  { %2869 = vst [vmem:[#allocation2 + $0xfe8] sm:$0xff] %v1525_v7  ;;  %v7557_v7 = vmov 0.0  }
 0x2eb   :  { %2871 = vst [vmem:[#allocation2 + $0xff8] sm:$0xff] %v2358_v11  ;;  %v7561_v11 = vmov 0.0  }
 0x2ec LB: > { %8625 = vst [vmem:[#allocation89_spill] sm:$0xff] %v5415_v14  ;;  %8626 = vst [vmem:[#allocation90_spill] sm:$0xff] %v5419_v20  ;;  %v8630_v63 = vld [vmem:[#allocation70_spill] sm:$0xff]  ;;  %v8631_v5 = vld [vmem:[#allocation72_spill] sm:$0xff]  ;;  %s4507_s25 = sshll.u32 %s5607_s1, 7  ;;  %s2942_s29 = sadd.s32 1, %s5607_s1   ;;  %s5607_s1 = sphi %s7625_s1, %s8794_s1   ;;  %v5603_v47 = vphi %v7623_v47, %v8793_v47   ;;  %v5599_v49 = vphi %v7621_v49, %v8792_v49   ;;  %v5595_v46 = vphi %v7619_v46, %v8791_v46   ;;  %v5591_v48 = vphi %v7617_v48, %v8790_v48   ;;  %v5587_v43 = vphi %v7615_v43, %v8789_v43   ;;  %v5583_v45 = vphi %v7613_v45, %v8788_v45   ;;  %v5579_v42 = vphi %v7611_v42, %v8214_v42   ;;  %v5575_v44 = vphi %v7609_v44, %v8787_v44   ;;  %v5571_v39 = vphi %v7607_v39, %v8238_v39   ;;  %v5567_v41 = vphi %v7605_v41, %v8786_v41   ;;  %v5563_v38 = vphi %v7603_v38, %v8785_v38   ;;  %v5559_v40 = vphi %v7601_v40, %v8270_v40   ;;  %v5555_v35 = vphi %v7599_v35, %v8278_v35   ;;  %v5551_v37 = vphi %v7597_v37, %v3732_v37   ;;  %v5547_v34 = vphi %v7595_v34, %v3733_v34   ;;  %v5543_v36 = vphi %v7593_v36, %v3734_v36   ;;  %v5539_v31 = vphi %v7591_v31, %v8784_v31   ;;  %v5535_v33 = vphi %v7589_v33, %v8783_v33   ;;  %v5531_v30 = vphi %v7587_v30, %v8782_v30   ;;  %v5527_v32 = vphi %v7585_v32, %v8781_v32   ;;  %v5523_v27 = vphi %v7583_v27, %v8780_v27   ;;  %v5519_v29 = vphi %v7581_v29, %v8779_v29   ;;  %v5515_v26 = vphi %v7579_v26, %v8778_v26   ;;  %v5511_v28 = vphi %v7577_v28, %v8138_v28   ;;  %v5507_v23 = vphi %v7575_v23, %v8777_v23   ;;  %v5503_v25 = vphi %v7573_v25, %v8776_v25   ;;  %v5499_v22 = vphi %v7571_v22, %v8210_v22   ;;  %v5495_v24 = vphi %v7569_v24, %v8775_v24   ;;  %v5491_v19 = vphi %v7567_v19, %v8252_v19   ;;  %v5487_v21 = vphi %v7565_v21, %v8267_v21   ;;  %v5483_v18 = vphi %v7563_v18, %v3701_v18   ;;  %v5479_v11 = vphi %v7561_v11, %v3702_v11   ;;  %v5475_v8 = vphi %v7559_v8, %v8774_v8   ;;  %v5471_v7 = vphi %v7557_v7, %v8773_v7   ;;  %v5467_v3 = vphi %v7555_v3, %v8772_v3   ;;  %v5463_v6 = vphi %v7553_v6, %v8771_v6   ;;  %v5459_v4 = vphi %v7551_v4, %v8770_v4   ;;  %v5455_v15 = vphi %v7549_v15, %v8769_v15   ;;  %v5451_v13 = vphi %v7547_v13, %v8768_v13   ;;  %v5447_v2 = vphi %v7545_v2, %v8767_v2   ;;  %v5443_v16 = vphi %v7543_v16, %v8766_v16   ;;  %v5439_v17 = vphi %v7541_v17, %v8765_v17   ;;  %v5435_v10 = vphi %v7539_v10, %v8764_v10   ;;  %v5431_v1 = vphi %v7537_v1, %v8763_v1   ;;  %v5427_v12 = vphi %v7535_v12, %v8762_v12   ;;  %v5423_v9 = vphi %v7533_v9, %v8761_v9   ;;  %v5419_v20 = vphi %v7531_v20, %v8760_v20   ;;  %v5415_v14 = vphi %v7529_v14, %v8758_v14  }
 0x2ed   : > { %8627 = vst [vmem:[#allocation91_spill] sm:$0xff] %v5423_v9  ;;  %8628 = vst [vmem:[#allocation92_spill] sm:$0xff] %v5427_v12  ;;  %3061 = vmatprep.subr.mxu0 %v8630_v63  ;;  %3222 = vmatprep.subr.mxu1 %v8631_v5  ;;  %v8632_v62 = vld [vmem:[#allocation69_spill] sm:$0xff]  ;;  %v8633_v0 = vld [vmem:[#allocation71_spill] sm:$0xff]  ;;  %s2992_s26 = sshra.s32 %s4507_s25, 3  ;;  %p8296_p0 = scmp.ge.s32.totalorder %s2942_s29, 8  }
 0x2ee   : > { %8629 = vst [vmem:[#allocation93_spill] sm:$0xff] %v5479_v11  ;;  %3062 = vmatpush1.msra.mxu0 %v8632_v62  ;;  %3223 = vmatpush1.msra.mxu1 %v8633_v0  ;;  %v8634_v59 = vld [vmem:[#allocation66_spill] sm:$0xff]  ;;  %v8635_v61 = vld [vmem:[#allocation68_spill] sm:$0xff]  ;;  %v8636_v58 = vld [vmem:[#allocation65_spill] sm:$0xff]  ;;  %s4511_s27 = sshll.u32 %s2992_s26, 5 }
 0x2ef   : > { %3063 = vmatprep.subr.mxu0 %v8634_v59  ;;  %3224 = vmatprep.subr.mxu1 %v8635_v61  ;;  %v8637_v60 = vld [vmem:[#allocation67_spill] sm:$0xff]  ;;  %v8638_v55 = vld [vmem:[#allocation62_spill] sm:$0xff]  ;;  %v8639_v57 = vld [vmem:[#allocation64_spill] sm:$0xff]  ;;  %s7956_s28 = scalar_lea.vmem [#allocation2], %s4511_s27 }
 0x2f0   : > { %3064 = vmatpush1.msra.mxu0 %v8636_v58  ;;  %3225 = vmatpush1.msra.mxu1 %v8637_v60  ;;  %v8640_v54 = vld [vmem:[#allocation61_spill] sm:$0xff]  ;;  %v8641_v56 = vld [vmem:[#allocation63_spill] sm:$0xff]  ;;  %v8642_v51 = vld [vmem:[#allocation58_spill] sm:$0xff] }
 0x2f1   : > { %3065 = vmatprep.subr.mxu0 %v8638_v55  ;;  %3226 = vmatprep.subr.mxu1 %v8639_v57  ;;  %v8643_v53 = vld [vmem:[#allocation60_spill] sm:$0xff]  ;;  %v8644_v50 = vld [vmem:[#allocation57_spill] sm:$0xff]  ;;  %v8645_v52 = vld [vmem:[#allocation59_spill] sm:$0xff] }
 0x2f2   : > { %3066 = vmatpush1.msra.mxu0 %v8640_v54  ;;  %3227 = vmatpush1.msra.mxu1 %v8641_v56  ;;  %v8646_v0 = vld [vmem:[#allocation54_spill] sm:$0xff]  ;;  %v8647_v5 = vld [vmem:[#allocation56_spill] sm:$0xff]  ;;  %v8648_v58 = vld [vmem:[#allocation53_spill] sm:$0xff] }
 0x2f3   : > { %3067 = vmatprep.subr.mxu0 %v8642_v51  ;;  %3228 = vmatprep.subr.mxu1 %v8643_v53  ;;  %v8649_v55 = vld [vmem:[#allocation55_spill] sm:$0xff]  ;;  %v8650_v57 = vld [vmem:[#allocation50_spill] sm:$0xff]  ;;  %v8651_v54 = vld [vmem:[#allocation52_spill] sm:$0xff] }
 0x2f4   : > { %3068 = vmatpush1.msra.mxu0 %v8644_v50  ;;  %3229 = vmatpush1.msra.mxu1 %v8645_v52  ;;  %v8652_v56 = vld [vmem:[#allocation49_spill] sm:$0xff]  ;;  %v8653_v51 = vld [vmem:[#allocation51_spill] sm:$0xff]  ;;  %v8654_v53 = vld [vmem:[#allocation46_spill] sm:$0xff] }
 0x2f5   : > { %3069 = vmatprep.subr.mxu0 %v8646_v0  ;;  %3230 = vmatprep.subr.mxu1 %v8647_v5  ;;  %v8655_v50 = vld [vmem:[#allocation48_spill] sm:$0xff]  ;;  %v8656_v52 = vld [vmem:[#allocation45_spill] sm:$0xff]  ;;  %v8657_v0 = vld [vmem:[#allocation47_spill] sm:$0xff] }
 0x2f6   : > { %3070 = vmatpush1.msra.mxu0 %v8648_v58  ;;  %3231 = vmatpush1.msra.mxu1 %v8649_v55  ;;  %v8658_v5 = vld [vmem:[#allocation42_spill] sm:$0xff]  ;;  %v8659_v58 = vld [vmem:[#allocation44_spill] sm:$0xff]  ;;  %v8660_v55 = vld [vmem:[#allocation41_spill] sm:$0xff] }
 0x2f7   : > { %3071 = vmatprep.subr.mxu0 %v8650_v57  ;;  %3232 = vmatprep.subr.mxu1 %v8651_v54  ;;  %v8661_v57 = vld [vmem:[#allocation43_spill] sm:$0xff]  ;;  %v8662_v54 = vld [vmem:[#allocation38_spill] sm:$0xff] }
 0x2f8   : > { %3072 = vmatpush1.msra.mxu0 %v8652_v56  ;;  %3233 = vmatpush1.msra.mxu1 %v8653_v51  ;;  %v8663_v56 = vld [vmem:[#allocation40_spill] sm:$0xff]  ;;  %v8664_v51 = vld [vmem:[#allocation37_spill] sm:$0xff]  ;;  %v3022_v60 = vld [vmem:[%s7956_s28 + $0xc8] sm:$0xff] }
 0x2f9   : > { %3073 = vmatprep.subr.mxu0 %v8654_v53  ;;  %3234 = vmatprep.subr.mxu1 %v8655_v50  ;;  %v8665_v53 = vld [vmem:[#allocation39_spill] sm:$0xff]  ;;  %v8666_v50 = vld [vmem:[#allocation34_spill] sm:$0xff] }
 0x2fa   : > { %3074 = vmatpush1.msra.mxu0 %v8656_v52  ;;  %3235 = vmatpush1.msra.mxu1 %v8657_v0  ;;  %v8667_v52 = vld [vmem:[#allocation36_spill] sm:$0xff]  ;;  %v8668_v0 = vld [vmem:[#allocation33_spill] sm:$0xff] }
 0x2fb   : > { %3075 = vmatprep.subr.mxu0 %v8658_v5  ;;  %3236 = vmatprep.subr.mxu1 %v8659_v58  ;;  %v8669_v5 = vld [vmem:[#allocation35_spill] sm:$0xff]  ;;  %v8670_v58 = vld [vmem:[#allocation30_spill] sm:$0xff] }
 0x2fc   : > { %3076 = vmatpush1.msra.mxu0 %v8660_v55  ;;  %3237 = vmatpush1.msra.mxu1 %v8661_v57  ;;  %v8671_v55 = vld [vmem:[#allocation32_spill] sm:$0xff]  ;;  %v8672_v57 = vld [vmem:[#allocation29_spill] sm:$0xff] }
 0x2fd   : > { %3077 = vmatprep.subr.mxu0 %v8662_v54  ;;  %3238 = vmatprep.subr.mxu1 %v8663_v56  ;;  %v8673_v54 = vld [vmem:[#allocation31_spill] sm:$0xff]  ;;  %v8674_v56 = vld [vmem:[#allocation26_spill] sm:$0xff] }
 0x2fe   : > { %3078 = vmatpush1.msra.mxu0 %v8664_v51  ;;  %3239 = vmatpush1.msra.mxu1 %v8665_v53  ;;  %v8675_v51 = vld [vmem:[#allocation28_spill] sm:$0xff]  ;;  %v8676_v53 = vld [vmem:[#allocation25_spill] sm:$0xff] }
 0x2ff   : > { %3079 = vmatprep.subr.mxu0 %v8666_v50  ;;  %3240 = vmatprep.subr.mxu1 %v8667_v52  ;;  %v8677_v50 = vld [vmem:[#allocation27_spill] sm:$0xff]  ;;  %v8678_v52 = vld [vmem:[#allocation22_spill] sm:$0xff] }
 0x300   : > { %3080 = vmatpush1.msra.mxu0 %v8668_v0  ;;  %3241 = vmatpush1.msra.mxu1 %v8669_v5  ;;  %v8679_v0 = vld [vmem:[#allocation24_spill] sm:$0xff]  ;;  %v8680_v5 = vld [vmem:[#allocation21_spill] sm:$0xff] }
 0x301   : > { %3081 = vmatprep.subr.mxu0 %v8670_v58  ;;  %3242 = vmatprep.subr.mxu1 %v8671_v55  ;;  %v8526_v58 = vmov 0.0   ;;  %v8681_v55 = vld [vmem:[#allocation18_spill] sm:$0xff] }
 0x302   : > { %3082 = vmatpush1.msra.mxu0 %v8672_v57  ;;  %3243 = vmatpush1.msra.mxu1 %v8673_v54  ;;  %v8682_v57 = vld [vmem:[#allocation23_spill] sm:$0xff]  ;;  %v7829_v54 = vstv %s5607_s1  ;;  %s8794_s1 = smov %s2942_s29 }
 0x303   : > { %3083 = vmatprep.subr.mxu0 %v8674_v56  ;;  %3244 = vmatprep.subr.mxu1 %v8675_v51  ;;  %v8683_v56 = vld [vmem:[#allocation17_spill] sm:$0xff]  ;;  %v8684_v51 = vld [vmem:[#allocation20_spill] sm:$0xff] }
 0x304   : > { %3084 = vmatpush1.msra.mxu0 %v8676_v53  ;;  %3245 = vmatpush1.msra.mxu1 %v8677_v50  ;;  %v8685_v53 = vld [vmem:[#allocation14_spill] sm:$0xff]  ;;  %v8686_v50 = vld [vmem:[#allocation19_spill] sm:$0xff] }
 0x305   : > { %3085 = vmatprep.subr.mxu0 %v8678_v52  ;;  %3246 = vmatprep.subr.mxu1 %v8679_v0  ;;  %v8687_v52 = vld [vmem:[#allocation13_spill] sm:$0xff]  ;;  %v8688_v0 = vld [vmem:[#allocation16_spill] sm:$0xff] }
 0x306   : > { %3086 = vmatpush1.msra.mxu0 %v8680_v5  ;;  %3125 = vmatprep.mubr.f32.mxu0 %v8526_v58  ;;  %v8689_v5 = vld [vmem:[#allocation73_spill] sm:$0xff] }
 0x307   : > { %3087 = vmatprep.subr.mxu0 %v8681_v55  ;;  %3247 = vmatpush1.msra.mxu1 %v8682_v57  ;;  %vm3737_vm1 = vcmp.eq.s32.totalorder %v8689_v5, %v7829_v54  ;;  %v8690_v55 = vld [vmem:[#allocation10_spill] sm:$0xff]  ;;  %v8691_v57 = vld [vmem:[#allocation15_spill] sm:$0xff]  ;;  %v8692_v58 = vld [vmem:[#allocation9_spill] sm:$0xff] }
 0x308   : > { %3088 = vmatpush1.msra.mxu0 %v8683_v56  ;;  %3248 = vmatprep.subr.mxu1 %v8684_v51  ;;  %v8693_v56 = vld [vmem:[#allocation12_spill] sm:$0xff]  ;;  %v8694_v51 = vld [vmem:[#allocation75_spill] sm:$0xff]  ;;  %v8697_v5 = vld [vmem:[#allocation74_spill] sm:$0xff] }
 0x309   : > { %3089 = vmatprep.subr.mxu0 %v8685_v53  ;;  %3249 = vmatpush1.msra.mxu1 %v8686_v50  ;;  %vm3739_vm2 = vcmp.eq.s32.totalorder %v8694_v51, %v7829_v54  ;;  %v8695_v53 = vld [vmem:[#allocation11_spill] sm:$0xff]  ;;  %v5611_v50 = vmov 0   ;;  %vm3738_vm3 = vcmp.eq.s32.totalorder %v8697_v5, %v7829_v54  ;;  %v8700_v51 = vld [vmem:[#allocation78_spill] sm:$0xff]  ;;  %v8702_v5 = vld [vmem:[#allocation80_spill] sm:$0xff] }
 0x30a   : > { %3090 = vmatpush1.msra.mxu0 %v8687_v52  ;;  %3250 = vmatprep.subr.mxu1 %v8688_v0  ;;  %v3753_v52 = vsel %vm3737_vm1, 1, %v5611_v50  ;;  %v8696_v0 = vmov 0.0   ;;  %vm3742_vm6 = vcmp.eq.s32.totalorder %v8700_v51, %v7829_v54  ;;  %vm3744_vm8 = vcmp.eq.s32.totalorder %v8702_v5, %v7829_v54  ;;  %v8706_v51 = vld [vmem:[#allocation84_spill] sm:$0xff] }
 0x30b   : > { %3091 = vmatprep.subr.mxu0 %v8690_v55  ;;  %3251 = vmatpush1.msra.mxu1 %v8691_v57  ;;  %v8698_v55 = vld [vmem:[#allocation76_spill] sm:$0xff]  ;;  %v3754_v57 = vsel %vm3738_vm3, 1, %v5611_v50  ;;  %vm3748_vm12 = vcmp.eq.s32.totalorder %v8706_v51, %v7829_v54 }
 0x30c   : > { %3092 = vmatpush1.msra.mxu0 %v8692_v58  ;;  %3252 = vmatprep.subr.mxu1 %v8693_v56  ;;  %v3755_v58 = vsel %vm3739_vm2, 1, %v5611_v50  ;;  %vm3740_vm4 = vcmp.eq.s32.totalorder %v8698_v55, %v7829_v54  ;;  %v8703_v55 = vld [vmem:[#allocation81_spill] sm:$0xff] }
 0x30d   : > { %3126 = vmatmul.mubr.f32.vlgmr.msra.gmra.mxu0 %v5603_v47  ;;  %3253 = vmatpush1.msra.mxu1 %v8695_v53  ;;  %v3756_v56 = vsel %vm3740_vm4, 1, %v5611_v50  ;;  %vm3745_vm9 = vcmp.eq.s32.totalorder %v8703_v55, %v7829_v54  ;;  %v8710_v55 = vld [vmem:[#allocation88_spill] sm:$0xff] }
 0x30e   : > { %3131 = vmatprep.mubr.f32.mxu0 %v8696_v0  ;;  %3286 = vmatprep.mubr.f32.mxu1 %v8696_v0  ;;  %vm3752_vm0 = vcmp.eq.s32.totalorder %v8710_v55, %v7829_v54 }
 0x30f   : > { %3287 = vmatmul.mubr.f32.vlgmr.msra.gmra.mxu1 %v5603_v47  ;;  %5033 = vset.pattern.permute.xlu0 %v5611_v50  ;;  %v8699_v47 = vld [vmem:[#allocation77_spill] sm:$0xff] }
 0x310   : > { %3292 = vmatprep.mubr.f32.mxu1 %v8696_v0  ;;  %3770 = vperm.xlu0 %5033, %v3753_v52   ;;  %vm3741_vm5 = vcmp.eq.s32.totalorder %v8699_v47, %v7829_v54  ;;  %v8701_v52 = vld [vmem:[#allocation79_spill] sm:$0xff]  ;;  %v3761_v47 = vsel %vm3745_vm9, 1, %v5611_v50 }
 0x311   : > { %3132 = vmatmul.mubr.f32.gmra.mxu0 %v5599_v49  ;;  %5034 = vset.pattern.permute.xlu1 %v5611_v50  ;;  %v3757_v53 = vsel %vm3741_vm5, 1, %v5611_v50  ;;  %vm3743_vm7 = vcmp.eq.s32.totalorder %v8701_v52, %v7829_v54  ;;  %v8707_v52 = vld [vmem:[#allocation85_spill] sm:$0xff] }
 0x312   : > { %3137 = vmatprep.mubr.f32.mxu0 %v8696_v0  ;;  %3776 = vperm.xlu1 %5034, %v3755_v58   ;;  %v3759_v58 = vsel %vm3743_vm7, 1, %v5611_v50  ;;  %vm3749_vm13 = vcmp.eq.s32.totalorder %v8707_v52, %v7829_v54  ;;  %v3003_v52 = vld [vmem:[%s7956_s28 + $0x30] sm:$0xff] }
 0x313   : > { %3293 = vmatmul.mubr.f32.gmra.mxu1 %v5599_v49  ;;  %v3758_v49 = vsel %vm3742_vm6, 1, %v5611_v50  ;;  %v3765_v5 = vsel %vm3749_vm13, 1, %v5611_v50 }
 0x314   : > { %3298 = vmatprep.mubr.f32.mxu1 %v8696_v0  ;;  %3773 = vperm.xlu0 %5033, %v3754_v57   ;;  %v8704_v57 = vld [vmem:[#allocation82_spill] sm:$0xff] }
 0x315   : > { %3138 = vmatmul.mubr.f32.gmra.mxu0 %v5595_v46  ;;  %vm3746_vm10 = vcmp.eq.s32.totalorder %v8704_v57, %v7829_v54  ;;  %v3768_v57 = vsel %vm3752_vm0, 1, %v5611_v50 }
 0x316   : > { %3143 = vmatprep.mubr.f32.mxu0 %v8696_v0  ;;  %3779 = vperm.xlu1 %5034, %v3756_v56   ;;  %v8705_v56 = vld [vmem:[#allocation83_spill] sm:$0xff] }
 0x317   : > { %3299 = vmatmul.mubr.f32.gmra.mxu1 %v5595_v46  ;;  %v3760_v46 = vsel %vm3744_vm8, 1, %v5611_v50  ;;  %vm3747_vm11 = vcmp.eq.s32.totalorder %v8705_v56, %v7829_v54 }
 0x318   : > { %3304 = vmatprep.mubr.f32.mxu1 %v8696_v0  ;;  %3782 = vperm.xlu0 %5033, %v3757_v53   ;;  %v3763_v53 = vsel %vm3747_vm11, 1, %v5611_v50 }
 0x319   : > { %3144 = vmatmul.mubr.f32.gmra.mxu0 %v5591_v48 }
 0x31a   : > { %3149 = vmatprep.mubr.f32.mxu0 %v8696_v0  ;;  %3785 = vperm.xlu1 %5034, %v3758_v49   ;;  %v8708_v49 = vld [vmem:[#allocation86_spill] sm:$0xff] }
 0x31b   : > { %3305 = vmatmul.mubr.f32.gmra.mxu1 %v5591_v48  ;;  %v3762_v48 = vsel %vm3746_vm10, 1, %v5611_v50  ;;  %vm3750_vm14 = vcmp.eq.s32.totalorder %v8708_v49, %v7829_v54  ;;  %v3005_v49 = vld [vmem:[%s7956_s28 + $0x40] sm:$0xff] }
 0x31c   : > { %3310 = vmatprep.mubr.f32.mxu1 %v8696_v0  ;;  %3788 = vperm.xlu0 %5033, %v3759_v58   ;;  %v8709_v58 = vld [vmem:[#allocation87_spill] sm:$0xff] }
 0x31d   : > { %3150 = vmatmul.mubr.f32.gmra.mxu0 %v5587_v43  ;;  %vm3751_vm15 = vcmp.eq.s32.totalorder %v8709_v58, %v7829_v54  ;;  %v3004_v58 = vld [vmem:[%s7956_s28 + $0x38] sm:$0xff] }
 0x31e   : > { %3155 = vmatprep.mubr.f32.mxu0 %v8696_v0  ;;  %3791 = vperm.xlu1 %5034, %v3760_v46   ;;  %v3767_v46 = vsel %vm3751_vm15, 1, %v5611_v50 }
 0x31f   : > { %3311 = vmatmul.mubr.f32.gmra.mxu1 %v5587_v43  ;;  %v3764_v43 = vsel %vm3748_vm12, 1, %v5611_v50 }
 0x320   : > { %3316 = vmatprep.mubr.f32.mxu1 %v8696_v0  ;;  %3794 = vperm.xlu0 %5033, %v3761_v47  }
 0x321   : > { %3156 = vmatmul.mubr.f32.gmra.mxu0 %v5583_v45 }
 0x322   : > { %3161 = vmatprep.mubr.f32.mxu0 %v8696_v0  ;;  %3797 = vperm.xlu1 %5034, %v3762_v48  }
 0x323   : > { %3317 = vmatmul.mubr.f32.gmra.mxu1 %v5583_v45  ;;  %v3766_v45 = vsel %vm3750_vm14, 1, %v5611_v50 }
 0x324   : > { %3322 = vmatprep.mubr.f32.mxu1 %v8696_v0  ;;  %3800 = vperm.xlu0 %5033, %v3763_v53  }
 0x325   : > { %3162 = vmatmul.mubr.f32.gmra.mxu0 %v5579_v42 }
 0x326   : > { %3167 = vmatprep.mubr.f32.mxu0 %v8696_v0  ;;  %3803 = vperm.xlu1 %5034, %v3764_v43  }
 0x327   : > { %3323 = vmatmul.mubr.f32.gmra.mxu1 %v5579_v42  ;;  %v3000_v42 = vld [vmem:[%s7956_s28 + $0x18] sm:$0xff] }
 0x328   : > { %3328 = vmatprep.mubr.f32.mxu1 %v8696_v0  ;;  %3806 = vperm.xlu0 %5033, %v3765_v5  }
 0x329   : > { %3168 = vmatmul.mubr.f32.gmra.mxu0 %v5575_v44 }
 0x32a   : > { %3173 = vmatprep.mubr.f32.mxu0 %v8696_v0  ;;  %3809 = vperm.xlu1 %5034, %v3766_v45  }
 0x32b   : > { %3329 = vmatmul.mubr.f32.gmra.mxu1 %v5575_v44 }
 0x32c   : > { %3334 = vmatprep.mubr.f32.mxu1 %v8696_v0  ;;  %3812 = vperm.xlu0 %5033, %v3767_v46  }
 0x32d   : > { %3174 = vmatmul.mubr.f32.gmra.mxu0 %v5571_v39 }
 0x32e   : > { %3179 = vmatprep.mubr.f32.mxu0 %v8696_v0  ;;  %3815 = vperm.xlu1 %5034, %v3768_v57  }
 0x32f   : > { %3335 = vmatmul.mubr.f32.gmra.mxu1 %v5571_v39  ;;  %v2999_v39 = vld [vmem:[%s7956_s28 + $0x10] sm:$0xff] }
 0x330   : > { %3340 = vmatprep.mubr.f32.mxu1 %v8696_v0 }
 0x331   : > { %3180 = vmatmul.mubr.f32.gmra.mxu0 %v5567_v41 }
 0x332   : > { %3185 = vmatprep.mubr.f32.mxu0 %v8696_v0 }
 0x333   : > { %3341 = vmatmul.mubr.f32.gmra.mxu1 %v5567_v41 }
 0x334   : > { %3346 = vmatprep.mubr.f32.mxu1 %v8696_v0 }
 0x335   : > { %3186 = vmatmul.mubr.f32.gmra.mxu0 %v5563_v38 }
 0x336   : > { %3191 = vmatprep.mubr.f32.mxu0 %v8696_v0 }
 0x337   : > { %3347 = vmatmul.mubr.f32.gmra.mxu1 %v5563_v38 }
 0x338   : > { %3352 = vmatprep.mubr.f32.mxu1 %v8696_v0 }
 0x339   : > { %3192 = vmatmul.mubr.f32.gmra.mxu0 %v5559_v40 }
 0x33a   : > { %3197 = vmatprep.mubr.f32.mxu0 %v8696_v0 }
 0x33b   : > { %3353 = vmatmul.mubr.f32.gmra.mxu1 %v5559_v40 }
 0x33c   : > { %3358 = vmatprep.mubr.f32.mxu1 %v8696_v0 }
 0x33d   : > { %3198 = vmatmul.mubr.f32.gmra.mxu0 %v5555_v35 }
 0x33e   : > { %3203 = vmatprep.mubr.f32.mxu0 %v8696_v0 }
 0x33f   : > { %3359 = vmatmul.mubr.f32.gmra.mxu1 %v5555_v35  ;;  %v2997_v35 = vld [vmem:[%s7956_s28] sm:$0xff] }
 0x340   : > { %3364 = vmatprep.mubr.f32.mxu1 %v8696_v0 }
 0x341   : > { %3204 = vmatmul.mubr.f32.gmra.mxu0 %v5551_v37 }
 0x342   : > { %3209 = vmatprep.mubr.f32.mxu0 %v8696_v0 }
 0x343   : > { %3365 = vmatmul.mubr.f32.gmra.mxu1 %v5551_v37 }
 0x344   : > { %3370 = vmatprep.mubr.f32.mxu1 %v8696_v0 }
 0x345   : > { %3210 = vmatmul.mubr.f32.gmra.mxu0 %v5547_v34 }
 0x346   : > { %3215 = vmatprep.mubr.f32.mxu0 %v8696_v0 }
 0x347   : > { %3371 = vmatmul.mubr.f32.gmra.mxu1 %v5547_v34  ;;  %v2998_v34 = vld [vmem:[%s7956_s28 + $0x8] sm:$0xff] }
 0x348   : > { %3376 = vmatprep.mubr.f32.mxu1 %v8696_v0  ;;  %v3002_v0 = vld [vmem:[%s7956_s28 + $0x28] sm:$0xff] }
 0x349   : > { %3216 = vmatmul.mubr.f32.gmra.mxu0 %v5543_v36 }
 0x34b   : > { %3377 = vmatmul.mubr.f32.gmra.mxu1 %v5543_v36  ;;  %v3001_v36 = vld [vmem:[%s7956_s28 + $0x20] sm:$0xff] }
 0x3cd   : > { %v3127_v37 = vpop.f32.mrf.mxu0 }
 0x3ce   : > { %v3383_v38 = vadd.f32 %v3127_v37, %v2997_v35  ;;  %v3006_v35 = vld [vmem:[%s7956_s28 + $0x48] sm:$0xff] }
 0x3cf   : > { %v3129_v40 = vpop.f32.mrf.mxu0  ;;  %v3288_v41 = vpop.f32.mrf.mxu1 }
 0x3d0   : > { %v3447_v44 = vmul.f32 0.5, %v3383_v38  ;;  %v3384_v54 = vadd.f32 %v3129_v40, %v2998_v34  ;;  %v3385_v47 = vadd.f32 %v3288_v41, %v2999_v39 }
 0x3d1   : > { %v3133_v50 = vpop.f32.mrf.mxu0  ;;  %v3290_v56 = vpop.f32.mrf.mxu1 }
 0x3d2   : > { %5035 = vtanh.f32 %v3447_v44  ;;  %v3511_v48 = vmul.f32 0.5, %v3384_v54  ;;  %v3387_v51 = vadd.f32 %v3133_v50, %v3001_v36  ;;  %v3386_v53 = vadd.f32 %v3290_v56, %v3000_v42  ;;  %v3007_v36 = vld [vmem:[%s7956_s28 + $0x50] sm:$0xff]  ;;  %v3009_v42 = vld [vmem:[%s7956_s28 + $0x60] sm:$0xff]  ;;  %v3008_v54 = vld [vmem:[%s7956_s28 + $0x58] sm:$0xff] }
 0x3d3   : > { %v3135_v43 = vpop.f32.mrf.mxu0  ;;  %v3294_v5 = vpop.f32.mrf.mxu1 }
 0x3d4   : > { %5037 = vtanh.f32 %v3511_v48  ;;  %v3448_v45 = vmul.f32 0.5, %v3387_v51  ;;  %v3388_v55 = vadd.f32 %v3135_v43, %v3002_v0  ;;  %v3591_v46 = vmul.f32 0.5, %v3386_v53  ;;  %v3010_v48 = vld [vmem:[%s7956_s28 + $0x68] sm:$0xff] }
 0x3d5   : > { %5039 = vtanh.f32 %v3385_v47  ;;  %v3139_v57 = vpop.f32.mrf.mxu0  ;;  %v3389_v37 = vadd.f32 %v3294_v5, %v3003_v52  ;;  %v3296_v34 = vpop.f32.mrf.mxu1  ;;  %v3011_v5 = vld [vmem:[%s7956_s28 + $0x70] sm:$0xff] }
 0x3d6   : > { %5041 = vtanh.f32 %v3448_v45  ;;  %v3512_v38 = vmul.f32 0.5, %v3388_v55  ;;  %v3391_v39 = vadd.f32 %v3139_v57, %v3005_v49  ;;  %v3390_v40 = vadd.f32 %v3296_v34, %v3004_v58  ;;  %v3013_v45 = vld [vmem:[%s7956_s28 + $0x80] sm:$0xff] }
 0x3d7   : > { %5043 = vtanh.f32 %v3591_v46  ;;  %v3141_v41 = vpop.f32.mrf.mxu0  ;;  %v3300_v44 = vpop.f32.mrf.mxu1  ;;  %v3012_v46 = vld [vmem:[%s7956_s28 + $0x78] sm:$0xff] }
 0x3d8   : > { %5045 = vtanh.f32 %v3512_v38  ;;  %v3449_v50 = vmul.f32 0.5, %v3391_v39  ;;  %v3392_v0 = vadd.f32 %v3141_v41, %v3006_v35  ;;  %v3592_v47 = vmul.f32 0.5, %v3390_v40  ;;  %v3014_v38 = vld [vmem:[%s7956_s28 + $0x88] sm:$0xff] }
 0x3d9   : > { %5047 = vtanh.f32 %v3389_v37  ;;  %v3145_v56 = vpop.f32.mrf.mxu0  ;;  %v3393_v51 = vadd.f32 %v3300_v44, %v3007_v36  ;;  %v3302_v53 = vpop.f32.mrf.mxu1  ;;  %v3015_v44 = vld [vmem:[%s7956_s28 + $0x90] sm:$0xff] }
 0x3da   : > { %5049 = vtanh.f32 %v3449_v50  ;;  %v3513_v52 = vmul.f32 0.5, %v3392_v0  ;;  %v3395_v43 = vadd.f32 %v3145_v56, %v3009_v42  ;;  %v3394_v49 = vadd.f32 %v3302_v53, %v3008_v54 }
 0x3db   : > { %5051 = vtanh.f32 %v3592_v47  ;;  %v3147_v58 = vpop.f32.mrf.mxu0  ;;  %v3306_v55 = vpop.f32.mrf.mxu1 }
 0x3dc   : > { %5053 = vtanh.f32 %v3513_v52  ;;  %v3450_v57 = vmul.f32 0.5, %v3395_v43  ;;  %v3396_v35 = vadd.f32 %v3147_v58, %v3010_v48  ;;  %v3593_v37 = vmul.f32 0.5, %v3394_v49 }
 0x3dd   : > { %5055 = vtanh.f32 %v3393_v51  ;;  %v3151_v34 = vpop.f32.mrf.mxu0  ;;  %v3397_v39 = vadd.f32 %v3306_v55, %v3011_v5  ;;  %v3308_v40 = vpop.f32.mrf.mxu1  ;;  %v3017_v51 = vld [vmem:[%s7956_s28 + $0xa0] sm:$0xff]  ;;  %v3016_v5 = vld [vmem:[%s7956_s28 + $0x98] sm:$0xff] }
 0x3de   : > { %5057 = vtanh.f32 %v3450_v57  ;;  %v3514_v36 = vmul.f32 0.5, %v3396_v35  ;;  %v3399_v41 = vadd.f32 %v3151_v34, %v3013_v45  ;;  %v3398_v42 = vadd.f32 %v3308_v40, %v3012_v46  ;;  %v3018_v35 = vld [vmem:[%s7956_s28 + $0xa8] sm:$0xff] }
 0x3df   : > { %v5036_v54 = vpop.eup %5035  ;;  %5059 = vtanh.f32 %v3593_v37  ;;  %v3153_v50 = vpop.f32.mrf.mxu0 }
 0x3e0   : > { %v3312_v0 = vpop.f32.mrf.mxu1  ;;  %v3479_v47 = vmul.f32 0.5, %v5036_v54  ;;  %5061 = vtanh.f32 %v3514_v36  ;;  %v3451_v56 = vmul.f32 0.5, %v3399_v41  ;;  %v3400_v48 = vadd.f32 %v3153_v50, %v3014_v38  ;;  %v3021_v38 = vld [vmem:[%s7956_s28 + $0xc0] sm:$0xff] }
 0x3e1   : > { %v5038_v53 = vpop.eup %5037  ;;  %5063 = vtanh.f32 %v3397_v39  ;;  %v3157_v52 = vpop.f32.mrf.mxu0  ;;  %v3594_v43 = vmul.f32 0.5, %v3398_v42  ;;  %v3401_v49 = vadd.f32 %v3312_v0, %v3015_v44 }
 0x3e2   : > { %v3314_v58 = vpop.f32.mrf.mxu1  ;;  %v5040_v45 = vpop.eup %5039  ;;  %v3495_v55 = vadd.f32 0.5, %v3479_v47  ;;  %v3543_v46 = vmul.f32 0.5, %v5038_v53  ;;  %5065 = vtanh.f32 %v3451_v56  ;;  %v3515_v57 = vmul.f32 0.5, %v3400_v48 }
 0x3e3   : > { %v5042_v37 = vpop.eup %5041  ;;  %v3403_v34 = vadd.f32 %v3157_v52, %v3017_v51  ;;  %5067 = vtanh.f32 %v3594_v43  ;;  %v3159_v40 = vpop.f32.mrf.mxu0  ;;  %v3402_v42 = vadd.f32 %v3314_v58, %v3016_v5 }
 0x3e4   : > { %v3318_v36 = vpop.f32.mrf.mxu1  ;;  %v5044_v41 = vpop.eup %5043  ;;  %v3559_v39 = vadd.f32 0.5, %v3543_v46  ;;  %v3480_v54 = vmul.f32 0.5, %v5042_v37  ;;  %5069 = vtanh.f32 %v3515_v57  ;;  %v3671_v50 = vmul.f32 %v5040_v45, %v3495_v55 }
 0x3e5   : > { %v5046_v44 = vpop.eup %5045  ;;  %v3452_v0 = vmul.f32 0.5, %v3403_v34  ;;  %v3404_v47 = vadd.f32 %v3159_v40, %v3018_v35  ;;  %5071 = vtanh.f32 %v3401_v49  ;;  %v3163_v56 = vpop.f32.mrf.mxu0  ;;  %v3595_v55 = vmul.f32 0.5, %v3402_v42 }
 0x3e6   : > { %v3320_v48 = vpop.f32.mrf.mxu1  ;;  %v5048_v53 = vpop.eup %5047  ;;  %v3655_v51 = vmul.f32 %v5539_v31, %v3559_v39  ;;  %v3496_v52 = vadd.f32 0.5, %v3480_v54  ;;  %v3544_v43 = vmul.f32 0.5, %v5046_v44  ;;  %v3407_v59 = vadd.f32 %v3163_v56, %v3021_v38  ;;  %v3019_v39 = vld [vmem:[%s7956_s28 + $0xb0] sm:$0xff] }
 0x3e7   : > { %v5050_v46 = vpop.eup %5049  ;;  %5073 = vtanh.f32 %v3452_v0  ;;  %v3516_v37 = vmul.f32 0.5, %v3404_v47  ;;  %v3165_v57 = vpop.f32.mrf.mxu0  ;;  %v3623_v42 = vmul.f32 0.5, %v5044_v41 }
 0x3e8   : > { %v7983_v5 = vpop.f32.mrf.mxu1  ;;  %v5052_v58 = vpop.eup %5051  ;;  %v3560_v45 = vadd.f32 0.5, %v3544_v43  ;;  %v7985_v31 = vadd.f32 %v3671_v50, %v3655_v51   ;;  %v3481_v49 = vmul.f32 0.5, %v5050_v46  ;;  %v3672_v34 = vmul.f32 %v5048_v53, %v3496_v52  ;;  %v3025_v51 = vld [vmem:[%s7956_s28 + $0xe0] sm:$0xff]  ;;  %v3020_v43 = vld [vmem:[%s7956_s28 + $0xb8] sm:$0xff] }
 0x3e9   : > { %v5054_v35 = vpop.eup %5053  ;;  %5075 = vtanh.f32 %v3516_v37  ;;  %v3453_v40 = vmul.f32 0.5, %v3407_v59  ;;  %v3408_v38 = vadd.f32 %v3165_v57, %v3022_v60  ;;  %v3169_v54 = vpop.f32.mrf.mxu0 }
 0x3ea   : > { %8711 = vst [vmem:[#allocation94_spill] sm:$0xff] %v7985_v31  ;;  %v7988_v44 = vpop.f32.mrf.mxu1  ;;  %v5056_v0 = vpop.eup %5055  ;;  %v3656_v47 = vmul.f32 %v5535_v33, %v3560_v45  ;;  %5077 = vtanh.f32 %v7985_v31  ;;  %v3497_v50 = vadd.f32 0.5, %v3481_v49  ;;  %v3545_v56 = vmul.f32 0.5, %v5054_v35 }
 0x3eb   : > { %v5058_v46 = vpop.eup %5057  ;;  %5079 = vtanh.f32 %v3453_v40  ;;  %v3517_v53 = vmul.f32 0.5, %v3408_v38  ;;  %v3171_v52 = vpop.f32.mrf.mxu0  ;;  %v3405_v45 = vadd.f32 %v3318_v36, %v3019_v39  ;;  %v3411_v49 = vadd.f32 %v3169_v54, %v3025_v51 }
 0x3ec   : > { %v7994_v59 = vpop.f32.mrf.mxu1  ;;  %v5060_v60 = vpop.eup %5059  ;;  %v3561_v37 = vadd.f32 0.5, %v3545_v56  ;;  %v7996_v33 = vadd.f32 %v3672_v34, %v3656_v47   ;;  %v3482_v57 = vmul.f32 0.5, %v5058_v46  ;;  %v3673_v62 = vmul.f32 %v5056_v0, %v3497_v50  ;;  %v3026_v47 = vld [vmem:[%s7956_s28 + $0xe8] sm:$0xff]  ;;  %v3029_v46 = vld [vmem:[%s7956_s28 + $0x100] sm:$0xff] }
 0x3ed   : > { %v5062_v61 = vpop.eup %5061  ;;  %5081 = vtanh.f32 %v3595_v55  ;;  %v3406_v35 = vadd.f32 %v3320_v48, %v3020_v43  ;;  %v3175_v63 = vpop.f32.mrf.mxu0  ;;  %v8003_v36 = vadd.f32 0.5, %v3623_v42  ;;  %v3454_v55 = vmul.f32 0.5, %v3411_v49  ;;  %v3023_v43 = vld [vmem:[%s7956_s28 + $0xd0] sm:$0xff] }
 0x3ee   : > { %8712 = vst [vmem:[#allocation95_spill] sm:$0xff] %v7996_v33  ;;  %v7998_v31 = vpop.f32.mrf.mxu1  ;;  %v5064_v41 = vpop.eup %5063  ;;  %v3657_v40 = vmul.f32 %v5531_v30, %v3561_v37  ;;  %5083 = vtanh.f32 %v7996_v33  ;;  %v3498_v38 = vadd.f32 0.5, %v3482_v57  ;;  %v3546_v34 = vmul.f32 0.5, %v5062_v61 }
 0x3ef   : > { %v5066_v56 = vpop.eup %5065  ;;  %5085 = vtanh.f32 %v3517_v53  ;;  %v3177_v39 = vpop.f32.mrf.mxu0  ;;  %v3596_v51 = vmul.f32 0.5, %v3406_v35  ;;  %v3624_v61 = vmul.f32 0.5, %v5052_v58  ;;  %v3412_v42 = vadd.f32 %v3171_v52, %v3026_v47  ;;  %v3024_v35 = vld [vmem:[%s7956_s28 + $0xd8] sm:$0xff] }
 0x3f0   : > { %v8005_v48 = vpop.f32.mrf.mxu1  ;;  %v5068_v54 = vpop.eup %5067  ;;  %v3562_v0 = vadd.f32 0.5, %v3546_v34  ;;  %v8007_v30 = vadd.f32 %v3673_v62, %v3657_v40   ;;  %v3483_v50 = vmul.f32 0.5, %v5066_v56  ;;  %v3674_v57 = vmul.f32 %v5064_v41, %v3498_v38 }
 0x3f1   : > { %v5070_v37 = vpop.eup %5069  ;;  %5087 = vtanh.f32 %v3405_v45  ;;  %v3181_v53 = vpop.f32.mrf.mxu0  ;;  %v3518_v34 = vmul.f32 0.5, %v3412_v42  ;;  %v3409_v58 = vadd.f32 %v7983_v5, %v3023_v43  ;;  %v3415_v41 = vadd.f32 %v3175_v63, %v3029_v46  ;;  %v3030_v45 = vld [vmem:[%s7956_s28 + $0x108] sm:$0xff]  ;;  %v3033_v5 = vld [vmem:[%s7956_s28 + $0x120] sm:$0xff] }
 0x3f2   : > { %8713 = vst [vmem:[#allocation96_spill] sm:$0xff] %v8007_v30  ;;  %v8011_v49 = vpop.f32.mrf.mxu1  ;;  %v5072_v33 = vpop.eup %5071  ;;  %v3658_v14 = vmul.f32 %v5527_v32, %v3562_v0  ;;  %5089 = vtanh.f32 %v8007_v30  ;;  %v3499_v62 = vadd.f32 0.5, %v3483_v50  ;;  %v3547_v40 = vmul.f32 0.5, %v5070_v37  ;;  %v3027_v0 = vld [vmem:[%s7956_s28 + $0xf0] sm:$0xff] }
 0x3f3   : > { %5091 = vtanh.f32 %v3454_v55  ;;  %v3183_v52 = vpop.f32.mrf.mxu0  ;;  %v3625_v56 = vmul.f32 0.5, %v5060_v60  ;;  %v8023_v50 = vpop.permute.xlu0 %3770  ;;  %v3455_v55 = vmul.f32 0.5, %v3415_v41  ;;  %v3410_v63 = vadd.f32 %v7988_v44, %v3024_v35  ;;  %v3028_v44 = vld [vmem:[%s7956_s28 + $0xf8] sm:$0xff]  ;;  %v3034_v35 = vld [vmem:[%s7956_s28 + $0x128] sm:$0xff] }
 0x3f4   : > { %v8018_v38 = vpop.f32.mrf.mxu1  ;;  %v5074_v47 = vpop.eup %5073  ;;  %v3563_v20 = vadd.f32 0.5, %v3547_v40  ;;  %v8020_v32 = vadd.f32 %v3674_v57, %v3658_v14   ;;  %5093 = vtanh.f32 %v3596_v51  ;;  %v3675_v37 = vmul.f32 %v5072_v33, %v3499_v62 }
 0x3f5   : > { %5095 = vtanh.f32 %v3518_v34  ;;  %v3187_v43 = vpop.f32.mrf.mxu0  ;;  %v3484_v14 = vmul.f32 0.5, %v5074_v47  ;;  %v3416_v51 = vadd.f32 %v3177_v39, %v3030_v45  ;;  %v3597_v62 = vmul.f32 0.5, %v3410_v63 }
 0x3f6   : > { %8714 = vst [vmem:[#allocation97_spill] sm:$0xff] %v8020_v32  ;;  %v8027_v46 = vpop.f32.mrf.mxu1  ;;  %v5076_v42 = vpop.eup %5075  ;;  %v3659_v60 = vmul.f32 %v5523_v27, %v3563_v20  ;;  %5097 = vtanh.f32 %v8020_v32  ;;  %v3413_v40 = vadd.f32 %v7994_v59, %v3027_v0  ;;  %vm3817_vm1 = vcmp.eq.s32.totalorder %v8023_v50, 1  ;;  %v3031_v59 = vld [vmem:[%s7956_s28 + $0x110] sm:$0xff]  ;;  %v3037_v0 = vld [vmem:[%s7956_s28 + $0x140] sm:$0xff] }
 0x3f7   : > { %v8031_v57 = vpop.eup %5077  ;;  %v3548_v33 = vmul.f32 0.5, %v5076_v42  ;;  %5099 = vtanh.f32 %v3409_v58  ;;  %v3189_v34 = vpop.f32.mrf.mxu0  ;;  %v3519_v20 = vmul.f32 0.5, %v3416_v51  ;;  %v3419_v39 = vadd.f32 %v3181_v53, %v3033_v5  ;;  %v3032_v51 = vld [vmem:[%s7956_s28 + $0x118] sm:$0xff] }
 0x3f8   : > { %v5080_v41 = vpop.eup %5079  ;;  %v8037_v27 = vadd.f32 %v3675_v37, %v3659_v60   ;;  %5101 = vtanh.f32 %v3455_v55  ;;  %v8039_v45 = vpop.f32.mrf.mxu1  ;;  %v8041_v47 = vadd.f32 0.5, %v3624_v61  ;;  %v3626_v58 = vmul.f32 0.5, %v5068_v54 }
 0x3f9   : > { %v3564_v63 = vadd.f32 0.5, %v3548_v33  ;;  %5103 = vtanh.f32 %v3597_v62  ;;  %v3193_v42 = vpop.f32.mrf.mxu0  ;;  %v3456_v37 = vmul.f32 0.5, %v3419_v39  ;;  %v3414_v55 = vadd.f32 %v7998_v31, %v3028_v44  ;;  %v3038_v33 = vld [vmem:[%s7956_s28 + $0x148] sm:$0xff]  ;;  %v8055_v62 = vpop.permute.xlu1 %3776 }
 0x3fa   : > { %8715 = vst [vmem:[#allocation98_spill] sm:$0xff] %v8037_v27  ;;  %v8045_v30 = vpop.eup %5081  ;;  %5105 = vtanh.f32 %v8037_v27  ;;  %v3420_v53 = vadd.f32 %v3183_v52, %v3034_v35  ;;  %v8051_v61 = vadd.f32 0.5, %v3625_v56  ;;  %v3500_v54 = vadd.f32 0.5, %v3484_v14  ;;  %v8058_v52 = vpop.permute.xlu0 %3773 }
 0x3fb   : > { %v8049_v5 = vpop.eup %5083  ;;  %v3485_v60 = vmul.f32 0.5, %v5080_v41  ;;  %5107 = vtanh.f32 %v3519_v20  ;;  %v3417_v39 = vadd.f32 %v8005_v48, %v3031_v59  ;;  %v3423_v31 = vadd.f32 %v3187_v43, %v3037_v0  ;;  %v8060_v44 = vpop.f32.mrf.mxu1  ;;  %v3041_v41 = vld [vmem:[%s7956_s28 + $0x160] sm:$0xff]  ;;  %v3035_v0 = vld [vmem:[%s7956_s28 + $0x130] sm:$0xff] }
 0x3fc   : > { %v5086_v32 = vpop.eup %5085  ;;  %5109 = vtanh.f32 %v3413_v40  ;;  %v3520_v9 = vmul.f32 0.5, %v3420_v53  ;;  %v8062_v56 = vadd.f32 0.5, %v3626_v58  ;;  %v3660_v14 = vmul.f32 %v5519_v29, %v3564_v63  ;;  %v3195_v20 = vpop.f32.mrf.mxu0 }
 0x3fd   : > { %v3549_v35 = vmul.f32 0.5, %v5086_v32  ;;  %5111 = vtanh.f32 %v3456_v37  ;;  %vm3819_vm2 = vcmp.eq.s32.totalorder %v8055_v62, 1  ;;  %v3598_v53 = vmul.f32 0.5, %v3414_v55 }
 0x3fe   : > { %v5088_v40 = vpop.eup %5087  ;;  %v3457_v48 = vmul.f32 0.5, %v3423_v31  ;;  %v3418_v43 = vadd.f32 %v8011_v49, %v3032_v51  ;;  %v3424_v59 = vadd.f32 %v3189_v34, %v3038_v33  ;;  %v3501_v12 = vadd.f32 0.5, %v3485_v60  ;;  %v3036_v49 = vld [vmem:[%s7956_s28 + $0x138] sm:$0xff]  ;;  %v8075_v34 = vpop.f32.mrf.mxu1 }
 0x3ff   : > { %v5090_v27 = vpop.eup %5089  ;;  %v3565_v58 = vadd.f32 0.5, %v3549_v35  ;;  %v3676_v11 = vmul.f32 %v5088_v40, %v3500_v54  ;;  %5113 = vtanh.f32 %v3520_v9  ;;  %vm3818_vm3 = vcmp.eq.s32.totalorder %v8058_v52, 1  ;;  %v3042_v54 = vld [vmem:[%s7956_s28 + $0x168] sm:$0xff]  ;;  %v3199_v33 = vpop.f32.mrf.mxu0 }
 0x400   : > { %v5092_v29 = vpop.eup %5091  ;;  %5115 = vtanh.f32 %v3417_v39  ;;  %v3521_v32 = vmul.f32 0.5, %v3424_v59  ;;  %v8072_v63 = vmul.f32 %v8031_v57, %v8003_v36   ;;  %v3427_v37 = vadd.f32 %v3193_v42, %v3041_v41  ;;  %v3039_v42 = vld [vmem:[%s7956_s28 + $0x150] sm:$0xff] }
 0x401   : > { %v5094_v55 = vpop.eup %5093  ;;  %v8077_v60 = vadd.f32 %v3676_v11, %v3660_v14   ;;  %v3486_v51 = vmul.f32 0.5, %v5092_v29  ;;  %5117 = vtanh.f32 %v3457_v48  ;;  %v3421_v9 = vadd.f32 %v8018_v38, %v3035_v0  ;;  %v8094_v48 = vpop.f32.mrf.mxu1 }
 0x402   : > { %8716 = vst [vmem:[#allocation99_spill] sm:$0xff] %v8072_v63  ;;  %v5096_v39 = vpop.eup %5095  ;;  %5119 = vtanh.f32 %v3598_v53  ;;  %v3599_v31 = vmul.f32 0.5, %v3418_v43  ;;  %v8085_v8 = vsel %vm3817_vm1, %v8072_v63, %v5475_v8   ;;  %v3458_v36 = vmul.f32 0.5, %v3427_v37  ;;  %v3201_v0 = vpop.f32.mrf.mxu0 }
 0x403   : > { %8717 = vst [vmem:[#allocation100_spill] sm:$0xff] %v8077_v60  ;;  %v8718_v57 = vmov %v8085_v8  ;;  %v8088_v35 = vpop.eup %5097  ;;  %v3661_v11 = vmul.f32 %v5515_v26, %v3565_v58  ;;  %5121 = vtanh.f32 %v8077_v60  ;;  %v3550_v38 = vmul.f32 0.5, %v5096_v39  ;;  %v8097_v58 = vpop.permute.xlu1 %3779 }
 0x404   : > { %v3422_v14 = vadd.f32 %v8027_v46, %v3036_v49  ;;  %v5100_v41 = vpop.eup %5099  ;;  %v3627_v40 = vmul.f32 0.5, %v8045_v30  ;;  %v3502_v53 = vadd.f32 0.5, %v3486_v51  ;;  %5123 = vtanh.f32 %v3521_v32  ;;  %4576 = vmatprep.mubr.f32.mxu0 (%p8296_p0), %v8718_v57 }
 0x405   : > { %v3428_v50 = vadd.f32 %v3195_v20, %v3042_v54  ;;  %v5102_v8 = vpop.eup %5101  ;;  %v3566_v43 = vadd.f32 0.5, %v3550_v38  ;;  %v3677_v59 = vmul.f32 %v5100_v41, %v3501_v12  ;;  %5125 = vtanh.f32 %v3421_v9  ;;  %v3045_v20 = vld [vmem:[%s7956_s28 + $0x180] sm:$0xff]  ;;  %v3040_v9 = vld [vmem:[%s7956_s28 + $0x158] sm:$0xff] }
 0x406   : > { %v3425_v26 = vadd.f32 %v8039_v45, %v3039_v42  ;;  %v5104_v46 = vpop.eup %5103  ;;  %v3487_v29 = vmul.f32 0.5, %v5102_v8  ;;  %5127 = vtanh.f32 %v3458_v36  ;;  %v8100_v32 = vmul.f32 %v5090_v27, %v8051_v61   ;;  %v3046_v36 = vld [vmem:[%s7956_s28 + $0x188] sm:$0xff]  ;;  %v8121_v42 = vpop.f32.mrf.mxu1 }
 0x407   : > { %v3522_v30 = vmul.f32 0.5, %v3428_v50  ;;  %vm3820_vm4 = vcmp.eq.s32.totalorder %v8097_v58, 1  ;;  %v8104_v37 = vpop.eup %5105  ;;  %v3628_v12 = vmul.f32 0.5, %v5094_v55  ;;  %v8106_v51 = vadd.f32 %v3677_v59, %v3661_v11  }
 0x408   : > { %8719 = vst [vmem:[#allocation101_spill] sm:$0xff] %v8100_v32  ;;  %v8720_v49 = vmov %v8100_v32  ;;  %5129 = vtanh.f32 %v3599_v31  ;;  %v3600_v45 = vmul.f32 0.5, %v3422_v14  ;;  %v5108_v54 = vpop.eup %5107  ;;  %v3662_v39 = vmul.f32 %v5511_v28, %v3566_v43  ;;  %v3205_v14 = vpop.f32.mrf.mxu0 }
 0x409   : > { %8721 = vst [vmem:[#allocation102_spill] sm:$0xff] %v8106_v51  ;;  %5131 = vtanh.f32 %v3522_v30  ;;  %v8114_v3 = vsel %vm3819_vm2, %v8720_v49, %v5467_v3   ;;  %v8118_v27 = vmul.f32 %v8049_v5, %v8041_v47   ;;  %v5110_v31 = vpop.eup %5109  ;;  %v3503_v11 = vadd.f32 0.5, %v3487_v29  ;;  %v3043_v47 = vld [vmem:[%s7956_s28 + $0x170] sm:$0xff]  ;;  %v8132_v29 = vpop.permute.xlu1 %3785 }
 0x40a   : > { %v8722_v61 = vmov %v8114_v3  ;;  %5133 = vtanh.f32 %v8106_v51  ;;  %v3551_v28 = vmul.f32 0.5, %v5108_v54  ;;  %v3431_v38 = vadd.f32 %v3199_v33, %v3045_v20  ;;  %v5112_v41 = vpop.eup %5111  ;;  %v8134_v33 = vpop.permute.xlu0 %3782  ;;  %v3049_v20 = vld [vmem:[%s7956_s28 + $0x1a0] sm:$0xff] }
 0x40b   : > { %8723 = vst [vmem:[#allocation103_spill] sm:$0xff] %v8118_v27  ;;  %v8724_v55 = vmov %v8118_v27  ;;  %v3678_v50 = vmul.f32 %v5110_v31, %v3502_v53  ;;  %5135 = vtanh.f32 %v3425_v26  ;;  %v3426_v3 = vadd.f32 %v8060_v44, %v3040_v9  ;;  %v3207_v9 = vpop.f32.mrf.mxu0 }
 0x40c   : > { %v8128_v7 = vsel %vm3818_vm3, %v8724_v55, %v5471_v7   ;;  %v3567_v62 = vadd.f32 0.5, %v3551_v28  ;;  %v3488_v8 = vmul.f32 0.5, %v5112_v41  ;;  %v3459_v43 = vmul.f32 0.5, %v3431_v38  ;;  %v5114_v53 = vpop.eup %5113 }
 0x40d   : > { %v8725_v5 = vmov %v8128_v7  ;;  %v3432_v59 = vadd.f32 %v3201_v0, %v3046_v36  ;;  %v8136_v26 = vadd.f32 0.5, %v3627_v40  ;;  %v3629_v30 = vmul.f32 0.5, %v5104_v46  ;;  %v8141_v7 = vpop.f32.mrf.mxu1  ;;  %v5116_v52 = vpop.eup %5115 }
 0x40e   : > { %v8138_v28 = vadd.f32 %v3678_v50, %v3662_v39   ;;  %5137 = vtanh.f32 %v3600_v45  ;;  %vm3822_vm5 = vcmp.eq.s32.totalorder %v8132_v29, 1  ;;  %v3663_v44 = vmul.f32 %v5507_v23, %v3567_v62  ;;  %v5118_v54 = vpop.eup %5117  ;;  %v3050_v62 = vld [vmem:[%s7956_s28 + $0x1a8] sm:$0xff]  ;;  %v3057_v29 = vld [vmem:[%s7956_s28 + $0x1e0] sm:$0xff] }
 0x40f   : > { %v3552_v32 = vmul.f32 0.5, %v5114_v53  ;;  %5139 = vtanh.f32 %v3459_v43  ;;  %v3429_v0 = vadd.f32 %v8075_v34, %v3043_v47  ;;  %v3644_v40 = vadd.f32 0.5, %v3628_v12  ;;  %v5120_v39 = vpop.eup %5119  ;;  %v3044_v47 = vld [vmem:[%s7956_s28 + $0x178] sm:$0xff]  ;;  %v8157_v43 = vpop.f32.mrf.mxu1 }
 0x410   : > { %5141 = vtanh.f32 %v8138_v28  ;;  %v3679_v46 = vmul.f32 %v5116_v52, %v3503_v11  ;;  %v3523_v45 = vmul.f32 0.5, %v3432_v59  ;;  %vm3821_vm6 = vcmp.eq.s32.totalorder %v8134_v33, 1  ;;  %v5122_v31 = vpop.eup %5121  ;;  %v3047_v11 = vld [vmem:[%s7956_s28 + $0x190] sm:$0xff]  ;;  %v3907_v28 = vld [vmem:[%s8521_s5 + $0x38] sm:$0xff] (%p8296_p0) }
 0x411   : > { %v3504_v27 = vadd.f32 0.5, %v3488_v8  ;;  %v3568_v23 = vadd.f32 0.5, %v3552_v32  ;;  %v3601_v36 = vmul.f32 0.5, %v3426_v3  ;;  %v8150_v34 = vmul.f32 %v8088_v35, %v8062_v56   ;;  %v5124_v59 = vpop.eup %5123  ;;  %v3211_v35 = vpop.f32.mrf.mxu0 }
 0x412   : > { %v8152_v38 = vadd.f32 %v3679_v46, %v3663_v44   ;;  %v3489_v12 = vmul.f32 0.5, %v5118_v54  ;;  %5143 = vtanh.f32 %v3523_v45  ;;  %v3435_v41 = vadd.f32 %v3205_v14, %v3049_v20  ;;  %v8168_v8 = vpop.permute.xlu0 %3788  ;;  %v5126_v14 = vpop.eup %5125 }
 0x413   : > { %8726 = vst [vmem:[#allocation104_spill] sm:$0xff] %v8150_v34  ;;  %v8727_v50 = vmov %v8150_v34  ;;  %v8159_v53 = vadd.f32 0.5, %v3629_v30  ;;  %v3664_v3 = vmul.f32 %v5503_v25, %v3568_v23  ;;  %5145 = vtanh.f32 %v3429_v0  ;;  %v8171_v30 = vpop.permute.xlu1 %3791  ;;  %v5128_v25 = vpop.eup %5127 }
 0x414   : > { %v8166_v6 = vsel %vm3820_vm4, %v8727_v50, %v5463_v6   ;;  %v3630_v52 = vmul.f32 0.5, %v5120_v39  ;;  %5147 = vtanh.f32 %v8152_v38  ;;  %v3553_v44 = vmul.f32 0.5, %v5124_v59  ;;  %v8179_v23 = vpop.f32.mrf.mxu1 }
 0x415   : > { %v8728_v56 = vmov %v8166_v6  ;;  %v3460_v32 = vmul.f32 0.5, %v3435_v41  ;;  %vm3823_vm7 = vcmp.eq.s32.totalorder %v8168_v8, 1  ;;  %v3680_v0 = vmul.f32 %v5126_v14, %v3504_v27  ;;  %v5130_v54 = vpop.eup %5129 }
 0x416   : > { %v3430_v58 = vadd.f32 %v8094_v48, %v3044_v47  ;;  %v3436_v20 = vadd.f32 %v3207_v9, %v3050_v62  ;;  %v3433_v6 = vadd.f32 %v8121_v42, %v3047_v11  ;;  %vm3824_vm8 = vcmp.eq.s32.totalorder %v8171_v30, 1  ;;  %v5132_v34 = vpop.eup %5131  ;;  %v3053_v9 = vld [vmem:[%s7956_s28 + $0x1c0] sm:$0xff]  ;;  %v3213_v42 = vpop.f32.mrf.mxu0 }
 0x417   : > { %v3505_v46 = vadd.f32 0.5, %v3489_v12  ;;  %v3569_v45 = vadd.f32 0.5, %v3553_v44  ;;  %5149 = vtanh.f32 %v3601_v36  ;;  %v8177_v39 = vmul.f32 %v5122_v31, %v3644_v40   ;;  %v5134_v47 = vpop.eup %5133  ;;  %v3048_v36 = vld [vmem:[%s7956_s28 + $0x198] sm:$0xff]  ;;  %v3054_v40 = vld [vmem:[%s7956_s28 + $0x1c8] sm:$0xff] }
 0x418   : > { %v8181_v27 = vadd.f32 %v3680_v0, %v3664_v3   ;;  %v3490_v41 = vmul.f32 0.5, %v5128_v25  ;;  %5151 = vtanh.f32 %v3460_v32  ;;  %v3524_v48 = vmul.f32 0.5, %v3436_v20  ;;  %v5136_v31 = vpop.eup %5135  ;;  %v8198_v3 = vpop.permute.xlu0 %3794 }
 0x419   : > { %8729 = vst [vmem:[#allocation105_spill] sm:$0xff] %v8177_v39  ;;  %v8730_v59 = vmov %v8177_v39  ;;  %v3665_v62 = vmul.f32 %v5499_v22, %v3569_v45  ;;  %v3554_v12 = vmul.f32 0.5, %v5132_v34  ;;  %v3602_v11 = vmul.f32 0.5, %v3430_v58  ;;  %v3372_v20 = vpop.f32.mrf.mxu1 }
 0x41a   : > { %5153 = vtanh.f32 %v3433_v6  ;;  %v3646_v14 = vadd.f32 0.5, %v3630_v52  ;;  %v8192_v15 = vsel %vm3822_vm5, %v8730_v59, %v5455_v15   ;;  %v8196_v22 = vmul.f32 %v8104_v37, %v8136_v26   ;;  %v3051_v52 = vld [vmem:[%s7956_s28 + $0x1b0] sm:$0xff]  ;;  %v3217_v26 = vpop.f32.mrf.mxu0 }
 0x41b   : > { %5155 = vtanh.f32 %v8181_v27  ;;  %v8731_v0 = vmov %v8192_v15  ;;  %v3631_v44 = vmul.f32 0.5, %v5130_v54  ;;  %v3570_v32 = vadd.f32 0.5, %v3554_v12  ;;  %v5138_v6 = vpop.eup %5137 }
 0x41c   : > { %8732 = vst [vmem:[#allocation106_spill] sm:$0xff] %v8196_v22  ;;  %v8733_v63 = vmov %v8196_v22  ;;  %v3681_v25 = vmul.f32 %v5136_v31, %v3505_v46  ;;  %v3439_v58 = vadd.f32 %v3211_v35, %v3053_v9  ;;  %vm3825_vm9 = vcmp.eq.s32.totalorder %v8198_v3, 1  ;;  %v5140_v54 = vpop.eup %5139 }
 0x41d   : > { %5157 = vtanh.f32 %v3524_v48  ;;  %v8206_v4 = vsel %vm3821_vm6, %v8733_v63, %v5459_v4   ;;  %v3434_v15 = vadd.f32 %v8141_v7, %v3048_v36  ;;  %v3440_v37 = vadd.f32 %v3213_v42, %v3054_v40  ;;  %v5142_v45 = vpop.eup %5141  ;;  %v3055_v36 = vld [vmem:[%s7956_s28 + $0x1d0] sm:$0xff] }
 0x41e   : > { %v8734_v55 = vmov %v8206_v4  ;;  %v3506_v46 = vadd.f32 0.5, %v3490_v41  ;;  %v8210_v22 = vadd.f32 %v3681_v25, %v3665_v62   ;;  %5159 = vtanh.f32 %v3602_v11  ;;  %v3374_v41 = vpop.f32.mrf.mxu1 }
 0x41f   : > { %v3461_v35 = vmul.f32 0.5, %v3439_v58  ;;  %v3603_v39 = vmul.f32 0.5, %v3434_v15  ;;  %v3525_v34 = vmul.f32 0.5, %v3440_v37  ;;  %v3437_v48 = vadd.f32 %v8157_v43, %v3051_v52  ;;  %v5144_v9 = vpop.eup %5143  ;;  %v3058_v43 = vld [vmem:[%s7956_s28 + $0x1e8] sm:$0xff]  ;;  %v3059_v15 = vld [vmem:[%s7956_s28 + $0x1f0] sm:$0xff] }
 0x420   : > { %v8214_v42 = vmul.f32 %v5134_v47, %v8159_v53   ;;  %5161 = vtanh.f32 %v8210_v22  ;;  %v3491_v4 = vmul.f32 0.5, %v5140_v54  ;;  %v8217_v33 = vmul.f32 %v5142_v45, %v3646_v14   ;;  %v3219_v47 = vpop.f32.mrf.mxu0  ;;  %v5146_v12 = vpop.eup %5145  ;;  %v3903_v22 = vld [vmem:[%s8521_s5 + $0x18] sm:$0xff] (%p8296_p0) }
 0x421   : > { %v3443_v7 = vadd.f32 %v3217_v26, %v3057_v29  ;;  %v3666_v62 = vmul.f32 %v5495_v24, %v3570_v32  ;;  %5163 = vtanh.f32 %v3461_v35  ;;  %v3555_v11 = vmul.f32 0.5, %v5144_v9  ;;  %v5148_v40 = vpop.eup %5147  ;;  %v3378_v37 = vpop.f32.mrf.mxu1 }
 0x422   : > { %v8735_v49 = vmov %v8217_v33  ;;  %v8224_v13 = vsel %vm3823_vm7, %v8214_v42, %v5451_v13   ;;  %5165 = vtanh.f32 %v3603_v39  ;;  %v3647_v31 = vadd.f32 0.5, %v3631_v44  ;;  %v3904_v42 = vld [vmem:[%s8521_s5 + $0x20] sm:$0xff] (%p8296_p0) }
 0x423   : > { %v8736_v53 = vmov %v8224_v13  ;;  %v8231_v2 = vsel %vm3824_vm8, %v8735_v49, %v5447_v2   ;;  %v3462_v24 = vmul.f32 0.5, %v3443_v7  ;;  %v3632_v14 = vmul.f32 0.5, %v5138_v6  ;;  %v3052_v13 = vld [vmem:[%s7956_s28 + $0x1b8] sm:$0xff] }
 0x424   : > { %8737 = vst [vmem:[#allocation107_spill] sm:$0xff] %v8231_v2  ;;  %v8738_v58 = vmov %v8231_v2  ;;  %v3682_v8 = vmul.f32 %v5146_v12, %v3506_v46  ;;  %5167 = vtanh.f32 %v3525_v34  ;;  %v3507_v32 = vadd.f32 0.5, %v3491_v4  ;;  %v5150_v29 = vpop.eup %5149 }
 0x425   : > { %v3571_v25 = vadd.f32 0.5, %v3555_v11  ;;  %5169 = vtanh.f32 %v3437_v48  ;;  %v3444_v52 = vadd.f32 %v3219_v47, %v3058_v43  ;;  %v3441_v2 = vadd.f32 %v3372_v20, %v3055_v36  ;;  %v5152_v30 = vpop.eup %5151  ;;  %v3056_v20 = vld [vmem:[%s7956_s28 + $0x1d8] sm:$0xff] }
 0x426   : > { %v8236_v26 = vadd.f32 %v3682_v8, %v3666_v62   ;;  %5171 = vtanh.f32 %v3462_v24  ;;  %v8238_v39 = vmul.f32 %v5148_v40, %v3647_v31   ;;  %v3438_v6 = vadd.f32 %v8179_v23, %v3052_v13  ;;  %v3060_v47 = vld [vmem:[%s7956_s28 + $0x1f8] sm:$0xff] }
 0x427   : > { %v3667_v44 = vmul.f32 %v5491_v19, %v3571_v25  ;;  %v3526_v54 = vmul.f32 0.5, %v3444_v52  ;;  %v5154_v46 = vpop.eup %5153  ;;  %v3648_v35 = vadd.f32 0.5, %v3632_v14  ;;  %v3445_v45 = vadd.f32 %v3378_v37, %v3059_v15  ;;  %v3798_v19 = vpop.permute.xlu1 %3797 }
 0x428   : > { %5173 = vtanh.f32 %v8236_v26  ;;  %v8247_v16 = vsel %vm3825_vm9, %v8238_v39, %v5443_v16   ;;  %v5156_v34 = vpop.eup %5155  ;;  %v3633_v48 = vmul.f32 0.5, %v5150_v29  ;;  %v3683_v4 = vmul.f32 %v5154_v46, %v3507_v32  ;;  %v3902_v39 = vld [vmem:[%s8521_s5 + $0x10] sm:$0xff] (%p8296_p0) }
 0x429   : > { %v8739_v62 = vmov %v8247_v16  ;;  %5175 = vtanh.f32 %v3526_v54  ;;  %v8250_v23 = vmul.f32 %v5156_v34, %v3648_v35   ;;  %vm3826_vm10 = vcmp.eq.s32.totalorder %v3798_v19, 1  ;;  %v3380_v16 = vpop.f32.mrf.mxu1 }
 0x42a   : > { %5177 = vtanh.f32 %v3441_v2  ;;  %v5158_v33 = vpop.eup %5157  ;;  %v3492_v7 = vmul.f32 0.5, %v5152_v30  ;;  %v8252_v19 = vadd.f32 %v3683_v4, %v3667_v44   ;;  %v3604_v9 = vmul.f32 0.5, %v3438_v6  ;;  %4588 = vmatprep.mubr.f32.mxu1 (%p8296_p0), %v8739_v62 }
 0x42b   : > { %v8740_v43 = vmov %v8250_v23  ;;  %v3442_v3 = vadd.f32 %v3374_v41, %v3056_v20  ;;  %v5160_v12 = vpop.eup %5159  ;;  %v3556_v11 = vmul.f32 0.5, %v5158_v33  ;;  %5179 = vtanh.f32 %v3445_v45  ;;  %v3801_v41 = vpop.permute.xlu0 %3800 }
 0x42c   : > { %v8257_v17 = vsel %vm3826_vm10, %v8740_v43, %v5439_v17   ;;  %v3649_v24 = vadd.f32 0.5, %v3633_v48  ;;  %5181 = vtanh.f32 %v8252_v19  ;;  %v3446_v31 = vadd.f32 %v3380_v16, %v3060_v47  ;;  %v3804_v33 = vpop.permute.xlu1 %3803 }
 0x42d   : > { %v8741_v52 = vmov %v8257_v17  ;;  %v5162_v36 = vpop.eup %5161  ;;  %v3572_v40 = vadd.f32 0.5, %v3556_v11  ;;  %v3508_v8 = vadd.f32 0.5, %v3492_v7  ;;  %5183 = vtanh.f32 %v3604_v9 }
 0x42e   : > { %v5164_v14 = vpop.eup %5163  ;;  %v3605_v13 = vmul.f32 0.5, %v3442_v3  ;;  %v8260_v32 = vmul.f32 %v5162_v36, %v3649_v24   ;;  %v3634_v15 = vmul.f32 0.5, %v5160_v12  ;;  %vm3827_vm11 = vcmp.eq.s32.totalorder %v3801_v41, 1 }
 0x42f   : > { %v5166_v25 = vpop.eup %5165  ;;  %v3493_v37 = vmul.f32 0.5, %v5164_v14  ;;  %v3668_v17 = vmul.f32 %v5487_v21, %v3572_v40  ;;  %v3606_v6 = vmul.f32 0.5, %v3446_v31  ;;  %vm3828_vm12 = vcmp.eq.s32.totalorder %v3804_v33, 1  ;;  %v8745_v31 = vld [vmem:[#allocation93_spill] sm:$0xff]  ;;  %v8750_v33 = vld [vmem:[#allocation90_spill] sm:$0xff] }
 0x430   : > { %v8742_v44 = vmov %v8260_v32  ;;  %5185 = vtanh.f32 %v3605_v13  ;;  %v3650_v20 = vadd.f32 0.5, %v3634_v15  ;;  %v3635_v23 = vmul.f32 0.5, %v5166_v25  ;;  %v3807_v13 = vpop.permute.xlu0 %3806  ;;  %v8746_v32 = vld [vmem:[#allocation92_spill] sm:$0xff] }
 0x431   : > { %v5168_v29 = vpop.eup %5167  ;;  %v8265_v10 = vsel %vm3827_vm11, %v8742_v44, %v5435_v10   ;;  %v3509_v45 = vadd.f32 0.5, %v3493_v37  ;;  %5187 = vtanh.f32 %v3606_v6  ;;  %vm3829_vm13 = vcmp.eq.s32.totalorder %v3807_v13, 1  ;;  %v8748_v6 = vld [vmem:[#allocation91_spill] sm:$0xff] }
 0x432   : > { %v8743_v54 = vmov %v8265_v10  ;;  %v5170_v2 = vpop.eup %5169  ;;  %v3557_v30 = vmul.f32 0.5, %v5168_v29  ;;  %v3651_v11 = vadd.f32 0.5, %v3635_v23  ;;  %v8768_v13 = vmov %v8736_v53 }
 0x433   : > { %v5172_v46 = vpop.eup %5171  ;;  %v3684_v35 = vmul.f32 %v5170_v2, %v3508_v8  ;;  %v3810_v2 = vpop.permute.xlu1 %3809 }
 0x434   : > { %v3573_v34 = vadd.f32 0.5, %v3557_v30  ;;  %v3494_v48 = vmul.f32 0.5, %v5172_v46  ;;  %vm3830_vm14 = vcmp.eq.s32.totalorder %v3810_v2, 1  ;;  %v8767_v2 = vmov %v8738_v58  ;;  %v3915_v58 = vld [vmem:[%s8521_s5 + $0x78] sm:$0xff] (%p8296_p0) }
 0x435   : > { %v5174_v4 = vpop.eup %5173  ;;  %v8267_v21 = vadd.f32 %v3684_v35, %v3668_v17   ;;  %4544 = vmatprep.subr.mxu0 (%p8296_p0), %v3915_v58  ;;  %4600 = vmatprep.subr.mxu1 (%p8296_p0), %v3915_v58 }
 0x436   : > { %v5176_v7 = vpop.eup %5175  ;;  %v3669_v9 = vmul.f32 %v5483_v18, %v3573_v34  ;;  %v8270_v40 = vmul.f32 %v5174_v4, %v3650_v20   ;;  %v3510_v3 = vadd.f32 0.5, %v3494_v48  ;;  %v3813_v20 = vpop.permute.xlu0 %3812  ;;  %4545 = vmatpush3.msra.mxu0 (%p8296_p0), %v3915_v58  ;;  %4616 = vmatpush3.msra.mxu1 (%p8296_p0), %v3915_v58  ;;  %v3901_v58 = vld [vmem:[%s8521_s5 + $0x8] sm:$0xff] (%p8296_p0) }
 0x437   : > { %v5178_v10 = vpop.eup %5177  ;;  %5189 = vtanh.f32 %v8267_v21  ;;  %v3558_v47 = vmul.f32 0.5, %v5176_v7  ;;  %v3816_v4 = vpop.permute.xlu1 %3815  ;;  %vm3831_vm15 = vcmp.eq.s32.totalorder %v3813_v20, 1  ;;  %v8753_v7 = vld [vmem:[#allocation89_spill] sm:$0xff] }
 0x438   : > { %v3685_v16 = vmul.f32 %v5178_v10, %v3509_v45  ;;  %v8275_v1 = vsel %vm3828_vm12, %v8270_v40, %v5431_v1   ;;  %v5180_v12 = vpop.eup %5179  ;;  %vm3832_vm0 = vcmp.eq.s32.totalorder %v3816_v4, 1  ;;  %v8764_v10 = vmov %v8743_v54  ;;  %v3912_v21 = vld [vmem:[%s8521_s5 + $0x60] sm:$0xff] (%p8296_p0) }
 0x439   : > { %v8744_v50 = vmov %v8275_v1  ;;  %v3574_v24 = vadd.f32 0.5, %v3558_v47  ;;  %v5182_v36 = vpop.eup %5181  ;;  %v3686_v8 = vmul.f32 %v5180_v12, %v3510_v3  ;;  %v8770_v4 = vmov %v8734_v55  ;;  %v8793_v47 = vld [vmem:[#allocation99_spill] sm:$0xff] }
 0x43a   : > { %v3701_v18 = vadd.f32 %v3685_v16, %v3669_v9   ;;  %v8278_v35 = vmul.f32 %v5182_v36, %v3651_v11   ;;  %v5184_v41 = vpop.eup %5183  ;;  %v8766_v16 = vmov %v8739_v62  ;;  %v8772_v3 = vmov %v8722_v61  ;;  %v8797_v62 = vld [vmem:[#allocation107_spill] sm:$0xff] (%p8296_p0) }
 0x43b   : > { %v3670_v14 = vmul.f32 %v8745_v31, %v3574_v24  ;;  %v3636_v1 = vmul.f32 0.5, %v5184_v41  ;;  %v8775_v24 = vmov %v8236_v26  ;;  %v8778_v26 = vld [vmem:[#allocation102_spill] sm:$0xff]  ;;  %v8786_v41 = vmov %v8740_v43 }
 0x43c   : > { %5191 = vtanh.f32 %v3701_v18  ;;  %v8282_v12 = vsel %vm3829_vm13, %v8278_v35, %v8746_v32   ;;  %v8781_v32 = vld [vmem:[#allocation97_spill] sm:$0xff]  ;;  %v8784_v31 = vld [vmem:[#allocation94_spill] sm:$0xff]  ;;  %v3913_v18 = vld [vmem:[%s8521_s5 + $0x68] sm:$0xff] (%p8296_p0) }
 0x43d   : > { %v3702_v11 = vadd.f32 %v3686_v8, %v3670_v14   ;;  %v8747_v63 = vmov %v8282_v12  ;;  %v5186_v25 = vpop.eup %5185  ;;  %v3652_v37 = vadd.f32 0.5, %v3636_v1  ;;  %v8763_v1 = vmov %v8744_v50  ;;  %v8789_v43 = vld [vmem:[#allocation106_spill] sm:$0xff] }
 0x43e   : > { %v5188_v15 = vpop.eup %5187  ;;  %v3637_v17 = vmul.f32 0.5, %v5186_v25  ;;  %v8762_v12 = vmov %v8747_v63  ;;  %v8774_v8 = vmov %v8718_v57  ;;  %v8776_v25 = vmov %v8181_v27  ;;  %v8780_v27 = vld [vmem:[#allocation98_spill] sm:$0xff]  ;;  %v3911_v57 = vld [vmem:[%s8521_s5 + $0x58] sm:$0xff] (%p8296_p0) }
 0x43f   : > { %5193 = vtanh.f32 %v3702_v11  ;;  %v3638_v30 = vmul.f32 0.5, %v5188_v15  ;;  %v8769_v15 = vmov %v8731_v0  ;;  %v3905_v27 = vld [vmem:[%s8521_s5 + $0x28] sm:$0xff] (%p8296_p0)  ;;  %v3900_v26 = vld [vmem:[%s8521_s5] sm:$0xff] (%p8296_p0) }
 0x440   : > { %v3653_v46 = vadd.f32 0.5, %v3637_v17  ;;  %v8765_v17 = vmov %v8741_v52 }
 0x441   : > { %v3654_v48 = vadd.f32 0.5, %v3638_v30  ;;  %v8782_v30 = vld [vmem:[#allocation96_spill] sm:$0xff] }
 0x444   : > { %v5190_v29 = vpop.eup %5189 }
 0x445   : > { %v3732_v37 = vmul.f32 %v5190_v29, %v3652_v37   ;;  %v8779_v29 = vld [vmem:[#allocation100_spill] sm:$0xff] }
 0x447   : > { %v8285_v9 = vsel %vm3830_vm14, %v3732_v37, %v8748_v6   ;;  %v8771_v6 = vmov %v8728_v56 }
 0x448   : > { %v8749_v59 = vmov %v8285_v9 }
 0x449   : > { %v5192_v45 = vpop.eup %5191  ;;  %v8761_v9 = vmov %v8749_v59 }
 0x44a   : > { %v3733_v34 = vmul.f32 %v5192_v45, %v3653_v46   ;;  %v8788_v45 = vld [vmem:[#allocation105_spill] sm:$0xff] }
 0x44b   : > { %v8791_v46 = vld [vmem:[#allocation101_spill] sm:$0xff] }
 0x44c   : > { %v5194_v23 = vpop.eup %5193  ;;  %v8288_v20 = vsel %vm3831_vm15, %v3733_v34, %v8750_v33   ;;  %v8783_v33 = vld [vmem:[#allocation95_spill] sm:$0xff] }
 0x44d   : > { %8751 = vst [vmem:[#allocation108_spill] sm:$0xff] %v8288_v20  ;;  %v3734_v36 = vmul.f32 %v5194_v23, %v3654_v48   ;;  %v8759_v60 = vmov %v8288_v20  ;;  %v8777_v23 = vmov %v8152_v38  ;;  %v8785_v38 = vmov %v8742_v44  ;;  %v8790_v48 = vld [vmem:[#allocation104_spill] sm:$0xff]  ;;  %2941 = sbr.rel (!%p8296_p0) target bundleno = 748 (0x2ec), region = 64 }
 0x44e   : > { %v8760_v20 = vmov %v8759_v60  ;;  %v8787_v44 = vmov %v8735_v49  ;;  %v8792_v49 = vld [vmem:[#allocation103_spill] sm:$0xff]  ;;  %v3914_v60 = vld [vmem:[%s8521_s5 + $0x70] sm:$0xff] (%p8296_p0) }
 0x44f   : > { %v8291_v14 = vsel %vm3832_vm0, %v3734_v36, %v8753_v7   ;;  %v8773_v7 = vmov %v8725_v5  ;;  %4546 = vmatprep.subr.mxu0 (%p8296_p0), %v3914_v60  ;;  %4601 = vmatprep.subr.mxu1 (%p8296_p0), %v3914_v60  ;;  %v3909_v49 = vld [vmem:[%s8521_s5 + $0x48] sm:$0xff] (%p8296_p0)  ;;  %v3906_v38 = vld [vmem:[%s8521_s5 + $0x30] sm:$0xff] (%p8296_p0) }
 0x450   : > { %8754 = vst [vmem:[#allocation109_spill] sm:$0xff] %v8291_v14  ;;  %v8757_v51 = vmov %v8291_v14  ;;  %4547 = vmatpush3.msra.mxu0 (%p8296_p0), %v3914_v60  ;;  %4617 = vmatpush3.msra.mxu1 (%p8296_p0), %v3914_v60  ;;  %v3910_v60 = vld [vmem:[%s8521_s5 + $0x50] sm:$0xff] (%p8296_p0) }
 0x451   : > { %v8758_v14 = vmov %v8757_v51  ;;  %v8795_v51 = vld [vmem:[#allocation99_spill] sm:$0xff] (%p8296_p0)  ;;  %4548 = vmatprep.subr.mxu0 (%p8296_p0), %v3913_v18  ;;  %4602 = vmatprep.subr.mxu1 (%p8296_p0), %v3913_v18 }
 0x452   :  { %3849 = vst [vmem:[#allocation3 + $0x30] sm:$0xff] %v8795_v51  ;;  %4549 = vmatpush3.msra.mxu0 %v3913_v18  ;;  %4618 = vmatpush3.msra.mxu1 %v3913_v18  ;;  %v3908_v51 = vld [vmem:[%s8521_s5 + $0x40] sm:$0xff] }
 0x453   :  { %4550 = vmatprep.subr.mxu0 %v3912_v21  ;;  %4603 = vmatprep.subr.mxu1 %v3912_v21 }
 0x454   :  { %4551 = vmatpush3.msra.mxu0 %v3912_v21  ;;  %4619 = vmatpush3.msra.mxu1 %v3912_v21 }
 0x455   :  { %4552 = vmatprep.subr.mxu0 %v3911_v57  ;;  %4604 = vmatprep.subr.mxu1 %v3911_v57 }
 0x456   :  { %4553 = vmatpush3.msra.mxu0 %v3911_v57  ;;  %4620 = vmatpush3.msra.mxu1 %v3911_v57 }
 0x457   :  { %4554 = vmatprep.subr.mxu0 %v3910_v60  ;;  %4605 = vmatprep.subr.mxu1 %v3910_v60 }
 0x458   :  { %4555 = vmatpush3.msra.mxu0 %v3910_v60  ;;  %4621 = vmatpush3.msra.mxu1 %v3910_v60 }
 0x459   :  { %4556 = vmatprep.subr.mxu0 %v3909_v49  ;;  %4606 = vmatprep.subr.mxu1 %v3909_v49 }
 0x45a   :  { %4557 = vmatpush3.msra.mxu0 %v3909_v49  ;;  %4622 = vmatpush3.msra.mxu1 %v3909_v49 }
 0x45b   :  { %4558 = vmatprep.subr.mxu0 %v3908_v51  ;;  %4607 = vmatprep.subr.mxu1 %v3908_v51 }
 0x45c   :  { %4559 = vmatpush3.msra.mxu0 %v3908_v51  ;;  %4623 = vmatpush3.msra.mxu1 %v3908_v51 }
 0x45d   :  { %4560 = vmatprep.subr.mxu0 %v3907_v28  ;;  %4608 = vmatprep.subr.mxu1 %v3907_v28 }
 0x45e   :  { %4561 = vmatpush3.msra.mxu0 %v3907_v28  ;;  %4624 = vmatpush3.msra.mxu1 %v3907_v28 }
 0x45f   :  { %4562 = vmatprep.subr.mxu0 %v3906_v38  ;;  %4609 = vmatprep.subr.mxu1 %v3906_v38 }
 0x460   :  { %4563 = vmatpush3.msra.mxu0 %v3906_v38  ;;  %4625 = vmatpush3.msra.mxu1 %v3906_v38 }
 0x461   :  { %4564 = vmatprep.subr.mxu0 %v3905_v27  ;;  %4610 = vmatprep.subr.mxu1 %v3905_v27 }
 0x462   :  { %4565 = vmatpush3.msra.mxu0 %v3905_v27  ;;  %4626 = vmatpush3.msra.mxu1 %v3905_v27 }
 0x463   :  { %4566 = vmatprep.subr.mxu0 %v3904_v42  ;;  %4611 = vmatprep.subr.mxu1 %v3904_v42 }
 0x464   :  { %4567 = vmatpush3.msra.mxu0 %v3904_v42  ;;  %4627 = vmatpush3.msra.mxu1 %v3904_v42 }
 0x465   :  { %4568 = vmatprep.subr.mxu0 %v3903_v22  ;;  %4612 = vmatprep.subr.mxu1 %v3903_v22 }
 0x466   :  { %4569 = vmatpush3.msra.mxu0 %v3903_v22  ;;  %4628 = vmatpush3.msra.mxu1 %v3903_v22 }
 0x467   :  { %4570 = vmatprep.subr.mxu0 %v3902_v39  ;;  %4613 = vmatprep.subr.mxu1 %v3902_v39 }
 0x468   :  { %4571 = vmatpush3.msra.mxu0 %v3902_v39  ;;  %4629 = vmatpush3.msra.mxu1 %v3902_v39 }
 0x469   :  { %4572 = vmatprep.subr.mxu0 %v3901_v58  ;;  %4614 = vmatprep.subr.mxu1 %v3901_v58 }
 0x46a   :  { %4573 = vmatpush3.msra.mxu0 %v3901_v58  ;;  %4630 = vmatpush3.msra.mxu1 %v3901_v58 }
 0x46b   :  { %4574 = vmatprep.subr.mxu0 %v3900_v26  ;;  %4615 = vmatprep.subr.mxu1 %v3900_v26 }
 0x46c   :  { %4575 = vmatpush3.msra.mxu0 %v3900_v26  ;;  %4631 = vmatpush3.msra.mxu1 %v3900_v26 }
 0x46d   :  { %4577 = vmatmul.mubr.f32.vlgmr.msra.gmra.mxu0 %v8725_v5  ;;  %4589 = vmatmul.mubr.f32.vlgmr.msra.gmra.mxu1 %v8741_v52  ;;  %v8796_v5 = vld [vmem:[#allocation108_spill] sm:$0xff] }
 0x46e   :  { %4579 = vmatprep.mubr.f32.mxu0 %v8722_v61  ;;  %4591 = vmatprep.mubr.f32.mxu1 %v8743_v54  ;;  %v8798_v61 = vld [vmem:[#allocation109_spill] sm:$0xff] }
 0x471   :  { %4580 = vmatmul.mubr.f32.gmra.mxu0 %v8728_v56  ;;  %4592 = vmatmul.mubr.f32.gmra.mxu1 %v8744_v50  ;;  %v4510_v50 = vld [vmem:[%s8522_s6] ss:$0 sm:$0xff]  ;;  %s5612_s6 = smov [#allocation6]  }
 0x472   :  { %4582 = vmatprep.mubr.f32.mxu0 %v8734_v55  ;;  %4594 = vmatprep.mubr.f32.mxu1 %v8747_v63  ;;  %s4089_s13 = sshll.u32 %s5612_s6, 4  ;;  %s4090_s13 = int_to_ptr.vmem [resolvable:$true] %s4089_s13 }
 0x473   :  { %s5195_s14 = scalar_lea.vmem %s4090_s13, 2048  ;;  %p5200_p2 = scmp.lt.s32.totalorder %s4090_s13, %s4090_s13 }
 0x474   :  { %p5196_p1 = scmp.ne.s32.totalorder %s4090_s13, %s5195_s14  ;;  %p5201_p3 = scmp.lt.s32.totalorder %s5195_s14, %s5195_s14 }
 0x475   :  { %4583 = vmatmul.mubr.f32.gmra.mxu0 %v8731_v0  ;;  %4595 = vmatmul.mubr.f32.gmra.mxu1 %v8749_v59 }
 0x476   :  { %4585 = vmatprep.mubr.f32.mxu0 %v8736_v53  ;;  %4597 = vmatprep.mubr.f32.mxu1 %v8796_v5  ;;  %p5202_p4 = por %p5201_p3, %p5200_p2 }
 0x478   :  { %p5203_p5 = pnand %p5202_p4, %p5196_p1 }
 0x479   :  { %4586 = vmatmul.mubr.f32.gmra.mxu0 %v8797_v62  ;;  %4598 = vmatmul.mubr.f32.gmra.mxu1 %v8798_v61 }
 0x52d   :  { %v4578_v56 = vpop.f32.mrf.mxu0  ;;  %v4590_v55 = vpop.f32.mrf.mxu1 }
 0x52e   :  { %v3995_v19 = vadd.f32 %v4578_v56, %v4510_v50  ;;  %v4035_v63 = vadd.f32 %v4590_v55, %v4510_v50 }
 0x52f   :  { %v3989_v43 = vpop.f32.mrf.mxu0  ;;  %v4029_v0 = vpop.f32.mrf.mxu1 }
 0x530   :  { %4069 = vst [vmem:[#allocation6 + $0x8] sm:$0xff] %v3995_v19  ;;  %4077 = vst [vmem:[#allocation6 + $0x48] sm:$0xff] %v4035_v63  ;;  %v3990_v59 = vadd.f32 %v4510_v50, %v3989_v43  ;;  %v4030_v53 = vadd.f32 %v4510_v50, %v4029_v0 }
 0x531   :  { %v4581_v52 = vpop.f32.mrf.mxu0  ;;  %v4593_v40 = vpop.f32.mrf.mxu1 }
 0x532   :  { %4068 = vst [vmem:[#allocation6] sm:$0xff] %v3990_v59  ;;  %4076 = vst [vmem:[#allocation6 + $0x40] sm:$0xff] %v4030_v53  ;;  %v4005_v44 = vadd.f32 %v4581_v52, %v4510_v50  ;;  %v4045_v54 = vadd.f32 %v4593_v40, %v4510_v50 }
 0x533   :  { %v3999_v35 = vpop.f32.mrf.mxu0  ;;  %v4039_v34 = vpop.f32.mrf.mxu1 }
 0x534   :  { %4071 = vst [vmem:[#allocation6 + $0x18] sm:$0xff] %v4005_v44  ;;  %4079 = vst [vmem:[#allocation6 + $0x58] sm:$0xff] %v4045_v54  ;;  %v4000_v9 = vadd.f32 %v4510_v50, %v3999_v35  ;;  %v4040_v10 = vadd.f32 %v4510_v50, %v4039_v34 }
 0x535   :  { %v4584_v3 = vpop.f32.mrf.mxu0  ;;  %v4596_v47 = vpop.f32.mrf.mxu1 }
 0x536   :  { %4070 = vst [vmem:[#allocation6 + $0x10] sm:$0xff] %v4000_v9  ;;  %4078 = vst [vmem:[#allocation6 + $0x50] sm:$0xff] %v4040_v10  ;;  %v4015_v16 = vadd.f32 %v4584_v3, %v4510_v50  ;;  %v4055_v12 = vadd.f32 %v4596_v47, %v4510_v50 }
 0x537   :  { %v4009_v11 = vpop.f32.mrf.mxu0  ;;  %v4049_v24 = vpop.f32.mrf.mxu1 }
 0x538   :  { %4073 = vst [vmem:[#allocation6 + $0x28] sm:$0xff] %v4015_v16  ;;  %4081 = vst [vmem:[#allocation6 + $0x68] sm:$0xff] %v4055_v12  ;;  %v4010_v36 = vadd.f32 %v4510_v50, %v4009_v11  ;;  %v4050_v31 = vadd.f32 %v4510_v50, %v4049_v24 }
 0x539   :  { %v4587_v14 = vpop.f32.mrf.mxu0  ;;  %v4599_v8 = vpop.f32.mrf.mxu1 }
 0x53a   :  { %4072 = vst [vmem:[#allocation6 + $0x20] sm:$0xff] %v4010_v36  ;;  %4080 = vst [vmem:[#allocation6 + $0x60] sm:$0xff] %v4050_v31  ;;  %v4025_v13 = vadd.f32 %v4587_v14, %v4510_v50  ;;  %v4065_v41 = vadd.f32 %v4599_v8, %v4510_v50 }
 0x53b   :  { %v4019_v32 = vpop.f32.mrf.mxu0  ;;  %v4059_v1 = vpop.f32.mrf.mxu1 }
 0x53c   :  { %4075 = vst [vmem:[#allocation6 + $0x38] sm:$0xff] %v4025_v13  ;;  %4083 = vst [vmem:[#allocation6 + $0x78] sm:$0xff] %v4065_v41  ;;  %v4020_v25 = vadd.f32 %v4510_v50, %v4019_v32  ;;  %v4060_v15 = vadd.f32 %v4510_v50, %v4059_v1 }
 0x53e   :  { %4074 = vst [vmem:[#allocation6 + $0x30] sm:$0xff] %v4020_v25  ;;  %4082 = vst [vmem:[#allocation6 + $0x70] sm:$0xff] %v4060_v15 }
 0x53f   :  { %5206 = shalt.err (!%p5203_p5)
}
 0x540   :  { %s5613_s15 = smov 128   ;;  %s5614_s16 = smov 8  }
 0x541   :  { %4095 = dma.vmem_to_hbm [thread:$0]  %s4090_s13, 2048, %s8523_s7, [#allocation7], %s5613_s15, %s5613_s15, %s5614_s16  }
 0x542   :  { %5411 = dma.done.wait [#allocation7], 2048  }
 0x543   :  { %5412 = vsyncadd [#allocation7], 4294965248 }
 0x544   :  { %4099 = vsyncpa [#allocation7], 1 }

</bundles_post_ra>
